<compile_context>
chip_gen: v5e
topology: v5e:2x2
jax: 0.10.0
libtpu: 0.0.40
codegen_flags: <defaults>
</compile_context>

<pallas_src>
import functools

import jax
import jax.numpy as jnp
from jax.experimental import pallas as pl
from jax.experimental.pallas import tpu as pltpu


def _morphology_kernel(xm_ref, xh_ref, w_ref, out_ref, *,
                       C, K, O_pad, Wp, TL, beta, inv_beta,
                       soft_max, is_erosion, use_mxu):
    # xm_ref : (1, C, TL)      main lane tile of the flattened padded image
    # xh_ref : (1, C, HALO)    right halo (the next HALO lanes of the image)
    # w_ref  : (O_pad, K*K*C)  weight, lanes ordered (kh, kw, c), f32
    # out_ref: (1, O_pad, TL)
    sign = -1.0 if is_erosion else 1.0

    # Contiguous lane-dense slab covering this tile's TL working positions
    # plus a halo of >= (K-1)*(Wp+1) lanes; every patch tap is a STATIC lane
    # shift into this slab (no dynamic slicing, no patch-block concatenate).
    slab = jnp.concatenate([xm_ref[0], xh_ref[0]], axis=-1).astype(jnp.float32)
    taps = [(kh * K + kw, kh * Wp + kw) for kh in range(K) for kw in range(K)]
    w = w_ref[...]                                            # (O_pad, K*K*C)

    if soft_max:
        wb = w * beta                                         # tiny
        m_w = jnp.max(wb, axis=1, keepdims=True)              # (O_pad, 1)
        e_w = jnp.exp(wb - m_w)                               # (O_pad, K*K*C)
        sx = slab * (sign * beta)                             # (C, TL+HALO)
        m_x = jnp.max(jnp.max(sx, axis=1, keepdims=True),     # (1, 1) per-tile
                      axis=0, keepdims=True)
        ex = jnp.exp(sx - m_x)                                # ONE shared exp

        acc = jnp.zeros((O_pad, TL), jnp.float32)
        for tap, off in taps:
            if use_mxu:
                piece = ex[:, off:off + TL]                               # (C, TL)
                acc = acc + jnp.dot(e_w[:, tap * C:(tap + 1) * C], piece,
                                    preferred_element_type=jnp.float32)
            else:
                # Small O: VPU broadcast-FMA accumulation, no MXU push/drain
                # and no full-size cast of the exponentiated slab.
                for c in range(C):
                    acc = acc + (e_w[:, tap * C + c:tap * C + c + 1]
                                 * ex[c:c + 1, off:off + TL])
        # Factored LSE: logsumexp(beta*(w + sign*x)) = m_w + m_x + log(acc).
        r = (m_w + m_x + jnp.log(acc)) * inv_beta             # (O_pad, TL)
    else:
        xs = slab if sign > 0 else -slab
        r = jnp.full((O_pad, TL), -jnp.inf, jnp.float32)
        for tap, off in taps:
            for c in range(C):
                r = jnp.maximum(r, w[:, tap * C + c:tap * C + c + 1]
                                   + xs[c:c + 1, off:off + TL])

    if is_erosion:
        r = -r
    out_ref[0] = r.astype(out_ref.dtype)


def _round_up(x, m):
    return pl.cdiv(x, m) * m


def morphology_conv(x, weight, *, kernel_size, op_type, soft_max=True,
                    beta=15.0, lane_tile=2048):
    """x: (B, C, H, W); weight: (O, C, K, K).  Returns (B, O, H, W)."""
    if op_type not in ("erosion2d", "dilation2d"):
        raise ValueError(op_type)

    B, C, H, W = x.shape
    O = weight.shape[0]
    K = kernel_size

    pad_total = K - 1
    pad_beg = pad_total // 2
    pad_end = pad_total - pad_beg
    Hp, Wp = H + pad_total, W + pad_total

    # Halo = largest static patch offset, rounded up to a lane multiple.
    HALO = max(128, _round_up((K - 1) * (Wp + 1), 128))
    L_work = H * Wp                                    # working output lanes
    TL = _round_up(max(int(lane_tile), HALO), HALO)    # multiple of HALO (& 128)
    TL = max(HALO, min(TL, _round_up(L_work, HALO)))   # don't exceed the work
    n_tiles = pl.cdiv(L_work, TL)
    Lcomp = n_tiles * TL
    Lpad = _round_up(max(Lcomp + HALO, Hp * Wp), TL)   # lanes the kernel may read
    ratio = TL // HALO

    # 'same' padding + a FREE reshape flattening padded (H, W) onto one lane
    # axis (no im2col in HBM); zero-pad the lane axis up to Lpad.
    xp = jnp.pad(x, ((0, 0), (0, 0), (pad_beg, pad_end), (pad_beg, pad_end)))
    xflat = xp.reshape(B, C, Hp * Wp)
    xflat = jnp.pad(xflat, ((0, 0), (0, 0), (0, Lpad - Hp * Wp)))

    # Weight: (O, C, K, K) -> (O_pad, K*K*C), lanes ordered (kh, kw, c);
    # O padded to a sublane multiple so the epilogue runs on full vregs.
    O_pad = max(8, _round_up(O, 8))
    KKC = K * K * C
    w2 = jnp.transpose(weight, (0, 2, 3, 1)).reshape(O, KKC).astype(jnp.float32)
    if O_pad > O:
        w2 = jnp.pad(w2, ((0, O_pad - O), (0, 0)))

    use_mxu = O_pad > 8   # tiny O: VPU broadcast-FMA; larger O: per-tap MXU dot

    kernel = functools.partial(
        _morphology_kernel,
        C=C, K=K, O_pad=O_pad, Wp=Wp, TL=TL,
        beta=float(beta), inv_beta=1.0 / float(beta),
        soft_max=bool(soft_max), is_erosion=(op_type == "erosion2d"),
        use_mxu=use_mxu)

    # Per-tile VMEM footprint (double-buffered blocks + in-kernel temporaries),
    # with generous headroom, kept well under v7x's 64 MiB physical VMEM.
    itm = jnp.dtype(x.dtype).itemsize
    blk = 2 * (C * TL + C * HALO) * itm + 2 * O_pad * TL * itm + 2 * O_pad * KKC * 4
    tmp = (2 * C * (TL + HALO) + 3 * O_pad * TL) * 4
    vmem_limit = int(min(max(4 * (blk + tmp), 16 * 1024 * 1024),
                         48 * 1024 * 1024))

    out_work = pl.pallas_call(
        kernel,
        out_shape=jax.ShapeDtypeStruct((B, O_pad, Lcomp), x.dtype),
        grid=(B, n_tiles),
        in_specs=[
            # Main lane tile and its right halo: the SAME HBM array via two
            # blocked specs (the halo block (t+1)*ratio starts exactly where
            # the main tile ends), so HBM reads stay ~(1 + HALO/TL)x the input
            # and per-core VMEM is O(C*TL) rather than O(C*H*W).
            pl.BlockSpec((1, C, TL), lambda b, t: (b, 0, t)),
            pl.BlockSpec((1, C, HALO), lambda b, t: (b, 0, (t + 1) * ratio)),
            pl.BlockSpec((O_pad, KKC), lambda b, t: (0, 0)),
        ],
        out_specs=pl.BlockSpec((1, O_pad, TL), lambda b, t: (b, 0, t)),
        compiler_params=pltpu.CompilerParams(
            dimension_semantics=("parallel", "parallel"),
            vmem_limit_bytes=vmem_limit),
    )(xflat, xflat, w2)

    # Drop padded output channels and junk working positions.
    out = out_work[:, :O, :H * Wp].reshape(B, O, H, Wp)[:, :, :, :W]
    return out


def _reference(x, weight, *, kernel_size, op_type, soft_max=True, beta=15.0):
    """Pure-JAX reference mirroring the PyTorch forward, for validation."""
    B, C, H, W = x.shape
    O = weight.shape[0]
    K = kernel_size
    pad_beg = (K - 1) // 2
    pad_end = (K - 1) - pad_beg
    xp = jnp.pad(x, ((0, 0), (0, 0), (pad_beg, pad_end), (pad_beg, pad_end)))
    cols = []
    for kh in range(K):
        for kw in range(K):
            cols.append(xp[:, :, kh:kh + H, kw:kw + W])
    patches = jnp.stack(cols, axis=2).reshape(B, 1, C * K * K, H * W)
    w = weight.reshape(1, O, C * K * K, 1)
    t = (w - patches) if op_type == "erosion2d" else (w + patches)
    if soft_max:
        r = jax.scipy.special.logsumexp(t * beta, axis=2) / beta
    else:
        r = jnp.max(t, axis=2)
    if op_type == "erosion2d":
        r = -r
    return r.reshape(B, O, H, W)


if __name__ == "__main__":
    key = jax.random.PRNGKey(0)
    kx, kw, kw16 = jax.random.split(key, 3)
    B, C, O, H, W, K = 2, 4, 4, 16, 16, 5

    x = jax.random.normal(kx, (B, C, H, W), dtype=jnp.float32)
    # The module initialises the weight to ones; also exercise a bounded
    # random weight to validate the weight-dependent factored LSE.
    w_ones = jnp.ones((O, C, K, K), dtype=jnp.float32)
    w_rand = jax.random.uniform(kw, (O, C, K, K), dtype=jnp.float32)

    def check(weight, op_type, soft, tol, lane_tile=256):
        out = morphology_conv(x, weight, kernel_size=K, op_type=op_type,
                              soft_max=soft, beta=15.0, lane_tile=lane_tile)
        out = jax.block_until_ready(out)
        ref = _reference(x, weight, kernel_size=K, op_type=op_type,
                         soft_max=soft, beta=15.0)
        assert out.shape == ref.shape == (B, weight.shape[0], H, W)
        assert jnp.allclose(out, ref, atol=tol, rtol=tol), \
            f"mismatch: {op_type} soft_max={soft} O={weight.shape[0]}"

    # Soft-max path (module default) — VPU accumulation (small O), multi-tile
    # grid with the haloed lane tiles.
    check(w_ones, "erosion2d", True, 1e-4)
    check(w_rand, "dilation2d", True, 1e-4)
    # Hard-max path, both op types (erosion hard-max was previously untested).
    check(w_rand, "erosion2d", False, 1e-5)
    check(w_ones, "dilation2d", False, 1e-5)
    # Larger out_channels exercises the per-tap MXU matmul path.
    w16 = jax.random.uniform(kw16, (16, C, K, K), dtype=jnp.float32)
    check(w16, "dilation2d", True, 1e-4)

    print("KERNEL_OK")
</pallas_src>

<mosaic_0001>
module attributes {stable_mosaic.version = 11 : i64} {
  func.func @_morphology_kernel(%arg0: i32, %arg1: i32, %arg2: memref<1x4x256xf32, #tpu.memory_space<vmem>>, %arg3: memref<1x4x128xf32, #tpu.memory_space<vmem>>, %arg4: memref<8x100xf32, #tpu.memory_space<vmem>>, %arg5: memref<1x8x256xf32, #tpu.memory_space<vmem>>) attributes {dimension_semantics = [#tpu.dimension_semantics<parallel>, #tpu.dimension_semantics<parallel>], iteration_bounds = array<i64: 2, 2>, scalar_prefetch = 0 : i64, scratch_operands = 0 : i64, tpu.core_type = #tpu.core_type<tc>, window_params = [{transform_indices = @transform_0, window_bounds = array<i64: 1, 4, 256>}, {transform_indices = @transform_1, window_bounds = array<i64: 1, 4, 128>}, {pipeline_mode = #tpu.pipeline_mode<synchronous>, transform_indices = @transform_2, window_bounds = array<i64: 8, 100>}, {transform_indices = @transform_3, window_bounds = array<i64: 1, 8, 256>}]} {
    %c0 = arith.constant 0 : index
    %c0_0 = arith.constant 0 : index
    %c0_1 = arith.constant 0 : index
    %0 = vector.load %arg2[%c0, %c0_0, %c0_1] : memref<1x4x256xf32, #tpu.memory_space<vmem>>, vector<1x4x256xf32>
    %1 = vector.shape_cast %0 : vector<1x4x256xf32> to vector<4x256xf32>
    %c0_2 = arith.constant 0 : index
    %c0_3 = arith.constant 0 : index
    %c0_4 = arith.constant 0 : index
    %2 = vector.load %arg3[%c0_2, %c0_3, %c0_4] : memref<1x4x128xf32, #tpu.memory_space<vmem>>, vector<1x4x128xf32>
    %3 = vector.shape_cast %2 : vector<1x4x128xf32> to vector<4x128xf32>
    %4 = tpu.concatenate %1, %3 in 1 : vector<4x256xf32>, vector<4x128xf32> -> vector<4x384xf32>
    %c0_5 = arith.constant 0 : index
    %c0_6 = arith.constant 0 : index
    %5 = vector.load %arg4[%c0_5, %c0_6] : memref<8x100xf32, #tpu.memory_space<vmem>>, vector<8x100xf32>
    %cst = arith.constant 1.500000e+01 : f32
    %6 = vector.broadcast %cst : f32 to vector<8x100xf32>
    %7 = arith.mulf %5, %6 : vector<8x100xf32>
    %cst_7 = arith.constant dense<0xFF800000> : vector<8xf32>
    %8 = vector.multi_reduction <maximumf>, %7, %cst_7 [1] : vector<8x100xf32> to vector<8xf32>
    %9 = vector.shape_cast %8 : vector<8xf32> to vector<8x1xf32>
    %10 = vector.broadcast %9 : vector<8x1xf32> to vector<8x100xf32>
    %11 = arith.subf %7, %10 : vector<8x100xf32>
    %12 = math.exp %11 : vector<8x100xf32>
    %cst_8 = arith.constant -1.500000e+01 : f32
    %13 = vector.broadcast %cst_8 : f32 to vector<4x384xf32>
    %14 = arith.mulf %4, %13 : vector<4x384xf32>
    %cst_9 = arith.constant dense<0xFF800000> : vector<4xf32>
    %15 = vector.multi_reduction <maximumf>, %14, %cst_9 [1] : vector<4x384xf32> to vector<4xf32>
    %16 = vector.shape_cast %15 : vector<4xf32> to vector<4x1xf32>
    %cst_10 = arith.constant dense<0xFF800000> : vector<1xf32>
    %17 = vector.multi_reduction <maximumf>, %16, %cst_10 [0] : vector<4x1xf32> to vector<1xf32>
    %18 = vector.shape_cast %17 : vector<1xf32> to vector<1x1xf32>
    %19 = vector.broadcast %18 : vector<1x1xf32> to vector<4x384xf32>
    %20 = arith.subf %14, %19 : vector<4x384xf32>
    %21 = math.exp %20 : vector<4x384xf32>
    %cst_11 = arith.constant 0.000000e+00 : f32
    %22 = vector.broadcast %cst_11 : f32 to vector<8x256xf32>
    %23 = vector.extract_strided_slice %12 {offsets = [0, 0], sizes = [8, 1], strides = [1, 1]} : vector<8x100xf32> to vector<8x1xf32>
    %24 = vector.extract_strided_slice %21 {offsets = [0, 0], sizes = [1, 256], strides = [1, 1]} : vector<4x384xf32> to vector<1x256xf32>
    %25 = vector.broadcast %23 : vector<8x1xf32> to vector<8x256xf32>
    %26 = vector.broadcast %24 : vector<1x256xf32> to vector<8x256xf32>
    %27 = arith.mulf %25, %26 : vector<8x256xf32>
    %28 = arith.addf %22, %27 : vector<8x256xf32>
    %29 = vector.extract_strided_slice %12 {offsets = [0, 1], sizes = [8, 1], strides = [1, 1]} : vector<8x100xf32> to vector<8x1xf32>
    %30 = vector.extract_strided_slice %21 {offsets = [1, 0], sizes = [1, 256], strides = [1, 1]} : vector<4x384xf32> to vector<1x256xf32>
    %31 = vector.broadcast %29 : vector<8x1xf32> to vector<8x256xf32>
    %32 = vector.broadcast %30 : vector<1x256xf32> to vector<8x256xf32>
    %33 = arith.mulf %31, %32 : vector<8x256xf32>
    %34 = arith.addf %28, %33 : vector<8x256xf32>
    %35 = vector.extract_strided_slice %12 {offsets = [0, 2], sizes = [8, 1], strides = [1, 1]} : vector<8x100xf32> to vector<8x1xf32>
    %36 = vector.extract_strided_slice %21 {offsets = [2, 0], sizes = [1, 256], strides = [1, 1]} : vector<4x384xf32> to vector<1x256xf32>
    %37 = vector.broadcast %35 : vector<8x1xf32> to vector<8x256xf32>
    %38 = vector.broadcast %36 : vector<1x256xf32> to vector<8x256xf32>
    %39 = arith.mulf %37, %38 : vector<8x256xf32>
    %40 = arith.addf %34, %39 : vector<8x256xf32>
    %41 = vector.extract_strided_slice %12 {offsets = [0, 3], sizes = [8, 1], strides = [1, 1]} : vector<8x100xf32> to vector<8x1xf32>
    %42 = vector.extract_strided_slice %21 {offsets = [3, 0], sizes = [1, 256], strides = [1, 1]} : vector<4x384xf32> to vector<1x256xf32>
    %43 = vector.broadcast %41 : vector<8x1xf32> to vector<8x256xf32>
    %44 = vector.broadcast %42 : vector<1x256xf32> to vector<8x256xf32>
    %45 = arith.mulf %43, %44 : vector<8x256xf32>
    %46 = arith.addf %40, %45 : vector<8x256xf32>
    %47 = vector.extract_strided_slice %12 {offsets = [0, 4], sizes = [8, 1], strides = [1, 1]} : vector<8x100xf32> to vector<8x1xf32>
    %48 = vector.extract_strided_slice %21 {offsets = [0, 1], sizes = [1, 256], strides = [1, 1]} : vector<4x384xf32> to vector<1x256xf32>
    %49 = vector.broadcast %47 : vector<8x1xf32> to vector<8x256xf32>
    %50 = vector.broadcast %48 : vector<1x256xf32> to vector<8x256xf32>
    %51 = arith.mulf %49, %50 : vector<8x256xf32>
    %52 = arith.addf %46, %51 : vector<8x256xf32>
    %53 = vector.extract_strided_slice %12 {offsets = [0, 5], sizes = [8, 1], strides = [1, 1]} : vector<8x100xf32> to vector<8x1xf32>
    %54 = vector.extract_strided_slice %21 {offsets = [1, 1], sizes = [1, 256], strides = [1, 1]} : vector<4x384xf32> to vector<1x256xf32>
    %55 = vector.broadcast %53 : vector<8x1xf32> to vector<8x256xf32>
    %56 = vector.broadcast %54 : vector<1x256xf32> to vector<8x256xf32>
    %57 = arith.mulf %55, %56 : vector<8x256xf32>
    %58 = arith.addf %52, %57 : vector<8x256xf32>
    %59 = vector.extract_strided_slice %12 {offsets = [0, 6], sizes = [8, 1], strides = [1, 1]} : vector<8x100xf32> to vector<8x1xf32>
    %60 = vector.extract_strided_slice %21 {offsets = [2, 1], sizes = [1, 256], strides = [1, 1]} : vector<4x384xf32> to vector<1x256xf32>
    %61 = vector.broadcast %59 : vector<8x1xf32> to vector<8x256xf32>
    %62 = vector.broadcast %60 : vector<1x256xf32> to vector<8x256xf32>
    %63 = arith.mulf %61, %62 : vector<8x256xf32>
    %64 = arith.addf %58, %63 : vector<8x256xf32>
    %65 = vector.extract_strided_slice %12 {offsets = [0, 7], sizes = [8, 1], strides = [1, 1]} : vector<8x100xf32> to vector<8x1xf32>
    %66 = vector.extract_strided_slice %21 {offsets = [3, 1], sizes = [1, 256], strides = [1, 1]} : vector<4x384xf32> to vector<1x256xf32>
    %67 = vector.broadcast %65 : vector<8x1xf32> to vector<8x256xf32>
    %68 = vector.broadcast %66 : vector<1x256xf32> to vector<8x256xf32>
    %69 = arith.mulf %67, %68 : vector<8x256xf32>
    %70 = arith.addf %64, %69 : vector<8x256xf32>
    %71 = vector.extract_strided_slice %12 {offsets = [0, 8], sizes = [8, 1], strides = [1, 1]} : vector<8x100xf32> to vector<8x1xf32>
    %72 = vector.extract_strided_slice %21 {offsets = [0, 2], sizes = [1, 256], strides = [1, 1]} : vector<4x384xf32> to vector<1x256xf32>
    %73 = vector.broadcast %71 : vector<8x1xf32> to vector<8x256xf32>
    %74 = vector.broadcast %72 : vector<1x256xf32> to vector<8x256xf32>
    %75 = arith.mulf %73, %74 : vector<8x256xf32>
    %76 = arith.addf %70, %75 : vector<8x256xf32>
    %77 = vector.extract_strided_slice %12 {offsets = [0, 9], sizes = [8, 1], strides = [1, 1]} : vector<8x100xf32> to vector<8x1xf32>
    %78 = vector.extract_strided_slice %21 {offsets = [1, 2], sizes = [1, 256], strides = [1, 1]} : vector<4x384xf32> to vector<1x256xf32>
    %79 = vector.broadcast %77 : vector<8x1xf32> to vector<8x256xf32>
    %80 = vector.broadcast %78 : vector<1x256xf32> to vector<8x256xf32>
    %81 = arith.mulf %79, %80 : vector<8x256xf32>
    %82 = arith.addf %76, %81 : vector<8x256xf32>
    %83 = vector.extract_strided_slice %12 {offsets = [0, 10], sizes = [8, 1], strides = [1, 1]} : vector<8x100xf32> to vector<8x1xf32>
    %84 = vector.extract_strided_slice %21 {offsets = [2, 2], sizes = [1, 256], strides = [1, 1]} : vector<4x384xf32> to vector<1x256xf32>
    %85 = vector.broadcast %83 : vector<8x1xf32> to vector<8x256xf32>
    %86 = vector.broadcast %84 : vector<1x256xf32> to vector<8x256xf32>
    %87 = arith.mulf %85, %86 : vector<8x256xf32>
    %88 = arith.addf %82, %87 : vector<8x256xf32>
    %89 = vector.extract_strided_slice %12 {offsets = [0, 11], sizes = [8, 1], strides = [1, 1]} : vector<8x100xf32> to vector<8x1xf32>
    %90 = vector.extract_strided_slice %21 {offsets = [3, 2], sizes = [1, 256], strides = [1, 1]} : vector<4x384xf32> to vector<1x256xf32>
    %91 = vector.broadcast %89 : vector<8x1xf32> to vector<8x256xf32>
    %92 = vector.broadcast %90 : vector<1x256xf32> to vector<8x256xf32>
    %93 = arith.mulf %91, %92 : vector<8x256xf32>
    %94 = arith.addf %88, %93 : vector<8x256xf32>
    %95 = vector.extract_strided_slice %12 {offsets = [0, 12], sizes = [8, 1], strides = [1, 1]} : vector<8x100xf32> to vector<8x1xf32>
    %96 = vector.extract_strided_slice %21 {offsets = [0, 3], sizes = [1, 256], strides = [1, 1]} : vector<4x384xf32> to vector<1x256xf32>
    %97 = vector.broadcast %95 : vector<8x1xf32> to vector<8x256xf32>
    %98 = vector.broadcast %96 : vector<1x256xf32> to vector<8x256xf32>
    %99 = arith.mulf %97, %98 : vector<8x256xf32>
    %100 = arith.addf %94, %99 : vector<8x256xf32>
    %101 = vector.extract_strided_slice %12 {offsets = [0, 13], sizes = [8, 1], strides = [1, 1]} : vector<8x100xf32> to vector<8x1xf32>
    %102 = vector.extract_strided_slice %21 {offsets = [1, 3], sizes = [1, 256], strides = [1, 1]} : vector<4x384xf32> to vector<1x256xf32>
    %103 = vector.broadcast %101 : vector<8x1xf32> to vector<8x256xf32>
    %104 = vector.broadcast %102 : vector<1x256xf32> to vector<8x256xf32>
    %105 = arith.mulf %103, %104 : vector<8x256xf32>
    %106 = arith.addf %100, %105 : vector<8x256xf32>
    %107 = vector.extract_strided_slice %12 {offsets = [0, 14], sizes = [8, 1], strides = [1, 1]} : vector<8x100xf32> to vector<8x1xf32>
    %108 = vector.extract_strided_slice %21 {offsets = [2, 3], sizes = [1, 256], strides = [1, 1]} : vector<4x384xf32> to vector<1x256xf32>
    %109 = vector.broadcast %107 : vector<8x1xf32> to vector<8x256xf32>
    %110 = vector.broadcast %108 : vector<1x256xf32> to vector<8x256xf32>
    %111 = arith.mulf %109, %110 : vector<8x256xf32>
    %112 = arith.addf %106, %111 : vector<8x256xf32>
    %113 = vector.extract_strided_slice %12 {offsets = [0, 15], sizes = [8, 1], strides = [1, 1]} : vector<8x100xf32> to vector<8x1xf32>
    %114 = vector.extract_strided_slice %21 {offsets = [3, 3], sizes = [1, 256], strides = [1, 1]} : vector<4x384xf32> to vector<1x256xf32>
    %115 = vector.broadcast %113 : vector<8x1xf32> to vector<8x256xf32>
    %116 = vector.broadcast %114 : vector<1x256xf32> to vector<8x256xf32>
    %117 = arith.mulf %115, %116 : vector<8x256xf32>
    %118 = arith.addf %112, %117 : vector<8x256xf32>
    %119 = vector.extract_strided_slice %12 {offsets = [0, 16], sizes = [8, 1], strides = [1, 1]} : vector<8x100xf32> to vector<8x1xf32>
    %120 = vector.extract_strided_slice %21 {offsets = [0, 4], sizes = [1, 256], strides = [1, 1]} : vector<4x384xf32> to vector<1x256xf32>
    %121 = vector.broadcast %119 : vector<8x1xf32> to vector<8x256xf32>
    %122 = vector.broadcast %120 : vector<1x256xf32> to vector<8x256xf32>
    %123 = arith.mulf %121, %122 : vector<8x256xf32>
    %124 = arith.addf %118, %123 : vector<8x256xf32>
    %125 = vector.extract_strided_slice %12 {offsets = [0, 17], sizes = [8, 1], strides = [1, 1]} : vector<8x100xf32> to vector<8x1xf32>
    %126 = vector.extract_strided_slice %21 {offsets = [1, 4], sizes = [1, 256], strides = [1, 1]} : vector<4x384xf32> to vector<1x256xf32>
    %127 = vector.broadcast %125 : vector<8x1xf32> to vector<8x256xf32>
    %128 = vector.broadcast %126 : vector<1x256xf32> to vector<8x256xf32>
    %129 = arith.mulf %127, %128 : vector<8x256xf32>
    %130 = arith.addf %124, %129 : vector<8x256xf32>
    %131 = vector.extract_strided_slice %12 {offsets = [0, 18], sizes = [8, 1], strides = [1, 1]} : vector<8x100xf32> to vector<8x1xf32>
    %132 = vector.extract_strided_slice %21 {offsets = [2, 4], sizes = [1, 256], strides = [1, 1]} : vector<4x384xf32> to vector<1x256xf32>
    %133 = vector.broadcast %131 : vector<8x1xf32> to vector<8x256xf32>
    %134 = vector.broadcast %132 : vector<1x256xf32> to vector<8x256xf32>
    %135 = arith.mulf %133, %134 : vector<8x256xf32>
    %136 = arith.addf %130, %135 : vector<8x256xf32>
    %137 = vector.extract_strided_slice %12 {offsets = [0, 19], sizes = [8, 1], strides = [1, 1]} : vector<8x100xf32> to vector<8x1xf32>
    %138 = vector.extract_strided_slice %21 {offsets = [3, 4], sizes = [1, 256], strides = [1, 1]} : vector<4x384xf32> to vector<1x256xf32>
    %139 = vector.broadcast %137 : vector<8x1xf32> to vector<8x256xf32>
    %140 = vector.broadcast %138 : vector<1x256xf32> to vector<8x256xf32>
    %141 = arith.mulf %139, %140 : vector<8x256xf32>
    %142 = arith.addf %136, %141 : vector<8x256xf32>
    %143 = vector.extract_strided_slice %12 {offsets = [0, 20], sizes = [8, 1], strides = [1, 1]} : vector<8x100xf32> to vector<8x1xf32>
    %144 = vector.extract_strided_slice %21 {offsets = [0, 20], sizes = [1, 256], strides = [1, 1]} : vector<4x384xf32> to vector<1x256xf32>
    %145 = vector.broadcast %143 : vector<8x1xf32> to vector<8x256xf32>
    %146 = vector.broadcast %144 : vector<1x256xf32> to vector<8x256xf32>
    %147 = arith.mulf %145, %146 : vector<8x256xf32>
    %148 = arith.addf %142, %147 : vector<8x256xf32>
    %149 = vector.extract_strided_slice %12 {offsets = [0, 21], sizes = [8, 1], strides = [1, 1]} : vector<8x100xf32> to vector<8x1xf32>
    %150 = vector.extract_strided_slice %21 {offsets = [1, 20], sizes = [1, 256], strides = [1, 1]} : vector<4x384xf32> to vector<1x256xf32>
    %151 = vector.broadcast %149 : vector<8x1xf32> to vector<8x256xf32>
    %152 = vector.broadcast %150 : vector<1x256xf32> to vector<8x256xf32>
    %153 = arith.mulf %151, %152 : vector<8x256xf32>
    %154 = arith.addf %148, %153 : vector<8x256xf32>
    %155 = vector.extract_strided_slice %12 {offsets = [0, 22], sizes = [8, 1], strides = [1, 1]} : vector<8x100xf32> to vector<8x1xf32>
    %156 = vector.extract_strided_slice %21 {offsets = [2, 20], sizes = [1, 256], strides = [1, 1]} : vector<4x384xf32> to vector<1x256xf32>
    %157 = vector.broadcast %155 : vector<8x1xf32> to vector<8x256xf32>
    %158 = vector.broadcast %156 : vector<1x256xf32> to vector<8x256xf32>
    %159 = arith.mulf %157, %158 : vector<8x256xf32>
    %160 = arith.addf %154, %159 : vector<8x256xf32>
    %161 = vector.extract_strided_slice %12 {offsets = [0, 23], sizes = [8, 1], strides = [1, 1]} : vector<8x100xf32> to vector<8x1xf32>
    %162 = vector.extract_strided_slice %21 {offsets = [3, 20], sizes = [1, 256], strides = [1, 1]} : vector<4x384xf32> to vector<1x256xf32>
    %163 = vector.broadcast %161 : vector<8x1xf32> to vector<8x256xf32>
    %164 = vector.broadcast %162 : vector<1x256xf32> to vector<8x256xf32>
    %165 = arith.mulf %163, %164 : vector<8x256xf32>
    %166 = arith.addf %160, %165 : vector<8x256xf32>
    %167 = vector.extract_strided_slice %12 {offsets = [0, 24], sizes = [8, 1], strides = [1, 1]} : vector<8x100xf32> to vector<8x1xf32>
    %168 = vector.extract_strided_slice %21 {offsets = [0, 21], sizes = [1, 256], strides = [1, 1]} : vector<4x384xf32> to vector<1x256xf32>
    %169 = vector.broadcast %167 : vector<8x1xf32> to vector<8x256xf32>
    %170 = vector.broadcast %168 : vector<1x256xf32> to vector<8x256xf32>
    %171 = arith.mulf %169, %170 : vector<8x256xf32>
    %172 = arith.addf %166, %171 : vector<8x256xf32>
    %173 = vector.extract_strided_slice %12 {offsets = [0, 25], sizes = [8, 1], strides = [1, 1]} : vector<8x100xf32> to vector<8x1xf32>
    %174 = vector.extract_strided_slice %21 {offsets = [1, 21], sizes = [1, 256], strides = [1, 1]} : vector<4x384xf32> to vector<1x256xf32>
    %175 = vector.broadcast %173 : vector<8x1xf32> to vector<8x256xf32>
    %176 = vector.broadcast %174 : vector<1x256xf32> to vector<8x256xf32>
    %177 = arith.mulf %175, %176 : vector<8x256xf32>
    %178 = arith.addf %172, %177 : vector<8x256xf32>
    %179 = vector.extract_strided_slice %12 {offsets = [0, 26], sizes = [8, 1], strides = [1, 1]} : vector<8x100xf32> to vector<8x1xf32>
    %180 = vector.extract_strided_slice %21 {offsets = [2, 21], sizes = [1, 256], strides = [1, 1]} : vector<4x384xf32> to vector<1x256xf32>
    %181 = vector.broadcast %179 : vector<8x1xf32> to vector<8x256xf32>
    %182 = vector.broadcast %180 : vector<1x256xf32> to vector<8x256xf32>
    %183 = arith.mulf %181, %182 : vector<8x256xf32>
    %184 = arith.addf %178, %183 : vector<8x256xf32>
    %185 = vector.extract_strided_slice %12 {offsets = [0, 27], sizes = [8, 1], strides = [1, 1]} : vector<8x100xf32> to vector<8x1xf32>
    %186 = vector.extract_strided_slice %21 {offsets = [3, 21], sizes = [1, 256], strides = [1, 1]} : vector<4x384xf32> to vector<1x256xf32>
    %187 = vector.broadcast %185 : vector<8x1xf32> to vector<8x256xf32>
    %188 = vector.broadcast %186 : vector<1x256xf32> to vector<8x256xf32>
    %189 = arith.mulf %187, %188 : vector<8x256xf32>
    %190 = arith.addf %184, %189 : vector<8x256xf32>
    %191 = vector.extract_strided_slice %12 {offsets = [0, 28], sizes = [8, 1], strides = [1, 1]} : vector<8x100xf32> to vector<8x1xf32>
    %192 = vector.extract_strided_slice %21 {offsets = [0, 22], sizes = [1, 256], strides = [1, 1]} : vector<4x384xf32> to vector<1x256xf32>
    %193 = vector.broadcast %191 : vector<8x1xf32> to vector<8x256xf32>
    %194 = vector.broadcast %192 : vector<1x256xf32> to vector<8x256xf32>
    %195 = arith.mulf %193, %194 : vector<8x256xf32>
    %196 = arith.addf %190, %195 : vector<8x256xf32>
    %197 = vector.extract_strided_slice %12 {offsets = [0, 29], sizes = [8, 1], strides = [1, 1]} : vector<8x100xf32> to vector<8x1xf32>
    %198 = vector.extract_strided_slice %21 {offsets = [1, 22], sizes = [1, 256], strides = [1, 1]} : vector<4x384xf32> to vector<1x256xf32>
    %199 = vector.broadcast %197 : vector<8x1xf32> to vector<8x256xf32>
    %200 = vector.broadcast %198 : vector<1x256xf32> to vector<8x256xf32>
    %201 = arith.mulf %199, %200 : vector<8x256xf32>
    %202 = arith.addf %196, %201 : vector<8x256xf32>
    %203 = vector.extract_strided_slice %12 {offsets = [0, 30], sizes = [8, 1], strides = [1, 1]} : vector<8x100xf32> to vector<8x1xf32>
    %204 = vector.extract_strided_slice %21 {offsets = [2, 22], sizes = [1, 256], strides = [1, 1]} : vector<4x384xf32> to vector<1x256xf32>
    %205 = vector.broadcast %203 : vector<8x1xf32> to vector<8x256xf32>
    %206 = vector.broadcast %204 : vector<1x256xf32> to vector<8x256xf32>
    %207 = arith.mulf %205, %206 : vector<8x256xf32>
    %208 = arith.addf %202, %207 : vector<8x256xf32>
    %209 = vector.extract_strided_slice %12 {offsets = [0, 31], sizes = [8, 1], strides = [1, 1]} : vector<8x100xf32> to vector<8x1xf32>
    %210 = vector.extract_strided_slice %21 {offsets = [3, 22], sizes = [1, 256], strides = [1, 1]} : vector<4x384xf32> to vector<1x256xf32>
    %211 = vector.broadcast %209 : vector<8x1xf32> to vector<8x256xf32>
    %212 = vector.broadcast %210 : vector<1x256xf32> to vector<8x256xf32>
    %213 = arith.mulf %211, %212 : vector<8x256xf32>
    %214 = arith.addf %208, %213 : vector<8x256xf32>
    %215 = vector.extract_strided_slice %12 {offsets = [0, 32], sizes = [8, 1], strides = [1, 1]} : vector<8x100xf32> to vector<8x1xf32>
    %216 = vector.extract_strided_slice %21 {offsets = [0, 23], sizes = [1, 256], strides = [1, 1]} : vector<4x384xf32> to vector<1x256xf32>
    %217 = vector.broadcast %215 : vector<8x1xf32> to vector<8x256xf32>
    %218 = vector.broadcast %216 : vector<1x256xf32> to vector<8x256xf32>
    %219 = arith.mulf %217, %218 : vector<8x256xf32>
    %220 = arith.addf %214, %219 : vector<8x256xf32>
    %221 = vector.extract_strided_slice %12 {offsets = [0, 33], sizes = [8, 1], strides = [1, 1]} : vector<8x100xf32> to vector<8x1xf32>
    %222 = vector.extract_strided_slice %21 {offsets = [1, 23], sizes = [1, 256], strides = [1, 1]} : vector<4x384xf32> to vector<1x256xf32>
    %223 = vector.broadcast %221 : vector<8x1xf32> to vector<8x256xf32>
    %224 = vector.broadcast %222 : vector<1x256xf32> to vector<8x256xf32>
    %225 = arith.mulf %223, %224 : vector<8x256xf32>
    %226 = arith.addf %220, %225 : vector<8x256xf32>
    %227 = vector.extract_strided_slice %12 {offsets = [0, 34], sizes = [8, 1], strides = [1, 1]} : vector<8x100xf32> to vector<8x1xf32>
    %228 = vector.extract_strided_slice %21 {offsets = [2, 23], sizes = [1, 256], strides = [1, 1]} : vector<4x384xf32> to vector<1x256xf32>
    %229 = vector.broadcast %227 : vector<8x1xf32> to vector<8x256xf32>
    %230 = vector.broadcast %228 : vector<1x256xf32> to vector<8x256xf32>
    %231 = arith.mulf %229, %230 : vector<8x256xf32>
    %232 = arith.addf %226, %231 : vector<8x256xf32>
    %233 = vector.extract_strided_slice %12 {offsets = [0, 35], sizes = [8, 1], strides = [1, 1]} : vector<8x100xf32> to vector<8x1xf32>
    %234 = vector.extract_strided_slice %21 {offsets = [3, 23], sizes = [1, 256], strides = [1, 1]} : vector<4x384xf32> to vector<1x256xf32>
    %235 = vector.broadcast %233 : vector<8x1xf32> to vector<8x256xf32>
    %236 = vector.broadcast %234 : vector<1x256xf32> to vector<8x256xf32>
    %237 = arith.mulf %235, %236 : vector<8x256xf32>
    %238 = arith.addf %232, %237 : vector<8x256xf32>
    %239 = vector.extract_strided_slice %12 {offsets = [0, 36], sizes = [8, 1], strides = [1, 1]} : vector<8x100xf32> to vector<8x1xf32>
    %240 = vector.extract_strided_slice %21 {offsets = [0, 24], sizes = [1, 256], strides = [1, 1]} : vector<4x384xf32> to vector<1x256xf32>
    %241 = vector.broadcast %239 : vector<8x1xf32> to vector<8x256xf32>
    %242 = vector.broadcast %240 : vector<1x256xf32> to vector<8x256xf32>
    %243 = arith.mulf %241, %242 : vector<8x256xf32>
    %244 = arith.addf %238, %243 : vector<8x256xf32>
    %245 = vector.extract_strided_slice %12 {offsets = [0, 37], sizes = [8, 1], strides = [1, 1]} : vector<8x100xf32> to vector<8x1xf32>
    %246 = vector.extract_strided_slice %21 {offsets = [1, 24], sizes = [1, 256], strides = [1, 1]} : vector<4x384xf32> to vector<1x256xf32>
    %247 = vector.broadcast %245 : vector<8x1xf32> to vector<8x256xf32>
    %248 = vector.broadcast %246 : vector<1x256xf32> to vector<8x256xf32>
    %249 = arith.mulf %247, %248 : vector<8x256xf32>
    %250 = arith.addf %244, %249 : vector<8x256xf32>
    %251 = vector.extract_strided_slice %12 {offsets = [0, 38], sizes = [8, 1], strides = [1, 1]} : vector<8x100xf32> to vector<8x1xf32>
    %252 = vector.extract_strided_slice %21 {offsets = [2, 24], sizes = [1, 256], strides = [1, 1]} : vector<4x384xf32> to vector<1x256xf32>
    %253 = vector.broadcast %251 : vector<8x1xf32> to vector<8x256xf32>
    %254 = vector.broadcast %252 : vector<1x256xf32> to vector<8x256xf32>
    %255 = arith.mulf %253, %254 : vector<8x256xf32>
    %256 = arith.addf %250, %255 : vector<8x256xf32>
    %257 = vector.extract_strided_slice %12 {offsets = [0, 39], sizes = [8, 1], strides = [1, 1]} : vector<8x100xf32> to vector<8x1xf32>
    %258 = vector.extract_strided_slice %21 {offsets = [3, 24], sizes = [1, 256], strides = [1, 1]} : vector<4x384xf32> to vector<1x256xf32>
    %259 = vector.broadcast %257 : vector<8x1xf32> to vector<8x256xf32>
    %260 = vector.broadcast %258 : vector<1x256xf32> to vector<8x256xf32>
    %261 = arith.mulf %259, %260 : vector<8x256xf32>
    %262 = arith.addf %256, %261 : vector<8x256xf32>
    %263 = vector.extract_strided_slice %12 {offsets = [0, 40], sizes = [8, 1], strides = [1, 1]} : vector<8x100xf32> to vector<8x1xf32>
    %264 = vector.extract_strided_slice %21 {offsets = [0, 40], sizes = [1, 256], strides = [1, 1]} : vector<4x384xf32> to vector<1x256xf32>
    %265 = vector.broadcast %263 : vector<8x1xf32> to vector<8x256xf32>
    %266 = vector.broadcast %264 : vector<1x256xf32> to vector<8x256xf32>
    %267 = arith.mulf %265, %266 : vector<8x256xf32>
    %268 = arith.addf %262, %267 : vector<8x256xf32>
    %269 = vector.extract_strided_slice %12 {offsets = [0, 41], sizes = [8, 1], strides = [1, 1]} : vector<8x100xf32> to vector<8x1xf32>
    %270 = vector.extract_strided_slice %21 {offsets = [1, 40], sizes = [1, 256], strides = [1, 1]} : vector<4x384xf32> to vector<1x256xf32>
    %271 = vector.broadcast %269 : vector<8x1xf32> to vector<8x256xf32>
    %272 = vector.broadcast %270 : vector<1x256xf32> to vector<8x256xf32>
    %273 = arith.mulf %271, %272 : vector<8x256xf32>
    %274 = arith.addf %268, %273 : vector<8x256xf32>
    %275 = vector.extract_strided_slice %12 {offsets = [0, 42], sizes = [8, 1], strides = [1, 1]} : vector<8x100xf32> to vector<8x1xf32>
    %276 = vector.extract_strided_slice %21 {offsets = [2, 40], sizes = [1, 256], strides = [1, 1]} : vector<4x384xf32> to vector<1x256xf32>
    %277 = vector.broadcast %275 : vector<8x1xf32> to vector<8x256xf32>
    %278 = vector.broadcast %276 : vector<1x256xf32> to vector<8x256xf32>
    %279 = arith.mulf %277, %278 : vector<8x256xf32>
    %280 = arith.addf %274, %279 : vector<8x256xf32>
    %281 = vector.extract_strided_slice %12 {offsets = [0, 43], sizes = [8, 1], strides = [1, 1]} : vector<8x100xf32> to vector<8x1xf32>
    %282 = vector.extract_strided_slice %21 {offsets = [3, 40], sizes = [1, 256], strides = [1, 1]} : vector<4x384xf32> to vector<1x256xf32>
    %283 = vector.broadcast %281 : vector<8x1xf32> to vector<8x256xf32>
    %284 = vector.broadcast %282 : vector<1x256xf32> to vector<8x256xf32>
    %285 = arith.mulf %283, %284 : vector<8x256xf32>
    %286 = arith.addf %280, %285 : vector<8x256xf32>
    %287 = vector.extract_strided_slice %12 {offsets = [0, 44], sizes = [8, 1], strides = [1, 1]} : vector<8x100xf32> to vector<8x1xf32>
    %288 = vector.extract_strided_slice %21 {offsets = [0, 41], sizes = [1, 256], strides = [1, 1]} : vector<4x384xf32> to vector<1x256xf32>
    %289 = vector.broadcast %287 : vector<8x1xf32> to vector<8x256xf32>
    %290 = vector.broadcast %288 : vector<1x256xf32> to vector<8x256xf32>
    %291 = arith.mulf %289, %290 : vector<8x256xf32>
    %292 = arith.addf %286, %291 : vector<8x256xf32>
    %293 = vector.extract_strided_slice %12 {offsets = [0, 45], sizes = [8, 1], strides = [1, 1]} : vector<8x100xf32> to vector<8x1xf32>
    %294 = vector.extract_strided_slice %21 {offsets = [1, 41], sizes = [1, 256], strides = [1, 1]} : vector<4x384xf32> to vector<1x256xf32>
    %295 = vector.broadcast %293 : vector<8x1xf32> to vector<8x256xf32>
    %296 = vector.broadcast %294 : vector<1x256xf32> to vector<8x256xf32>
    %297 = arith.mulf %295, %296 : vector<8x256xf32>
    %298 = arith.addf %292, %297 : vector<8x256xf32>
    %299 = vector.extract_strided_slice %12 {offsets = [0, 46], sizes = [8, 1], strides = [1, 1]} : vector<8x100xf32> to vector<8x1xf32>
    %300 = vector.extract_strided_slice %21 {offsets = [2, 41], sizes = [1, 256], strides = [1, 1]} : vector<4x384xf32> to vector<1x256xf32>
    %301 = vector.broadcast %299 : vector<8x1xf32> to vector<8x256xf32>
    %302 = vector.broadcast %300 : vector<1x256xf32> to vector<8x256xf32>
    %303 = arith.mulf %301, %302 : vector<8x256xf32>
    %304 = arith.addf %298, %303 : vector<8x256xf32>
    %305 = vector.extract_strided_slice %12 {offsets = [0, 47], sizes = [8, 1], strides = [1, 1]} : vector<8x100xf32> to vector<8x1xf32>
    %306 = vector.extract_strided_slice %21 {offsets = [3, 41], sizes = [1, 256], strides = [1, 1]} : vector<4x384xf32> to vector<1x256xf32>
    %307 = vector.broadcast %305 : vector<8x1xf32> to vector<8x256xf32>
    %308 = vector.broadcast %306 : vector<1x256xf32> to vector<8x256xf32>
    %309 = arith.mulf %307, %308 : vector<8x256xf32>
    %310 = arith.addf %304, %309 : vector<8x256xf32>
    %311 = vector.extract_strided_slice %12 {offsets = [0, 48], sizes = [8, 1], strides = [1, 1]} : vector<8x100xf32> to vector<8x1xf32>
    %312 = vector.extract_strided_slice %21 {offsets = [0, 42], sizes = [1, 256], strides = [1, 1]} : vector<4x384xf32> to vector<1x256xf32>
    %313 = vector.broadcast %311 : vector<8x1xf32> to vector<8x256xf32>
    %314 = vector.broadcast %312 : vector<1x256xf32> to vector<8x256xf32>
    %315 = arith.mulf %313, %314 : vector<8x256xf32>
    %316 = arith.addf %310, %315 : vector<8x256xf32>
    %317 = vector.extract_strided_slice %12 {offsets = [0, 49], sizes = [8, 1], strides = [1, 1]} : vector<8x100xf32> to vector<8x1xf32>
    %318 = vector.extract_strided_slice %21 {offsets = [1, 42], sizes = [1, 256], strides = [1, 1]} : vector<4x384xf32> to vector<1x256xf32>
    %319 = vector.broadcast %317 : vector<8x1xf32> to vector<8x256xf32>
    %320 = vector.broadcast %318 : vector<1x256xf32> to vector<8x256xf32>
    %321 = arith.mulf %319, %320 : vector<8x256xf32>
    %322 = arith.addf %316, %321 : vector<8x256xf32>
    %323 = vector.extract_strided_slice %12 {offsets = [0, 50], sizes = [8, 1], strides = [1, 1]} : vector<8x100xf32> to vector<8x1xf32>
    %324 = vector.extract_strided_slice %21 {offsets = [2, 42], sizes = [1, 256], strides = [1, 1]} : vector<4x384xf32> to vector<1x256xf32>
    %325 = vector.broadcast %323 : vector<8x1xf32> to vector<8x256xf32>
    %326 = vector.broadcast %324 : vector<1x256xf32> to vector<8x256xf32>
    %327 = arith.mulf %325, %326 : vector<8x256xf32>
    %328 = arith.addf %322, %327 : vector<8x256xf32>
    %329 = vector.extract_strided_slice %12 {offsets = [0, 51], sizes = [8, 1], strides = [1, 1]} : vector<8x100xf32> to vector<8x1xf32>
    %330 = vector.extract_strided_slice %21 {offsets = [3, 42], sizes = [1, 256], strides = [1, 1]} : vector<4x384xf32> to vector<1x256xf32>
    %331 = vector.broadcast %329 : vector<8x1xf32> to vector<8x256xf32>
    %332 = vector.broadcast %330 : vector<1x256xf32> to vector<8x256xf32>
    %333 = arith.mulf %331, %332 : vector<8x256xf32>
    %334 = arith.addf %328, %333 : vector<8x256xf32>
    %335 = vector.extract_strided_slice %12 {offsets = [0, 52], sizes = [8, 1], strides = [1, 1]} : vector<8x100xf32> to vector<8x1xf32>
    %336 = vector.extract_strided_slice %21 {offsets = [0, 43], sizes = [1, 256], strides = [1, 1]} : vector<4x384xf32> to vector<1x256xf32>
    %337 = vector.broadcast %335 : vector<8x1xf32> to vector<8x256xf32>
    %338 = vector.broadcast %336 : vector<1x256xf32> to vector<8x256xf32>
    %339 = arith.mulf %337, %338 : vector<8x256xf32>
    %340 = arith.addf %334, %339 : vector<8x256xf32>
    %341 = vector.extract_strided_slice %12 {offsets = [0, 53], sizes = [8, 1], strides = [1, 1]} : vector<8x100xf32> to vector<8x1xf32>
    %342 = vector.extract_strided_slice %21 {offsets = [1, 43], sizes = [1, 256], strides = [1, 1]} : vector<4x384xf32> to vector<1x256xf32>
    %343 = vector.broadcast %341 : vector<8x1xf32> to vector<8x256xf32>
    %344 = vector.broadcast %342 : vector<1x256xf32> to vector<8x256xf32>
    %345 = arith.mulf %343, %344 : vector<8x256xf32>
    %346 = arith.addf %340, %345 : vector<8x256xf32>
    %347 = vector.extract_strided_slice %12 {offsets = [0, 54], sizes = [8, 1], strides = [1, 1]} : vector<8x100xf32> to vector<8x1xf32>
    %348 = vector.extract_strided_slice %21 {offsets = [2, 43], sizes = [1, 256], strides = [1, 1]} : vector<4x384xf32> to vector<1x256xf32>
    %349 = vector.broadcast %347 : vector<8x1xf32> to vector<8x256xf32>
    %350 = vector.broadcast %348 : vector<1x256xf32> to vector<8x256xf32>
    %351 = arith.mulf %349, %350 : vector<8x256xf32>
    %352 = arith.addf %346, %351 : vector<8x256xf32>
    %353 = vector.extract_strided_slice %12 {offsets = [0, 55], sizes = [8, 1], strides = [1, 1]} : vector<8x100xf32> to vector<8x1xf32>
    %354 = vector.extract_strided_slice %21 {offsets = [3, 43], sizes = [1, 256], strides = [1, 1]} : vector<4x384xf32> to vector<1x256xf32>
    %355 = vector.broadcast %353 : vector<8x1xf32> to vector<8x256xf32>
    %356 = vector.broadcast %354 : vector<1x256xf32> to vector<8x256xf32>
    %357 = arith.mulf %355, %356 : vector<8x256xf32>
    %358 = arith.addf %352, %357 : vector<8x256xf32>
    %359 = vector.extract_strided_slice %12 {offsets = [0, 56], sizes = [8, 1], strides = [1, 1]} : vector<8x100xf32> to vector<8x1xf32>
    %360 = vector.extract_strided_slice %21 {offsets = [0, 44], sizes = [1, 256], strides = [1, 1]} : vector<4x384xf32> to vector<1x256xf32>
    %361 = vector.broadcast %359 : vector<8x1xf32> to vector<8x256xf32>
    %362 = vector.broadcast %360 : vector<1x256xf32> to vector<8x256xf32>
    %363 = arith.mulf %361, %362 : vector<8x256xf32>
    %364 = arith.addf %358, %363 : vector<8x256xf32>
    %365 = vector.extract_strided_slice %12 {offsets = [0, 57], sizes = [8, 1], strides = [1, 1]} : vector<8x100xf32> to vector<8x1xf32>
    %366 = vector.extract_strided_slice %21 {offsets = [1, 44], sizes = [1, 256], strides = [1, 1]} : vector<4x384xf32> to vector<1x256xf32>
    %367 = vector.broadcast %365 : vector<8x1xf32> to vector<8x256xf32>
    %368 = vector.broadcast %366 : vector<1x256xf32> to vector<8x256xf32>
    %369 = arith.mulf %367, %368 : vector<8x256xf32>
    %370 = arith.addf %364, %369 : vector<8x256xf32>
    %371 = vector.extract_strided_slice %12 {offsets = [0, 58], sizes = [8, 1], strides = [1, 1]} : vector<8x100xf32> to vector<8x1xf32>
    %372 = vector.extract_strided_slice %21 {offsets = [2, 44], sizes = [1, 256], strides = [1, 1]} : vector<4x384xf32> to vector<1x256xf32>
    %373 = vector.broadcast %371 : vector<8x1xf32> to vector<8x256xf32>
    %374 = vector.broadcast %372 : vector<1x256xf32> to vector<8x256xf32>
    %375 = arith.mulf %373, %374 : vector<8x256xf32>
    %376 = arith.addf %370, %375 : vector<8x256xf32>
    %377 = vector.extract_strided_slice %12 {offsets = [0, 59], sizes = [8, 1], strides = [1, 1]} : vector<8x100xf32> to vector<8x1xf32>
    %378 = vector.extract_strided_slice %21 {offsets = [3, 44], sizes = [1, 256], strides = [1, 1]} : vector<4x384xf32> to vector<1x256xf32>
    %379 = vector.broadcast %377 : vector<8x1xf32> to vector<8x256xf32>
    %380 = vector.broadcast %378 : vector<1x256xf32> to vector<8x256xf32>
    %381 = arith.mulf %379, %380 : vector<8x256xf32>
    %382 = arith.addf %376, %381 : vector<8x256xf32>
    %383 = vector.extract_strided_slice %12 {offsets = [0, 60], sizes = [8, 1], strides = [1, 1]} : vector<8x100xf32> to vector<8x1xf32>
    %384 = vector.extract_strided_slice %21 {offsets = [0, 60], sizes = [1, 256], strides = [1, 1]} : vector<4x384xf32> to vector<1x256xf32>
    %385 = vector.broadcast %383 : vector<8x1xf32> to vector<8x256xf32>
    %386 = vector.broadcast %384 : vector<1x256xf32> to vector<8x256xf32>
    %387 = arith.mulf %385, %386 : vector<8x256xf32>
    %388 = arith.addf %382, %387 : vector<8x256xf32>
    %389 = vector.extract_strided_slice %12 {offsets = [0, 61], sizes = [8, 1], strides = [1, 1]} : vector<8x100xf32> to vector<8x1xf32>
    %390 = vector.extract_strided_slice %21 {offsets = [1, 60], sizes = [1, 256], strides = [1, 1]} : vector<4x384xf32> to vector<1x256xf32>
    %391 = vector.broadcast %389 : vector<8x1xf32> to vector<8x256xf32>
    %392 = vector.broadcast %390 : vector<1x256xf32> to vector<8x256xf32>
    %393 = arith.mulf %391, %392 : vector<8x256xf32>
    %394 = arith.addf %388, %393 : vector<8x256xf32>
    %395 = vector.extract_strided_slice %12 {offsets = [0, 62], sizes = [8, 1], strides = [1, 1]} : vector<8x100xf32> to vector<8x1xf32>
    %396 = vector.extract_strided_slice %21 {offsets = [2, 60], sizes = [1, 256], strides = [1, 1]} : vector<4x384xf32> to vector<1x256xf32>
    %397 = vector.broadcast %395 : vector<8x1xf32> to vector<8x256xf32>
    %398 = vector.broadcast %396 : vector<1x256xf32> to vector<8x256xf32>
    %399 = arith.mulf %397, %398 : vector<8x256xf32>
    %400 = arith.addf %394, %399 : vector<8x256xf32>
    %401 = vector.extract_strided_slice %12 {offsets = [0, 63], sizes = [8, 1], strides = [1, 1]} : vector<8x100xf32> to vector<8x1xf32>
    %402 = vector.extract_strided_slice %21 {offsets = [3, 60], sizes = [1, 256], strides = [1, 1]} : vector<4x384xf32> to vector<1x256xf32>
    %403 = vector.broadcast %401 : vector<8x1xf32> to vector<8x256xf32>
    %404 = vector.broadcast %402 : vector<1x256xf32> to vector<8x256xf32>
    %405 = arith.mulf %403, %404 : vector<8x256xf32>
    %406 = arith.addf %400, %405 : vector<8x256xf32>
    %407 = vector.extract_strided_slice %12 {offsets = [0, 64], sizes = [8, 1], strides = [1, 1]} : vector<8x100xf32> to vector<8x1xf32>
    %408 = vector.extract_strided_slice %21 {offsets = [0, 61], sizes = [1, 256], strides = [1, 1]} : vector<4x384xf32> to vector<1x256xf32>
    %409 = vector.broadcast %407 : vector<8x1xf32> to vector<8x256xf32>
    %410 = vector.broadcast %408 : vector<1x256xf32> to vector<8x256xf32>
    %411 = arith.mulf %409, %410 : vector<8x256xf32>
    %412 = arith.addf %406, %411 : vector<8x256xf32>
    %413 = vector.extract_strided_slice %12 {offsets = [0, 65], sizes = [8, 1], strides = [1, 1]} : vector<8x100xf32> to vector<8x1xf32>
    %414 = vector.extract_strided_slice %21 {offsets = [1, 61], sizes = [1, 256], strides = [1, 1]} : vector<4x384xf32> to vector<1x256xf32>
    %415 = vector.broadcast %413 : vector<8x1xf32> to vector<8x256xf32>
    %416 = vector.broadcast %414 : vector<1x256xf32> to vector<8x256xf32>
    %417 = arith.mulf %415, %416 : vector<8x256xf32>
    %418 = arith.addf %412, %417 : vector<8x256xf32>
    %419 = vector.extract_strided_slice %12 {offsets = [0, 66], sizes = [8, 1], strides = [1, 1]} : vector<8x100xf32> to vector<8x1xf32>
    %420 = vector.extract_strided_slice %21 {offsets = [2, 61], sizes = [1, 256], strides = [1, 1]} : vector<4x384xf32> to vector<1x256xf32>
    %421 = vector.broadcast %419 : vector<8x1xf32> to vector<8x256xf32>
    %422 = vector.broadcast %420 : vector<1x256xf32> to vector<8x256xf32>
    %423 = arith.mulf %421, %422 : vector<8x256xf32>
    %424 = arith.addf %418, %423 : vector<8x256xf32>
    %425 = vector.extract_strided_slice %12 {offsets = [0, 67], sizes = [8, 1], strides = [1, 1]} : vector<8x100xf32> to vector<8x1xf32>
    %426 = vector.extract_strided_slice %21 {offsets = [3, 61], sizes = [1, 256], strides = [1, 1]} : vector<4x384xf32> to vector<1x256xf32>
    %427 = vector.broadcast %425 : vector<8x1xf32> to vector<8x256xf32>
    %428 = vector.broadcast %426 : vector<1x256xf32> to vector<8x256xf32>
    %429 = arith.mulf %427, %428 : vector<8x256xf32>
    %430 = arith.addf %424, %429 : vector<8x256xf32>
    %431 = vector.extract_strided_slice %12 {offsets = [0, 68], sizes = [8, 1], strides = [1, 1]} : vector<8x100xf32> to vector<8x1xf32>
    %432 = vector.extract_strided_slice %21 {offsets = [0, 62], sizes = [1, 256], strides = [1, 1]} : vector<4x384xf32> to vector<1x256xf32>
    %433 = vector.broadcast %431 : vector<8x1xf32> to vector<8x256xf32>
    %434 = vector.broadcast %432 : vector<1x256xf32> to vector<8x256xf32>
    %435 = arith.mulf %433, %434 : vector<8x256xf32>
    %436 = arith.addf %430, %435 : vector<8x256xf32>
    %437 = vector.extract_strided_slice %12 {offsets = [0, 69], sizes = [8, 1], strides = [1, 1]} : vector<8x100xf32> to vector<8x1xf32>
    %438 = vector.extract_strided_slice %21 {offsets = [1, 62], sizes = [1, 256], strides = [1, 1]} : vector<4x384xf32> to vector<1x256xf32>
    %439 = vector.broadcast %437 : vector<8x1xf32> to vector<8x256xf32>
    %440 = vector.broadcast %438 : vector<1x256xf32> to vector<8x256xf32>
    %441 = arith.mulf %439, %440 : vector<8x256xf32>
    %442 = arith.addf %436, %441 : vector<8x256xf32>
    %443 = vector.extract_strided_slice %12 {offsets = [0, 70], sizes = [8, 1], strides = [1, 1]} : vector<8x100xf32> to vector<8x1xf32>
    %444 = vector.extract_strided_slice %21 {offsets = [2, 62], sizes = [1, 256], strides = [1, 1]} : vector<4x384xf32> to vector<1x256xf32>
    %445 = vector.broadcast %443 : vector<8x1xf32> to vector<8x256xf32>
    %446 = vector.broadcast %444 : vector<1x256xf32> to vector<8x256xf32>
    %447 = arith.mulf %445, %446 : vector<8x256xf32>
    %448 = arith.addf %442, %447 : vector<8x256xf32>
    %449 = vector.extract_strided_slice %12 {offsets = [0, 71], sizes = [8, 1], strides = [1, 1]} : vector<8x100xf32> to vector<8x1xf32>
    %450 = vector.extract_strided_slice %21 {offsets = [3, 62], sizes = [1, 256], strides = [1, 1]} : vector<4x384xf32> to vector<1x256xf32>
    %451 = vector.broadcast %449 : vector<8x1xf32> to vector<8x256xf32>
    %452 = vector.broadcast %450 : vector<1x256xf32> to vector<8x256xf32>
    %453 = arith.mulf %451, %452 : vector<8x256xf32>
    %454 = arith.addf %448, %453 : vector<8x256xf32>
    %455 = vector.extract_strided_slice %12 {offsets = [0, 72], sizes = [8, 1], strides = [1, 1]} : vector<8x100xf32> to vector<8x1xf32>
    %456 = vector.extract_strided_slice %21 {offsets = [0, 63], sizes = [1, 256], strides = [1, 1]} : vector<4x384xf32> to vector<1x256xf32>
    %457 = vector.broadcast %455 : vector<8x1xf32> to vector<8x256xf32>
    %458 = vector.broadcast %456 : vector<1x256xf32> to vector<8x256xf32>
    %459 = arith.mulf %457, %458 : vector<8x256xf32>
    %460 = arith.addf %454, %459 : vector<8x256xf32>
    %461 = vector.extract_strided_slice %12 {offsets = [0, 73], sizes = [8, 1], strides = [1, 1]} : vector<8x100xf32> to vector<8x1xf32>
    %462 = vector.extract_strided_slice %21 {offsets = [1, 63], sizes = [1, 256], strides = [1, 1]} : vector<4x384xf32> to vector<1x256xf32>
    %463 = vector.broadcast %461 : vector<8x1xf32> to vector<8x256xf32>
    %464 = vector.broadcast %462 : vector<1x256xf32> to vector<8x256xf32>
    %465 = arith.mulf %463, %464 : vector<8x256xf32>
    %466 = arith.addf %460, %465 : vector<8x256xf32>
    %467 = vector.extract_strided_slice %12 {offsets = [0, 74], sizes = [8, 1], strides = [1, 1]} : vector<8x100xf32> to vector<8x1xf32>
    %468 = vector.extract_strided_slice %21 {offsets = [2, 63], sizes = [1, 256], strides = [1, 1]} : vector<4x384xf32> to vector<1x256xf32>
    %469 = vector.broadcast %467 : vector<8x1xf32> to vector<8x256xf32>
    %470 = vector.broadcast %468 : vector<1x256xf32> to vector<8x256xf32>
    %471 = arith.mulf %469, %470 : vector<8x256xf32>
    %472 = arith.addf %466, %471 : vector<8x256xf32>
    %473 = vector.extract_strided_slice %12 {offsets = [0, 75], sizes = [8, 1], strides = [1, 1]} : vector<8x100xf32> to vector<8x1xf32>
    %474 = vector.extract_strided_slice %21 {offsets = [3, 63], sizes = [1, 256], strides = [1, 1]} : vector<4x384xf32> to vector<1x256xf32>
    %475 = vector.broadcast %473 : vector<8x1xf32> to vector<8x256xf32>
    %476 = vector.broadcast %474 : vector<1x256xf32> to vector<8x256xf32>
    %477 = arith.mulf %475, %476 : vector<8x256xf32>
    %478 = arith.addf %472, %477 : vector<8x256xf32>
    %479 = vector.extract_strided_slice %12 {offsets = [0, 76], sizes = [8, 1], strides = [1, 1]} : vector<8x100xf32> to vector<8x1xf32>
    %480 = vector.extract_strided_slice %21 {offsets = [0, 64], sizes = [1, 256], strides = [1, 1]} : vector<4x384xf32> to vector<1x256xf32>
    %481 = vector.broadcast %479 : vector<8x1xf32> to vector<8x256xf32>
    %482 = vector.broadcast %480 : vector<1x256xf32> to vector<8x256xf32>
    %483 = arith.mulf %481, %482 : vector<8x256xf32>
    %484 = arith.addf %478, %483 : vector<8x256xf32>
    %485 = vector.extract_strided_slice %12 {offsets = [0, 77], sizes = [8, 1], strides = [1, 1]} : vector<8x100xf32> to vector<8x1xf32>
    %486 = vector.extract_strided_slice %21 {offsets = [1, 64], sizes = [1, 256], strides = [1, 1]} : vector<4x384xf32> to vector<1x256xf32>
    %487 = vector.broadcast %485 : vector<8x1xf32> to vector<8x256xf32>
    %488 = vector.broadcast %486 : vector<1x256xf32> to vector<8x256xf32>
    %489 = arith.mulf %487, %488 : vector<8x256xf32>
    %490 = arith.addf %484, %489 : vector<8x256xf32>
    %491 = vector.extract_strided_slice %12 {offsets = [0, 78], sizes = [8, 1], strides = [1, 1]} : vector<8x100xf32> to vector<8x1xf32>
    %492 = vector.extract_strided_slice %21 {offsets = [2, 64], sizes = [1, 256], strides = [1, 1]} : vector<4x384xf32> to vector<1x256xf32>
    %493 = vector.broadcast %491 : vector<8x1xf32> to vector<8x256xf32>
    %494 = vector.broadcast %492 : vector<1x256xf32> to vector<8x256xf32>
    %495 = arith.mulf %493, %494 : vector<8x256xf32>
    %496 = arith.addf %490, %495 : vector<8x256xf32>
    %497 = vector.extract_strided_slice %12 {offsets = [0, 79], sizes = [8, 1], strides = [1, 1]} : vector<8x100xf32> to vector<8x1xf32>
    %498 = vector.extract_strided_slice %21 {offsets = [3, 64], sizes = [1, 256], strides = [1, 1]} : vector<4x384xf32> to vector<1x256xf32>
    %499 = vector.broadcast %497 : vector<8x1xf32> to vector<8x256xf32>
    %500 = vector.broadcast %498 : vector<1x256xf32> to vector<8x256xf32>
    %501 = arith.mulf %499, %500 : vector<8x256xf32>
    %502 = arith.addf %496, %501 : vector<8x256xf32>
    %503 = vector.extract_strided_slice %12 {offsets = [0, 80], sizes = [8, 1], strides = [1, 1]} : vector<8x100xf32> to vector<8x1xf32>
    %504 = vector.extract_strided_slice %21 {offsets = [0, 80], sizes = [1, 256], strides = [1, 1]} : vector<4x384xf32> to vector<1x256xf32>
    %505 = vector.broadcast %503 : vector<8x1xf32> to vector<8x256xf32>
    %506 = vector.broadcast %504 : vector<1x256xf32> to vector<8x256xf32>
    %507 = arith.mulf %505, %506 : vector<8x256xf32>
    %508 = arith.addf %502, %507 : vector<8x256xf32>
    %509 = vector.extract_strided_slice %12 {offsets = [0, 81], sizes = [8, 1], strides = [1, 1]} : vector<8x100xf32> to vector<8x1xf32>
    %510 = vector.extract_strided_slice %21 {offsets = [1, 80], sizes = [1, 256], strides = [1, 1]} : vector<4x384xf32> to vector<1x256xf32>
    %511 = vector.broadcast %509 : vector<8x1xf32> to vector<8x256xf32>
    %512 = vector.broadcast %510 : vector<1x256xf32> to vector<8x256xf32>
    %513 = arith.mulf %511, %512 : vector<8x256xf32>
    %514 = arith.addf %508, %513 : vector<8x256xf32>
    %515 = vector.extract_strided_slice %12 {offsets = [0, 82], sizes = [8, 1], strides = [1, 1]} : vector<8x100xf32> to vector<8x1xf32>
    %516 = vector.extract_strided_slice %21 {offsets = [2, 80], sizes = [1, 256], strides = [1, 1]} : vector<4x384xf32> to vector<1x256xf32>
    %517 = vector.broadcast %515 : vector<8x1xf32> to vector<8x256xf32>
    %518 = vector.broadcast %516 : vector<1x256xf32> to vector<8x256xf32>
    %519 = arith.mulf %517, %518 : vector<8x256xf32>
    %520 = arith.addf %514, %519 : vector<8x256xf32>
    %521 = vector.extract_strided_slice %12 {offsets = [0, 83], sizes = [8, 1], strides = [1, 1]} : vector<8x100xf32> to vector<8x1xf32>
    %522 = vector.extract_strided_slice %21 {offsets = [3, 80], sizes = [1, 256], strides = [1, 1]} : vector<4x384xf32> to vector<1x256xf32>
    %523 = vector.broadcast %521 : vector<8x1xf32> to vector<8x256xf32>
    %524 = vector.broadcast %522 : vector<1x256xf32> to vector<8x256xf32>
    %525 = arith.mulf %523, %524 : vector<8x256xf32>
    %526 = arith.addf %520, %525 : vector<8x256xf32>
    %527 = vector.extract_strided_slice %12 {offsets = [0, 84], sizes = [8, 1], strides = [1, 1]} : vector<8x100xf32> to vector<8x1xf32>
    %528 = vector.extract_strided_slice %21 {offsets = [0, 81], sizes = [1, 256], strides = [1, 1]} : vector<4x384xf32> to vector<1x256xf32>
    %529 = vector.broadcast %527 : vector<8x1xf32> to vector<8x256xf32>
    %530 = vector.broadcast %528 : vector<1x256xf32> to vector<8x256xf32>
    %531 = arith.mulf %529, %530 : vector<8x256xf32>
    %532 = arith.addf %526, %531 : vector<8x256xf32>
    %533 = vector.extract_strided_slice %12 {offsets = [0, 85], sizes = [8, 1], strides = [1, 1]} : vector<8x100xf32> to vector<8x1xf32>
    %534 = vector.extract_strided_slice %21 {offsets = [1, 81], sizes = [1, 256], strides = [1, 1]} : vector<4x384xf32> to vector<1x256xf32>
    %535 = vector.broadcast %533 : vector<8x1xf32> to vector<8x256xf32>
    %536 = vector.broadcast %534 : vector<1x256xf32> to vector<8x256xf32>
    %537 = arith.mulf %535, %536 : vector<8x256xf32>
    %538 = arith.addf %532, %537 : vector<8x256xf32>
    %539 = vector.extract_strided_slice %12 {offsets = [0, 86], sizes = [8, 1], strides = [1, 1]} : vector<8x100xf32> to vector<8x1xf32>
    %540 = vector.extract_strided_slice %21 {offsets = [2, 81], sizes = [1, 256], strides = [1, 1]} : vector<4x384xf32> to vector<1x256xf32>
    %541 = vector.broadcast %539 : vector<8x1xf32> to vector<8x256xf32>
    %542 = vector.broadcast %540 : vector<1x256xf32> to vector<8x256xf32>
    %543 = arith.mulf %541, %542 : vector<8x256xf32>
    %544 = arith.addf %538, %543 : vector<8x256xf32>
    %545 = vector.extract_strided_slice %12 {offsets = [0, 87], sizes = [8, 1], strides = [1, 1]} : vector<8x100xf32> to vector<8x1xf32>
    %546 = vector.extract_strided_slice %21 {offsets = [3, 81], sizes = [1, 256], strides = [1, 1]} : vector<4x384xf32> to vector<1x256xf32>
    %547 = vector.broadcast %545 : vector<8x1xf32> to vector<8x256xf32>
    %548 = vector.broadcast %546 : vector<1x256xf32> to vector<8x256xf32>
    %549 = arith.mulf %547, %548 : vector<8x256xf32>
    %550 = arith.addf %544, %549 : vector<8x256xf32>
    %551 = vector.extract_strided_slice %12 {offsets = [0, 88], sizes = [8, 1], strides = [1, 1]} : vector<8x100xf32> to vector<8x1xf32>
    %552 = vector.extract_strided_slice %21 {offsets = [0, 82], sizes = [1, 256], strides = [1, 1]} : vector<4x384xf32> to vector<1x256xf32>
    %553 = vector.broadcast %551 : vector<8x1xf32> to vector<8x256xf32>
    %554 = vector.broadcast %552 : vector<1x256xf32> to vector<8x256xf32>
    %555 = arith.mulf %553, %554 : vector<8x256xf32>
    %556 = arith.addf %550, %555 : vector<8x256xf32>
    %557 = vector.extract_strided_slice %12 {offsets = [0, 89], sizes = [8, 1], strides = [1, 1]} : vector<8x100xf32> to vector<8x1xf32>
    %558 = vector.extract_strided_slice %21 {offsets = [1, 82], sizes = [1, 256], strides = [1, 1]} : vector<4x384xf32> to vector<1x256xf32>
    %559 = vector.broadcast %557 : vector<8x1xf32> to vector<8x256xf32>
    %560 = vector.broadcast %558 : vector<1x256xf32> to vector<8x256xf32>
    %561 = arith.mulf %559, %560 : vector<8x256xf32>
    %562 = arith.addf %556, %561 : vector<8x256xf32>
    %563 = vector.extract_strided_slice %12 {offsets = [0, 90], sizes = [8, 1], strides = [1, 1]} : vector<8x100xf32> to vector<8x1xf32>
    %564 = vector.extract_strided_slice %21 {offsets = [2, 82], sizes = [1, 256], strides = [1, 1]} : vector<4x384xf32> to vector<1x256xf32>
    %565 = vector.broadcast %563 : vector<8x1xf32> to vector<8x256xf32>
    %566 = vector.broadcast %564 : vector<1x256xf32> to vector<8x256xf32>
    %567 = arith.mulf %565, %566 : vector<8x256xf32>
    %568 = arith.addf %562, %567 : vector<8x256xf32>
    %569 = vector.extract_strided_slice %12 {offsets = [0, 91], sizes = [8, 1], strides = [1, 1]} : vector<8x100xf32> to vector<8x1xf32>
    %570 = vector.extract_strided_slice %21 {offsets = [3, 82], sizes = [1, 256], strides = [1, 1]} : vector<4x384xf32> to vector<1x256xf32>
    %571 = vector.broadcast %569 : vector<8x1xf32> to vector<8x256xf32>
    %572 = vector.broadcast %570 : vector<1x256xf32> to vector<8x256xf32>
    %573 = arith.mulf %571, %572 : vector<8x256xf32>
    %574 = arith.addf %568, %573 : vector<8x256xf32>
    %575 = vector.extract_strided_slice %12 {offsets = [0, 92], sizes = [8, 1], strides = [1, 1]} : vector<8x100xf32> to vector<8x1xf32>
    %576 = vector.extract_strided_slice %21 {offsets = [0, 83], sizes = [1, 256], strides = [1, 1]} : vector<4x384xf32> to vector<1x256xf32>
    %577 = vector.broadcast %575 : vector<8x1xf32> to vector<8x256xf32>
    %578 = vector.broadcast %576 : vector<1x256xf32> to vector<8x256xf32>
    %579 = arith.mulf %577, %578 : vector<8x256xf32>
    %580 = arith.addf %574, %579 : vector<8x256xf32>
    %581 = vector.extract_strided_slice %12 {offsets = [0, 93], sizes = [8, 1], strides = [1, 1]} : vector<8x100xf32> to vector<8x1xf32>
    %582 = vector.extract_strided_slice %21 {offsets = [1, 83], sizes = [1, 256], strides = [1, 1]} : vector<4x384xf32> to vector<1x256xf32>
    %583 = vector.broadcast %581 : vector<8x1xf32> to vector<8x256xf32>
    %584 = vector.broadcast %582 : vector<1x256xf32> to vector<8x256xf32>
    %585 = arith.mulf %583, %584 : vector<8x256xf32>
    %586 = arith.addf %580, %585 : vector<8x256xf32>
    %587 = vector.extract_strided_slice %12 {offsets = [0, 94], sizes = [8, 1], strides = [1, 1]} : vector<8x100xf32> to vector<8x1xf32>
    %588 = vector.extract_strided_slice %21 {offsets = [2, 83], sizes = [1, 256], strides = [1, 1]} : vector<4x384xf32> to vector<1x256xf32>
    %589 = vector.broadcast %587 : vector<8x1xf32> to vector<8x256xf32>
    %590 = vector.broadcast %588 : vector<1x256xf32> to vector<8x256xf32>
    %591 = arith.mulf %589, %590 : vector<8x256xf32>
    %592 = arith.addf %586, %591 : vector<8x256xf32>
    %593 = vector.extract_strided_slice %12 {offsets = [0, 95], sizes = [8, 1], strides = [1, 1]} : vector<8x100xf32> to vector<8x1xf32>
    %594 = vector.extract_strided_slice %21 {offsets = [3, 83], sizes = [1, 256], strides = [1, 1]} : vector<4x384xf32> to vector<1x256xf32>
    %595 = vector.broadcast %593 : vector<8x1xf32> to vector<8x256xf32>
    %596 = vector.broadcast %594 : vector<1x256xf32> to vector<8x256xf32>
    %597 = arith.mulf %595, %596 : vector<8x256xf32>
    %598 = arith.addf %592, %597 : vector<8x256xf32>
    %599 = vector.extract_strided_slice %12 {offsets = [0, 96], sizes = [8, 1], strides = [1, 1]} : vector<8x100xf32> to vector<8x1xf32>
    %600 = vector.extract_strided_slice %21 {offsets = [0, 84], sizes = [1, 256], strides = [1, 1]} : vector<4x384xf32> to vector<1x256xf32>
    %601 = vector.broadcast %599 : vector<8x1xf32> to vector<8x256xf32>
    %602 = vector.broadcast %600 : vector<1x256xf32> to vector<8x256xf32>
    %603 = arith.mulf %601, %602 : vector<8x256xf32>
    %604 = arith.addf %598, %603 : vector<8x256xf32>
    %605 = vector.extract_strided_slice %12 {offsets = [0, 97], sizes = [8, 1], strides = [1, 1]} : vector<8x100xf32> to vector<8x1xf32>
    %606 = vector.extract_strided_slice %21 {offsets = [1, 84], sizes = [1, 256], strides = [1, 1]} : vector<4x384xf32> to vector<1x256xf32>
    %607 = vector.broadcast %605 : vector<8x1xf32> to vector<8x256xf32>
    %608 = vector.broadcast %606 : vector<1x256xf32> to vector<8x256xf32>
    %609 = arith.mulf %607, %608 : vector<8x256xf32>
    %610 = arith.addf %604, %609 : vector<8x256xf32>
    %611 = vector.extract_strided_slice %12 {offsets = [0, 98], sizes = [8, 1], strides = [1, 1]} : vector<8x100xf32> to vector<8x1xf32>
    %612 = vector.extract_strided_slice %21 {offsets = [2, 84], sizes = [1, 256], strides = [1, 1]} : vector<4x384xf32> to vector<1x256xf32>
    %613 = vector.broadcast %611 : vector<8x1xf32> to vector<8x256xf32>
    %614 = vector.broadcast %612 : vector<1x256xf32> to vector<8x256xf32>
    %615 = arith.mulf %613, %614 : vector<8x256xf32>
    %616 = arith.addf %610, %615 : vector<8x256xf32>
    %617 = vector.extract_strided_slice %12 {offsets = [0, 99], sizes = [8, 1], strides = [1, 1]} : vector<8x100xf32> to vector<8x1xf32>
    %618 = vector.extract_strided_slice %21 {offsets = [3, 84], sizes = [1, 256], strides = [1, 1]} : vector<4x384xf32> to vector<1x256xf32>
    %619 = vector.broadcast %617 : vector<8x1xf32> to vector<8x256xf32>
    %620 = vector.broadcast %618 : vector<1x256xf32> to vector<8x256xf32>
    %621 = arith.mulf %619, %620 : vector<8x256xf32>
    %622 = arith.addf %616, %621 : vector<8x256xf32>
    %623 = vector.broadcast %18 : vector<1x1xf32> to vector<8x1xf32>
    %624 = arith.addf %9, %623 : vector<8x1xf32>
    %625 = math.log %622 : vector<8x256xf32>
    %626 = vector.broadcast %624 : vector<8x1xf32> to vector<8x256xf32>
    %627 = arith.addf %626, %625 : vector<8x256xf32>
    %cst_12 = arith.constant 0.0666666701 : f32
    %628 = vector.broadcast %cst_12 : f32 to vector<8x256xf32>
    %629 = arith.mulf %627, %628 : vector<8x256xf32>
    %cst_13 = arith.constant 0.000000e+00 : f32
    %630 = vector.broadcast %cst_13 : f32 to vector<8x256xf32>
    %631 = arith.subf %630, %629 : vector<8x256xf32>
    %c0_14 = arith.constant 0 : index
    %c0_15 = arith.constant 0 : index
    %c0_16 = arith.constant 0 : index
    %632 = vector.load %arg5[%c0_14, %c0_15, %c0_16] : memref<1x8x256xf32, #tpu.memory_space<vmem>>, vector<1x8x256xf32>
    %633 = vector.shape_cast %632 : vector<1x8x256xf32> to vector<8x256xf32>
    %634 = vector.shape_cast %631 : vector<8x256xf32> to vector<1x8x256xf32>
    tpu.vector_store %arg5[%c0_14, %c0_15, %c0_16], %634 {strides = array<i32>} : memref<1x8x256xf32, #tpu.memory_space<vmem>>, vector<1x8x256xf32>,
    return
  }
  func.func @transform_0(%arg0: i32, %arg1: i32) -> (i32, i32, i32) {
    %c0_i32 = arith.constant 0 : i32
    %c0_i32_0 = arith.constant 0 : i32
    return %arg0, %c0_i32, %arg1 : i32, i32, i32
  }
  func.func @transform_1(%arg0: i32, %arg1: i32) -> (i32, i32, i32) {
    %c1_i32 = arith.constant 1 : i32
    %0 = arith.addi %arg1, %c1_i32 : i32
    %c2_i32 = arith.constant 2 : i32
    %1 = arith.muli %0, %c2_i32 : i32
    %c0_i32 = arith.constant 0 : i32
    %c0_i32_0 = arith.constant 0 : i32
    return %arg0, %c0_i32, %1 : i32, i32, i32
  }
  func.func @transform_2(%arg0: i32, %arg1: i32) -> (i32, i32) {
    %c0_i32 = arith.constant 0 : i32
    %c0_i32_0 = arith.constant 0 : i32
    %c0_i32_1 = arith.constant 0 : i32
    return %c0_i32, %c0_i32_0 : i32, i32
  }
  func.func @transform_3(%arg0: i32, %arg1: i32) -> (i32, i32, i32) {
    %c0_i32 = arith.constant 0 : i32
    %c0_i32_0 = arith.constant 0 : i32
    return %arg0, %c0_i32, %arg1 : i32, i32, i32
  }
}

</mosaic_0001>

<bundles_post_ra>
// kernel: tpu_custom_call.1
= control target key start
LH: loop header
LB: loop body
LE: loop exit
PB: predicated region body
PF: predicated region fallthrough
CT: control target
= control target key end

     0   :  { %s5211_s0 = inlined_call_operand.hbm [shape: f32[2,4,768], index: 0, kind: input, shape index: {}]   ;;  %s5212_s1 = inlined_call_operand.hbm [shape: f32[2,4,768], index: 1, kind: input, shape index: {}]   ;;  %s5213_s2 = inlined_call_operand.hbm [shape: f32[8,100], index: 2, kind: input, shape index: {}]   ;;  %s5214_s3 = inlined_call_operand.hbm [shape: f32[2,8,512], index: 3, kind: output, shape index: {}]  }
   0x1   :  { %5293 = sst [smem:[#allocation139_spill]] %s5213_s2 }
   0x2   :  { %5294 = sst [smem:[#allocation140_spill]] %s5214_s3 }
   0x3   :  { %8 = vsyncpa [#allocation3], 0 }
   0x4   :  { %10 = vsyncpa [#allocation3 + $0x1], 0 }
   0x5   :  { %11 = vsyncpa [#allocation6], 0 }
   0x6   :  { %13 = vsyncpa [#allocation6 + $0x1], 0 }
   0x7   :  { %14 = vsyncpa [#allocation4], 0 }
   0x8   :  { %16 = vsyncpa [#allocation4 + $0x1], 0  ;;  %s3405_s12 = smov 0   ;;  %s3407_s13 = smov 0  }
   0x9   :  { %s3409_s14 = smov 0   ;;  %s3411_s15 = smov 0  }
   0xa   :  { %s3413_s16 = smov 0   ;;  %s3415_s17 = smov 0  }
   0xb   :  { %s3417_s18 = smov 0   ;;  %s3419_s19 = smov 0  }
   0xc   :  { %s3421_s20 = smov 0   ;;  %s3423_s21 = smov 0  }
   0xd   :  { %s3425_s22 = smov 0  }
   0xe LB: > { %5295 = sst [smem:[#allocation13_spill]] %s3230_s15  ;;  %s3459_s23 = sadd.s32 4294967295, %s3258_s22   ;;  %s3258_s22 = sphi %s3425_s22, %s22_s22   ;;  %s3254_s21 = sphi %s3423_s21, %s5623_s21   ;;  %s3250_s20 = sphi %s3421_s20, %s5629_s20   ;;  %s3246_s19 = sphi %s3419_s19, %s5621_s19   ;;  %s3242_s18 = sphi %s3417_s18, %s5620_s18   ;;  %s3238_s17 = sphi %s3415_s17, %s5619_s17   ;;  %s3234_s16 = sphi %s3413_s16, %s5628_s16   ;;  %s3230_s15 = sphi %s3411_s15, %s5627_s15   ;;  %s3226_s14 = sphi %s3409_s14, %s5626_s14   ;;  %s3222_s13 = sphi %s3407_s13, %s5625_s13   ;;  %s3218_s12 = sphi %s3405_s12, %s5624_s12  }
   0xf   : > { %5296 = sst [smem:[#allocation14_spill]] %s3238_s17  ;;  %p88_p0 = scmp.ne.s32.totalorder %s3222_s13, %s3218_s12 }
  0x10   : > { %5297 = sst [smem:[#allocation15_spill]] %s3250_s20  ;;  %p5218_p1 = scmp.eq.s32.totalorder %s3459_s23, 0 }
  0x11   : > { %5298 = sst [smem:[#allocation16_spill]] %s3254_s21  ;;  %p135_p2 = scmp.eq.s32.totalorder %s3459_s23, 3 }
  0x12   : > { %p2658_p3 = scmp.ge.s32.totalorder %s3258_s22, 1  ;;  %p148_p4 = scmp.lt.s32.totalorder %s3258_s22, 5 }
  0x13   : > { %p3468_p5 = por %p88_p0, %p5218_p1  ;;  %s5301_s2 = sld [smem:[#allocation139_spill]] }
  0x14   : > { %p3472_p6 = pnand %p2658_p3, %p148_p4  ;;  %s3260_s29 = smov [#allocation7]  }
  0x15   : > { %s162_s30 = sshll.u32 %s3260_s29, 4  ;;  %s2655_s4 = sadd.s32 4294967294, %s3258_s22   ;;  %s163_s30 = int_to_ptr.vmem [resolvable:$true] %s162_s30 }
  0x16   : > { %p2693_p7 = pneg %p3472_p6  ;;  %s31_s5 = sadd.s32 1, %s3250_s20 }
  0x17   : > { %p32_p9 = scmp.ge.s32.totalorder %s31_s5, 2  ;;  %s34_s6 = sadd.s32 1, %s3254_s21 }
  0x18   : > { %p2694_p8 = pnand %p2693_p7, %p5218_p1  ;;  %s43_s7 = sadd.s32 1, %s3238_s17 }
  0x19   : > { %s160_s28 = sshll.u32 %s5301_s2, 4  ;;  %p50_p10 = scmp.ne.s32.totalorder %s3238_s17, %s3234_s16  ;;  %s161_s28 = int_to_ptr.hbm [resolvable:$true] %s160_s28 }
  0x1a   : > { %2696 = dma.hbm_to_vmem [thread:$0]  (!%p2694_p8), %s161_s28, 128, %s163_s30, [#allocation6]  }
  0x1b   : > { %s5631_s5 = smov (%p32_p9, %s31_s5), 0  ;;  %s5633_s6 = smov (!%p32_p9, %s34_s6), %s3254_s21 }
  0x1c   : > { %5302 = sst [smem:[#allocation17_spill]] %s5631_s5  ;;  %s39_s8 = ssub.s32 %s3250_s20, %s5631_s5 }
  0x1d   : > { %p51_p11 = scmp.eq.s32.totalorder %s3258_s22, 0  ;;  %p36_p12 = scmp.ge.s32.totalorder %s5633_s6, 2 }
  0x1e   : > { %p56_p13 = scmp.ne.s32.totalorder %s3234_s16, %s3230_s15  ;;  %s2678_s10 = sshll.u32 %s3250_s20, 1 }
  0x1f   : > { %p3502_p0 = por %p51_p11, %p50_p10  ;;  %s5635_s6 = smov (%p36_p12, %s5633_s6), 0 }
  0x20   : > { %5304 = sst [smem:[#allocation18_spill]] %s5635_s6  ;;  %p3514_p3 = por %p5218_p1, %p56_p13 }
  0x21   : > { %s2679_s12 = sadd.s32 2, %s2678_s10  ;;  %s38_s26 = ssub.s32 %s3254_s21, %s5635_s6 }
  0x22   : > { %s2680_s27 = sshll.u32 %s5631_s5, 1  ;;  %s40_s28 = sor.u32 %s39_s8, %s38_s26 }
  0x23   : > { %s2681_s29 = sadd.s32 2, %s2680_s27  ;;  %p41_p4 = scmp.eq.s32.totalorder %s40_s28, 0 }
  0x24   : > { %s71_s30 = ssub.s32 %s2679_s12, %s2681_s29  ;;  %p3526_p7 = por %p135_p2, %p50_p10 }
  0x25   : > { %s72_s2 = sor.u32 %s71_s30, %s38_s26  ;;  %p141_p9 = scmp.eq.s32.totalorder %s2655_s4, 3 }
  0x26   : > { %s3531_s3 = scalar_select %p41_p4, %s3238_s17, %s43_s7  }
  0x27   : > { %p73_p8 = scmp.eq.s32.totalorder %s72_s2, 0  ;;  %p2709_p12 = scmp.lt.s32.totalorder %s3258_s22, 4 }
  0x28   : > { %5307 = sst [smem:[#allocation19_spill]] %s3531_s3  ;;  %s173_s6 = sand.u32 1, %s3238_s17  }
  0x29   : > { %p3538_p1 = por %p141_p9, %p56_p13  ;;  %s2661_s12 = sshll.u32 %s173_s6, 3 }
  0x2a   : > { %s2682_s26 = smul.u32 6, %s3254_s21  ;;  %p2698_p2 = pnand %p2709_p12, %p3502_p0 }
  0x2b   : > { %s5308_s8 = scalar_select %p3538_p1, 1, 0 }
  0x2c   : > { %s182_s7 = sadd.s32 %s2682_s26, %s2678_s10  ;;  %s177_s4 = scalar_lea.vmem [#allocation2], %s2661_s12 }
  0x2d   : > { %5309 = sst [smem:[#allocation20_spill]] %s5308_s8  ;;  %s188_s27 = sshll.u32 %s177_s4, 4  ;;  %s189_s27 = int_to_ptr.vmem [resolvable:$true] %s188_s27 }
  0x2e   : > { %s2663_s28 = sshll.u32 %s182_s7, 2  ;;  %s174_s9 = scalar_lea.sflag [#allocation3], %s173_s6 }
  0x2f   : > { %s184_s5 = scalar_lea.hbm %s5211_s0, %s2663_s28  ;;  %s2573_s21 = scalar_lea.hbm %s5212_s1, %s2663_s28 }
  0x30   : > { %s186_s3 = sshll.u32 %s184_s5, 4  ;;  %s195_s15 = sand.u32 1, %s3258_s22   ;;  %s187_s3 = int_to_ptr.hbm [resolvable:$true] %s186_s3 }
  0x31   : > { %2700 = dma.hbm_to_vmem [thread:$0]  (!%p2698_p2), %s187_s3, 128, %s189_s27, %s174_s9  }
  0x32   : > { %s75_s10 = sadd.s32 1, %s3226_s14  ;;  %p82_p10 = scmp.ne.s32.totalorder %s3226_s14, %s3222_s13 }
  0x33   : > { %s3559_s12 = scalar_select %p73_p8, %s3226_s14, %s75_s10  }
  0x34   : > { %p84_p13 = por %p82_p10, %p51_p11  ;;  %s197_s26 = sand.u32 1, %s3226_s14  }
  0x35   : > { %s2574_s7 = scalar_lea.hbm %s2573_s21, 8  ;;  %s2664_s4 = sshll.u32 %s197_s26, 2 }
  0x36   : > { %s209_s5 = sshll.u32 %s2574_s7, 4  ;;  %s199_s29 = scalar_lea.vmem [#allocation5], %s2664_s4  ;;  %s210_s5 = int_to_ptr.hbm [resolvable:$true] %s209_s5 }
  0x37   : > { %s211_s17 = sshll.u32 %s199_s29, 4  ;;  %p2701_p0 = pnand %p2709_p12, %p84_p13  ;;  %s212_s17 = int_to_ptr.vmem [resolvable:$true] %s211_s17 }
  0x38   : > { %s196_s6 = scalar_lea.sflag [#allocation6], %s195_s15  ;;  %220 = sbr.rel (%p3472_p6) target bundleno = 8607 (0x219f), region = 32 }
  0x39   : > { %2703 = dma.hbm_to_vmem [thread:$0]  (!%p2701_p0), %s210_s5, 64, %s212_s17, %s196_s6  }
  0x3d   : > { %s3569_s2 = sand.u32 1, %s3234_s16  }
  0x3e   : > { %s2668_s3 = sshll.u32 %s3569_s2, 3  ;;  %s223_s21 = scalar_lea.sflag [#allocation3], %s3569_s2 }
  0x3f   : > { %s226_s8 = scalar_lea.vmem [#allocation2], %s2668_s3 }
  0x40   : > { %3201 = dma.done.wait (%p3514_p3), %s223_s21, 128  }
  0x41   : > { %3203 = vsyncadd (%p3514_p3), %s223_s21, 4294967168  ;;  %s232_s15 = sand.u32 1, %s3459_s23   ;;  %s234_s25 = sand.u32 1, %s3222_s13  }
  0x42   : > { %s2669_s27 = sshll.u32 %s234_s25, 2  ;;  %s233_s28 = scalar_lea.sflag [#allocation6], %s232_s15 }
  0x43   : > { %s236_s30 = scalar_lea.vmem [#allocation5], %s2669_s27 }
  0x44   : > { %3205 = dma.done.wait (%p3468_p5), %s233_s28, 64  }
  0x45   : > { %3207 = vsyncadd (%p3468_p5), %s233_s28, 4294967232  ;;  %p5310_p6 = scmp.eq.s32.totalorder %s3459_s23, 0 }
  0x47   : > { %3209 = dma.done.wait (%p5310_p6), [#allocation6], 128   ;;  %p5311_p11 = pmov %p5310_p6 }
  0x48   : > { %v274_v0 = vld [vmem:[%s226_s8] sm:$0xff]  ;;  %v282_v1 = vld [vmem:[#allocation7] sm:$0xff]  ;;  %vm284_vm0 = vcmask 818176   ;;  %v275_v4 = vld [vmem:[%s236_s30] sm:$0xf]  ;;  %vm294_vm1 = vcmask 1043456  }
  0x49   : > { %3211 = vsyncadd (%p5311_p11), [#allocation6], 4294967168  ;;  %277 = vst [vmem:[#allocation1] ss:$2 sm:$0xff] %v274_v0  ;;  %v283_v2 = vmul.f32 15.0, %v282_v1  ;;  %v3587_v5 = vmul.f32 -15.0, %v275_v4 }
  0x4a   : > { %v3261_v15 = vmov 4   ;;  %v3262_v16 = vmov 2   ;;  %v3263_v17 = vmov 0   ;;  %v3264_v22 = vmov 3   ;;  %s3284_s23 = smov 127   ;;  %s3285_s24 = smov 126  }
  0x4b   : > { %v285_v3 = vsel %vm284_vm0, %v283_v2, -inf  ;;  %v297_v12 = vsel %vm294_vm1, %v3587_v5, -inf  ;;  %2929 = vset.pattern.permute.xlu0 %v3261_v15  ;;  %2927 = vset.pattern.permute.xlu2 %v3262_v16  ;;  %v3265_v23 = vmov 1   ;;  %v3266_v24 = vmov 9   ;;  %s3286_s11 = smov 125   ;;  %s3288_s9 = smov 124  }
  0x4c   : > { %286 = vmax.xlane.f32.xlu0 %v285_v3  ;;  %2925 = vset.pattern.permute.xlu1 %v3263_v17  ;;  %v3267_v25 = vmov 5   ;;  %v3268_v26 = vmov 7   ;;  %v3269_v27 = vmov 11   ;;  %v3270_v28 = vmov 6   ;;  %s3289_s10 = smov 108   ;;  %s3292_s26 = smov 107  }
  0x4d   : > { %v3271_v29 = vmov 13   ;;  %v3272_v30 = vmov 8   ;;  %v3273_v31 = vmov 15   ;;  %v3274_v32 = vmov 10   ;;  %s3297_s7 = smov 106   ;;  %s3302_s4 = smov 105  }
  0x4e   : > { %v3275_v33 = vmov 17   ;;  %v3276_v34 = vmov 12   ;;  %v3277_v35 = vmov 19   ;;  %v3278_v36 = vmov 14   ;;  %s3307_s5 = smov 104   ;;  %s3312_s29 = smov 88  }
  0x4f   : > { %v3279_v37 = vmov 21   ;;  %v3280_v40 = vmov 16   ;;  %v3281_v43 = vmov 18   ;;  %v3282_v47 = vmov 20   ;;  %s3317_s17 = smov 87   ;;  %s3322_s6 = smov 86  }
  0x50   : > { %v278_v6 = vld.sshfl [vmem:[#allocation1] sm:$0xff pattern:$0x75316420]  ;;  %v279_v7 = vld.sshfl [vmem:[#allocation1 + $0x8] sm:$0xff pattern:$0x75316420] }
  0x51   : > { %v3589_v8 = vmul.f32 -15.0, %v278_v6  ;;  %v3591_v9 = vmul.f32 -15.0, %v279_v7  ;;  %v3283_v52 = vmov 22   ;;  %s3327_s3 = smov 85   ;;  %s3332_s21 = smov 84   ;;  %vm376_vm2 = vcmask 1039360  }
  0x52   : > { %vm468_vm3 = vcmask 1031168   ;;  %vm557_vm4 = vcmask 1022976   ;;  %vm646_vm5 = vcmask 1014784   ;;  %vm735_vm6 = vcmask 883712   ;;  %s3337_s8 = smov 68   ;;  %s3342_s15 = smov 67  }
  0x53   : > { %v295_v10 = vsel %vm294_vm1, %v3589_v8, -inf  ;;  %v296_v11 = vsel %vm294_vm1, %v3591_v9, -inf  ;;  %vm824_vm7 = vcmask 875520   ;;  %vm913_vm8 = vcmask 867328   ;;  %s3347_s25 = smov 66   ;;  %s3352_s27 = smov 65  }
  0x54   : > { %v298_v13 = vmax.f32 %v295_v10, %v296_v11  ;;  %vm1002_vm9 = vcmask 859136   ;;  %vm1091_vm10 = vcmask 850944   ;;  %vm1180_vm11 = vcmask 719872   ;;  %s3357_s28 = smov 64   ;;  %s3362_s30 = smov 48  }
  0x55   : > { %vm1269_vm12 = vcmask 711680   ;;  %vm1358_vm13 = vcmask 703488   ;;  %vm1447_vm14 = vcmask 695296   ;;  %vm1536_vm15 = vcmask 687104  }
  0x56   : > { %v299_v14 = vmax.f32 %v298_v13, %v297_v12  ;;  %vm1625_vm0 = vcmask 556032  }
  0x58   : > { %300 = vmax.xlane.f32.xlu0 %v299_v14 }
  0xbf   : > { %v3599_v18 = vpop.xlane.xlu0 %286 }
  0xc0   : > { %5312 = vst [vmem:[#allocation21_spill] sm:$0xff] %v3599_v18  ;;  %v288_v19 = vsub.f32 %v283_v2, %v3599_v18 }
  0xc2   : > { %v289_v20 = vmul.f32 1.442695, %v288_v19 }
  0xc4   : > { %3026 = vpow2.f32 %v289_v20 }
  0xca   : > { %v3602_v21 = vpop.eup %3026 }
  0xcb   : > { %340 = vperm.xlu2 %2927, %v3602_v21   ;;  %320 = vperm.xlu1 %2925, %v3602_v21   ;;  %v301_v38 = vpop.xlane.xlu0 %300 }
  0xcc   : > { %360 = vperm.xlu0 %2929, %v3602_v21   ;;  %v302_v39 = vsel %vm294_vm1, %v301_v38, -inf  ;;  %vm5289_vm1 = vcmask 547840  }
  0xcd   : > { %v303_v41 = vrot.slane %v302_v39, 4 }
  0xcf   : > { %v304_v42 = vmax.f32 %v302_v39, %v303_v41 }
  0xd1   : > { %v305_v44 = vrot.slane %v304_v42, 2 }
  0xd3   : > { %2928 = vset.pattern.permute.xlu2 %v3264_v22  ;;  %2926 = vset.pattern.permute.xlu1 %v3265_v23  ;;  %v306_v45 = vmax.f32 %v304_v42, %v305_v44 }
  0xd4   : > { %2934 = vset.pattern.permute.xlu0 %v3266_v24  ;;  %350 = vperm.xlu2 %2928, %v3602_v21  }
  0xd5   : > { %330 = vperm.xlu1 %2926, %v3602_v21   ;;  %476 = vperm.xlu0 %2934, %v3602_v21   ;;  %v307_v46 = vrot.slane %v306_v45, 1 }
  0xd7   : > { %v3629_v49 = vmax.f32 %v306_v45, %v307_v46 }
  0xd9   : > { %5313 = vst [vmem:[#allocation22_spill] sm:$0xff] %v3629_v49  ;;  %v309_v50 = vsub.f32 %v3589_v8, %v3629_v49  ;;  %v310_v51 = vsub.f32 %v3591_v9, %v3629_v49  ;;  %v311_v54 = vsub.f32 %v3587_v5, %v3629_v49 }
  0xdb   : > { %v312_v55 = vmul.f32 1.442695, %v309_v50  ;;  %v314_v56 = vmul.f32 1.442695, %v310_v51  ;;  %v316_v57 = vmul.f32 1.442695, %v311_v54 }
  0xdc   : > { %2930 = vset.pattern.permute.xlu2 %v3267_v25  ;;  %v3287_v50 = vmov 23  }
  0xdd   : > { %2932 = vset.pattern.permute.xlu1 %v3268_v26  ;;  %2936 = vset.pattern.permute.xlu0 %v3269_v27  ;;  %3028 = vpow2.f32 %v312_v55 }
  0xde   : > { %384 = vperm.xlu2 %2930, %v3602_v21   ;;  %430 = vperm.xlu1 %2932, %v3602_v21   ;;  %3030 = vpow2.f32 %v314_v56 }
  0xdf   : > { %520 = vperm.xlu0 %2936, %v3602_v21   ;;  %3032 = vpow2.f32 %v316_v57 }
  0xe3   : > { %v3029_v59 = vpop.eup %3028 }
  0xe4   : > { %v3031_v60 = vpop.eup %3030  ;;  %v3640_v61 = vperm.slane %v3029_v59, 0  ;;  %v3664_v13 = vperm.slane %v3029_v59, 1  ;;  %v3678_v24 = vperm.slane %v3029_v59, 3 }
  0xe5   : > { %v3642_v62 = vperm.slane %v3031_v60, 0  ;;  %v3033_v63 = vpop.eup %3032  ;;  %v3653_v7 = vperm.slane %v3031_v60, 1  ;;  %v3666_v14 = vperm.slane %v3031_v60, 2  ;;  %v3668_v15 = vperm.slane %v3031_v60, 3 }
  0xe6   : > { %2931 = vset.pattern.permute.xlu2 %v3270_v28  ;;  %5314 = vst [vmem:[#allocation23_spill] sm:$0xff] %v3640_v61  ;;  %v3646_v1 = vperm.slane %v3033_v63, 2  ;;  %v3655_v8 = vperm.slane %v3033_v63, 0  ;;  %v3675_v22 = vperm.slane %v3033_v63, 1 }
  0xe7   : > { %2938 = vset.pattern.permute.xlu0 %v3271_v29  ;;  %407 = vperm.xlu2 %2931, %v3602_v21   ;;  %5315 = vst [vmem:[#allocation24_spill] sm:$0xff] %v3642_v62  ;;  %v3688_v29 = vperm.slane %v3029_v59, 2 }
  0xe8   : > { %565 = vperm.xlu0 %2938, %v3602_v21   ;;  %5317 = vst [vmem:[#allocation26_spill] sm:$0xff] %v3646_v1 }
  0xe9   : > { %5318 = vst [vmem:[#allocation27_spill] sm:$0xff] %v3653_v7 }
  0xea   : > { %5319 = vst [vmem:[#allocation28_spill] sm:$0xff] %v3655_v8 }
  0xeb   : > { %5321 = vst [vmem:[#allocation30_spill] sm:$0xff] %v3664_v13 }
  0xec   : > { %5322 = vst [vmem:[#allocation31_spill] sm:$0xff] %v3666_v14 }
  0xed   : > { %5323 = vst [vmem:[#allocation32_spill] sm:$0xff] %v3668_v15 }
  0xee   : > { %5324 = vst [vmem:[#allocation33_spill] sm:$0xff] %v3675_v22 }
  0xef   : > { %2933 = vset.pattern.permute.xlu2 %v3272_v30  ;;  %5325 = vst [vmem:[#allocation34_spill] sm:$0xff] %v3678_v24 }
  0xf0   : > { %2940 = vset.pattern.permute.xlu0 %v3273_v31  ;;  %453 = vperm.xlu2 %2933, %v3602_v21  }
  0xf1   : > { %609 = vperm.xlu0 %2940, %v3602_v21  }
  0xf8   : > { %2935 = vset.pattern.permute.xlu2 %v3274_v32 }
  0xf9   : > { %2942 = vset.pattern.permute.xlu0 %v3275_v33  ;;  %498 = vperm.xlu2 %2935, %v3602_v21  }
  0xfa   : > { %654 = vperm.xlu0 %2942, %v3602_v21  }
 0x101   : > { %2937 = vset.pattern.permute.xlu2 %v3276_v34  ;;  %v3696_v34 = vperm.slane %v3033_v63, 3 }
 0x102   : > { %2944 = vset.pattern.permute.xlu0 %v3277_v35  ;;  %542 = vperm.xlu2 %2937, %v3602_v21  }
 0x103   : > { %698 = vperm.xlu0 %2944, %v3602_v21   ;;  %5326 = vst [vmem:[#allocation35_spill] sm:$0xff] %v3696_v34 }
 0x10a   : > { %2939 = vset.pattern.permute.xlu2 %v3278_v36 }
 0x10b   : > { %2946 = vset.pattern.permute.xlu0 %v3279_v37  ;;  %587 = vperm.xlu2 %2939, %v3602_v21  }
 0x10c   : > { %743 = vperm.xlu0 %2946, %v3602_v21  }
 0x113   : > { %2941 = vset.pattern.permute.xlu2 %v3280_v40 }
 0x114   : > { %631 = vperm.xlu2 %2941, %v3602_v21   ;;  %2948 = vset.pattern.permute.xlu0 %v3287_v50 }
 0x11c   : > { %2943 = vset.pattern.permute.xlu2 %v3281_v43 }
 0x11d   : > { %676 = vperm.xlu2 %2943, %v3602_v21  }
 0x125   : > { %2945 = vset.pattern.permute.xlu2 %v3282_v47  ;;  %v3626_v48 = vpop.permute.xlu2 %340 }
 0x126   : > { %720 = vperm.xlu2 %2945, %v3602_v21  }
 0x12e   : > { %2947 = vset.pattern.permute.xlu2 %v3283_v52  ;;  %v3635_v53 = vpop.permute.xlu2 %350 }
 0x12f   : > { %765 = vperm.xlu2 %2947, %v3602_v21  }
 0x138   : > { %v385_v58 = vpop.permute.xlu2 %384 }
 0x139   : > { %v389_v10 = vmul.f32 %v385_v58, %v3653_v7  ;;  %v388_v17 = vmul.f32 %v385_v58, %v3664_v13  ;;  %v390_v26 = vmul.f32 %v3675_v22, %v385_v58 }
 0x13d   : > { %v3644_v0 = vpop.permute.xlu1 %320 }
 0x13e   : > { %5316 = vst [vmem:[#allocation25_spill] sm:$0xff] %v3644_v0  ;;  %v361_v2 = vpop.permute.xlu0 %360 }
 0x13f   : > { %v365_v3 = vmul.f32 %v361_v2, %v3642_v62  ;;  %v364_v4 = vmul.f32 %v361_v2, %v3640_v61  ;;  %v366_v11 = vmul.f32 %v3655_v8, %v361_v2 }
 0x141   : > { %v408_v5 = vpop.permute.xlu2 %407  ;;  %372 = vrot.lane.b32.xlu2 %v365_v3, %s3284_s23  ;;  %370 = vrot.lane.b32.xlu1 %v364_v4, %s3284_s23 }
 0x142   : > { %v413_v6 = vmul.f32 %v3646_v1, %v408_v5  ;;  %v412_v16 = vmul.f32 %v408_v5, %v3666_v14  ;;  %v411_v31 = vmul.f32 %v408_v5, %v3688_v29 }
 0x144   : > { %421 = vrot.lane.b32.xlu0 %v413_v6, %s3284_s23 }
 0x147   : > { %v3658_v9 = vpop.permute.xlu1 %330  ;;  %v477_v33 = vpop.permute.xlu0 %476 }
 0x148   : > { %5320 = vst [vmem:[#allocation29_spill] sm:$0xff] %v3658_v9  ;;  %v480_v37 = vmul.f32 %v477_v33, %v3653_v7  ;;  %v479_v44 = vmul.f32 %v477_v33, %v3664_v13  ;;  %v481_v51 = vmul.f32 %v477_v33, %v3675_v22 }
 0x149   : > { %396 = vrot.lane.b32.xlu2 %v389_v10, %s3284_s23  ;;  %374 = vrot.lane.b32.xlu1 %v366_v11, %s3284_s23 }
 0x14a   : > { %v454_v12 = vpop.permute.xlu2 %453 }
 0x14b   : > { %v456_v27 = vmul.f32 %v454_v12, %v3640_v61  ;;  %v458_v30 = vmul.f32 %v454_v12, %v3655_v8  ;;  %v457_v39 = vmul.f32 %v454_v12, %v3642_v62 }
 0x150   : > { %v431_v19 = vpop.permute.xlu1 %430 }
 0x151   : > { %419 = vrot.lane.b32.xlu2 %v412_v16, %s3284_s23  ;;  %394 = vrot.lane.b32.xlu1 %v388_v17, %s3284_s23  ;;  %v435_v20 = vmul.f32 %v431_v19, %v3668_v15  ;;  %v434_v25 = vmul.f32 %v431_v19, %v3678_v24  ;;  %v436_v36 = vmul.f32 %v3696_v34, %v431_v19  ;;  %v521_v43 = vpop.permute.xlu0 %520 }
 0x152   : > { %v524_v45 = vmul.f32 %v521_v43, %v3668_v15  ;;  %v523_v63 = vmul.f32 %v521_v43, %v3678_v24  ;;  %v525_v5 = vmul.f32 %v521_v43, %v3696_v34 }
 0x153   : > { %v499_v23 = vpop.permute.xlu2 %498  ;;  %442 = vrot.lane.b32.xlu0 %v435_v20, %s3284_s23 }
 0x154   : > { %v501_v32 = vmul.f32 %v499_v23, %v3688_v29  ;;  %v503_v40 = vmul.f32 %v499_v23, %v3646_v1  ;;  %v502_v57 = vmul.f32 %v499_v23, %v3666_v14 }
 0x159   : > { %440 = vrot.lane.b32.xlu2 %v434_v25, %s3284_s23  ;;  %398 = vrot.lane.b32.xlu1 %v390_v26, %s3284_s23 }
 0x15a   : > { %v566_v55 = vpop.permute.xlu0 %565 }
 0x15b   : > { %462 = vrot.lane.b32.xlu0 %v456_v27, %s3285_s24  ;;  %v569_v58 = vmul.f32 %v566_v55, %v3653_v7  ;;  %v568_v16 = vmul.f32 %v566_v55, %v3664_v13  ;;  %v570_v23 = vmul.f32 %v566_v55, %v3675_v22 }
 0x15c   : > { %v3686_v28 = vpop.permute.xlu2 %542 }
 0x15d   : > { %v545_v38 = vmul.f32 %v3686_v28, %v3640_v61  ;;  %v547_v52 = vmul.f32 %v3686_v28, %v3655_v8  ;;  %v546_v10 = vmul.f32 %v3686_v28, %v3642_v62 }
 0x161   : > { %466 = vrot.lane.b32.xlu2 %v458_v30, %s3285_s24  ;;  %417 = vrot.lane.b32.xlu1 %v411_v31, %s3284_s23 }
 0x163   : > { %507 = vrot.lane.b32.xlu0 %v501_v32, %s3285_s24  ;;  %v610_v4 = vpop.permute.xlu0 %609 }
 0x164   : > { %v613_v6 = vmul.f32 %v610_v4, %v3668_v15  ;;  %v612_v32 = vmul.f32 %v610_v4, %v3678_v24 }
 0x165   : > { %v3698_v35 = vpop.permute.xlu2 %587 }
 0x166   : > { %v590_v42 = vmul.f32 %v3698_v35, %v3688_v29  ;;  %v592_v2 = vmul.f32 %v3698_v35, %v3646_v1  ;;  %v591_v27 = vmul.f32 %v3698_v35, %v3666_v14 }
 0x169   : > { %444 = vrot.lane.b32.xlu1 %v436_v36, %s3284_s23  ;;  %487 = vrot.lane.b32.xlu2 %v480_v37, %s3285_s24  ;;  %v614_v37 = vmul.f32 %v610_v4, %v3696_v34  ;;  %s3367_s23 = smov 47  }
 0x16b   : > { %551 = vrot.lane.b32.xlu0 %v545_v38, %s3286_s11 }
 0x16c   : > { %v655_v12 = vpop.permute.xlu0 %654 }
 0x16d   : > { %v658_v17 = vmul.f32 %v655_v12, %v3653_v7 }
 0x16e   : > { %v3709_v41 = vpop.permute.xlu2 %631 }
 0x16f   : > { %v634_v46 = vmul.f32 %v3709_v41, %v3640_v61  ;;  %v636_v11 = vmul.f32 %v3709_v41, %v3655_v8 }
 0x171   : > { %464 = vrot.lane.b32.xlu1 %v457_v39, %s3285_s24  ;;  %511 = vrot.lane.b32.xlu2 %v503_v40, %s3285_s24 }
 0x173   : > { %596 = vrot.lane.b32.xlu0 %v590_v42, %s3286_s11  ;;  %v635_v42 = vmul.f32 %v3709_v41, %v3642_v62 }
 0x175   : > { %v699_v19 = vpop.permute.xlu0 %698 }
 0x176   : > { %v702_v28 = vmul.f32 %v699_v19, %v3668_v15 }
 0x177   : > { %v3722_v47 = vpop.permute.xlu2 %676 }
 0x178   : > { %v679_v54 = vmul.f32 %v3722_v47, %v3688_v29  ;;  %v681_v25 = vmul.f32 %v3722_v47, %v3646_v1 }
 0x179   : > { %485 = vrot.lane.b32.xlu1 %v479_v44, %s3285_s24  ;;  %531 = vrot.lane.b32.xlu2 %v524_v45, %s3285_s24 }
 0x17b   : > { %640 = vrot.lane.b32.xlu0 %v634_v46, %s3288_s9  ;;  %v657_v46 = vmul.f32 %v655_v12, %v3664_v13 }
 0x17e   : > { %v744_v26 = vpop.permute.xlu0 %743 }
 0x17f   : > { %v747_v38 = vmul.f32 %v744_v26, %v3653_v7 }
 0x180   : > { %v3733_v56 = vpop.permute.xlu2 %720 }
 0x181   : > { %489 = vrot.lane.b32.xlu1 %v481_v51, %s3285_s24  ;;  %555 = vrot.lane.b32.xlu2 %v547_v52, %s3286_s11  ;;  %v723_v59 = vmul.f32 %v3733_v56, %v3640_v61  ;;  %v725_v33 = vmul.f32 %v3733_v56, %v3655_v8  ;;  %v659_v51 = vmul.f32 %v655_v12, %v3675_v22 }
 0x183   : > { %685 = vrot.lane.b32.xlu0 %v679_v54, %s3288_s9  ;;  %v680_v54 = vmul.f32 %v3722_v47, %v3666_v14 }
 0x189   : > { %509 = vrot.lane.b32.xlu1 %v502_v57, %s3285_s24  ;;  %576 = vrot.lane.b32.xlu2 %v569_v58, %s3286_s11  ;;  %v3742_v60 = vpop.permute.xlu2 %765  ;;  %v701_v58 = vmul.f32 %v699_v19, %v3678_v24 }
 0x18a   : > { %v768_v3 = vmul.f32 %v3742_v60, %v3688_v29  ;;  %v770_v43 = vmul.f32 %v3742_v60, %v3646_v1 }
 0x18b   : > { %729 = vrot.lane.b32.xlu0 %v723_v59, %s3289_s10 }
 0x191   : > { %529 = vrot.lane.b32.xlu1 %v523_v63, %s3285_s24  ;;  %600 = vrot.lane.b32.xlu2 %v592_v2, %s3286_s11  ;;  %v3290_v2 = vmov 24  }
 0x192   : > { %2949 = vset.pattern.permute.xlu2 %v3290_v2  ;;  %v3293_v2 = vmov 26  }
 0x193   : > { %774 = vrot.lane.b32.xlu0 %v768_v3, %s3289_s10  ;;  %v703_v3 = vmul.f32 %v699_v19, %v3696_v34  ;;  %v769_v19 = vmul.f32 %v3742_v60, %v3666_v14 }
 0x199   : > { %533 = vrot.lane.b32.xlu1 %v525_v5, %s3285_s24  ;;  %620 = vrot.lane.b32.xlu2 %v613_v6, %s3286_s11  ;;  %v724_v5 = vmul.f32 %v3733_v56, %v3642_v62  ;;  %s3372_s24 = smov 46  }
 0x19b   : > { %787 = vperm.xlu0 %2948, %v3602_v21   ;;  %v3767_v20 = vpop.permute.xlu2 %372 }
 0x1a1   : > { %553 = vrot.lane.b32.xlu1 %v546_v10, %s3286_s11  ;;  %644 = vrot.lane.b32.xlu2 %v636_v11, %s3288_s9  ;;  %v746_v10 = vmul.f32 %v744_v26, %v3664_v13 }
 0x1a3   : > { %v3777_v30 = vpop.permute.xlu2 %396 }
 0x1a9   : > { %574 = vrot.lane.b32.xlu1 %v568_v16, %s3286_s11  ;;  %665 = vrot.lane.b32.xlu2 %v658_v17, %s3288_s9  ;;  %v748_v17 = vmul.f32 %v744_v26, %v3675_v22 }
 0x1ab   : > { %v3788_v35 = vpop.permute.xlu2 %419 }
 0x1b1   : > { %578 = vrot.lane.b32.xlu1 %v570_v23, %s3286_s11  ;;  %689 = vrot.lane.b32.xlu2 %v681_v25, %s3288_s9 }
 0x1b3   : > { %v3796_v39 = vpop.permute.xlu2 %440 }
 0x1b6   : > { %v3781_v31 = vpop.permute.xlu0 %421 }
 0x1b7   : > { %5327 = vst [vmem:[#allocation36_spill] sm:$0xff] %v3781_v31 }
 0x1b9   : > { %598 = vrot.lane.b32.xlu1 %v591_v27, %s3286_s11  ;;  %709 = vrot.lane.b32.xlu2 %v702_v28, %s3288_s9 }
 0x1bb   : > { %v3808_v45 = vpop.permute.xlu2 %466 }
 0x1bc   : > { %5328 = vst [vmem:[#allocation37_spill] sm:$0xff] %v3808_v45 }
 0x1c1   : > { %618 = vrot.lane.b32.xlu1 %v612_v32, %s3286_s11  ;;  %733 = vrot.lane.b32.xlu2 %v725_v33, %s3289_s10 }
 0x1c3   : > { %v3815_v41 = vpop.permute.xlu2 %487 }
 0x1c5   : > { %v3790_v36 = vpop.permute.xlu0 %442 }
 0x1c9   : > { %622 = vrot.lane.b32.xlu1 %v614_v37, %s3286_s11  ;;  %754 = vrot.lane.b32.xlu2 %v747_v38, %s3289_s10  ;;  %v3291_v38 = vmov 25   ;;  %s3383_s11 = smov 45  }
 0x1ca   : > { %2950 = vset.pattern.permute.xlu0 %v3291_v38 }
 0x1cb   : > { %v3823_v55 = vpop.permute.xlu2 %511 }
 0x1cc   : > { %5329 = vst [vmem:[#allocation38_spill] sm:$0xff] %v3823_v55 }
 0x1cd   : > { %v3798_v40 = vpop.permute.xlu0 %462 }
 0x1d1   : > { %642 = vrot.lane.b32.xlu1 %v635_v42, %s3288_s9  ;;  %778 = vrot.lane.b32.xlu2 %v770_v43, %s3289_s10 }
 0x1d3   : > { %v3829_v59 = vpop.permute.xlu2 %531 }
 0x1d5   : > { %v3806_v44 = vpop.permute.xlu0 %507 }
 0x1d9   : > { %663 = vrot.lane.b32.xlu1 %v657_v46, %s3288_s9 }
 0x1db   : > { %v3837_v4 = vpop.permute.xlu2 %555 }
 0x1dc   : > { %5330 = vst [vmem:[#allocation39_spill] sm:$0xff] %v3837_v4 }
 0x1dd   : > { %v3812_v50 = vpop.permute.xlu0 %551 }
 0x1e1   : > { %667 = vrot.lane.b32.xlu1 %v659_v51, %s3288_s9 }
 0x1e3   : > { %v3845_v11 = vpop.permute.xlu2 %576 }
 0x1e5   : > { %v3818_v52 = vpop.permute.xlu0 %596 }
 0x1e9   : > { %687 = vrot.lane.b32.xlu1 %v680_v54, %s3288_s9 }
 0x1eb   : > { %v3852_v56 = vpop.permute.xlu2 %600 }
 0x1ec   : > { %5331 = vst [vmem:[#allocation40_spill] sm:$0xff] %v3852_v56 }
 0x1ed   : > { %v3825_v57 = vpop.permute.xlu0 %640 }
 0x1f1   : > { %707 = vrot.lane.b32.xlu1 %v701_v58, %s3288_s9 }
 0x1f3   : > { %v3858_v23 = vpop.permute.xlu2 %620 }
 0x1f5   : > { %v3831_v63 = vpop.permute.xlu0 %685 }
 0x1f9   : > { %711 = vrot.lane.b32.xlu1 %v703_v3, %s3288_s9  ;;  %s3384_s9 = smov 44  }
 0x1fb   : > { %v3862_v26 = vpop.permute.xlu2 %644 }
 0x1fc   : > { %5332 = vst [vmem:[#allocation41_spill] sm:$0xff] %v3862_v26 }
 0x1fd   : > { %v3835_v47 = vpop.permute.xlu0 %729 }
 0x201   : > { %731 = vrot.lane.b32.xlu1 %v724_v5, %s3289_s10 }
 0x203   : > { %v3866_v28 = vpop.permute.xlu2 %665 }
 0x205   : > { %v3842_v6 = vpop.permute.xlu0 %774 }
 0x209   : > { %752 = vrot.lane.b32.xlu1 %v746_v10, %s3289_s10 }
 0x20b   : > { %v3868_v32 = vpop.permute.xlu2 %689 }
 0x20c   : > { %5333 = vst [vmem:[#allocation42_spill] sm:$0xff] %v3868_v32 }
 0x20d   : > { %v788_v12 = vpop.permute.xlu0 %787 }
 0x20e   : > { %v791_v16 = vmul.f32 %v788_v12, %v3668_v15  ;;  %v790_v25 = vmul.f32 %v788_v12, %v3678_v24  ;;  %v792_v27 = vmul.f32 %v788_v12, %v3696_v34 }
 0x210   : > { %798 = vrot.lane.b32.xlu2 %v791_v16, %s3289_s10 }
 0x211   : > { %756 = vrot.lane.b32.xlu1 %v748_v17, %s3289_s10  ;;  %v3294_v17 = vmov 27  }
 0x213   : > { %v3870_v60 = vpop.permute.xlu2 %709 }
 0x218   : > { %809 = vperm.xlu2 %2949, %v3602_v21  }
 0x219   : > { %776 = vrot.lane.b32.xlu1 %v769_v19, %s3289_s10 }
 0x21b   : > { %v3872_v33 = vpop.permute.xlu2 %733 }
 0x21c   : > { %5334 = vst [vmem:[#allocation43_spill] sm:$0xff] %v3872_v33 }
 0x220   : > { %2951 = vset.pattern.permute.xlu2 %v3293_v2 }
 0x221   : > { %796 = vrot.lane.b32.xlu1 %v790_v25, %s3289_s10 }
 0x223   : > { %v3874_v37 = vpop.permute.xlu2 %754 }
 0x229   : > { %800 = vrot.lane.b32.xlu1 %v792_v27, %s3289_s10  ;;  %s2673_s10 = sshll.u32 %s3242_s18, 1 }
 0x22b   : > { %v3876_v42 = vpop.permute.xlu2 %778 }
 0x22c   : > { %5335 = vst [vmem:[#allocation44_spill] sm:$0xff] %v3876_v42 }
 0x26a   : > { %v3878_v43 = vpop.permute.xlu2 %798 }
 0x26b   : > { %5336 = vst [vmem:[#allocation45_spill] sm:$0xff] %v3878_v43 }
 0x272   : > { %v810_v46 = vpop.permute.xlu2 %809 }
 0x273   : > { %v814_v51 = vmul.f32 %v810_v46, %v3655_v8  ;;  %v812_v54 = vmul.f32 %v810_v46, %v3640_v61  ;;  %v813_v58 = vmul.f32 %v810_v46, %v3642_v62 }
 0x275   : > { %822 = vrot.lane.b32.xlu2 %v814_v51, %s3292_s26  ;;  %818 = vrot.lane.b32.xlu0 %v812_v54, %s3292_s26  ;;  %v3295_v54 = vmov 28  }
 0x276   : > { %820 = vrot.lane.b32.xlu1 %v813_v58, %s3292_s26 }
 0x27d   : > { %832 = vperm.xlu0 %2950, %v3602_v21  }
 0x285   : > { %2952 = vset.pattern.permute.xlu0 %v3294_v17 }
 0x2cf   : > { %v3896_v19 = vpop.permute.xlu2 %822 }
 0x2d0   : > { %5338 = vst [vmem:[#allocation47_spill] sm:$0xff] %v3896_v19 }
 0x2e7   : > { %v3887_v3 = vpop.permute.xlu0 %818 }
 0x2e8   : > { %5337 = vst [vmem:[#allocation46_spill] sm:$0xff] %v3887_v3 }
 0x2ef   : > { %v833_v5 = vpop.permute.xlu0 %832 }
 0x2f0   : > { %v836_v10 = vmul.f32 %v833_v5, %v3653_v7  ;;  %v835_v12 = vmul.f32 %v833_v5, %v3664_v13  ;;  %v837_v16 = vmul.f32 %v833_v5, %v3675_v22 }
 0x2f2   : > { %843 = vrot.lane.b32.xlu2 %v836_v10, %s3292_s26  ;;  %841 = vrot.lane.b32.xlu1 %v835_v12, %s3292_s26 }
 0x2fa   : > { %854 = vperm.xlu2 %2951, %v3602_v21   ;;  %845 = vrot.lane.b32.xlu1 %v837_v16, %s3292_s26  ;;  %v3296_v16 = vmov 29  }
 0x302   : > { %2953 = vset.pattern.permute.xlu2 %v3295_v54 }
 0x34c   : > { %v3898_v25 = vpop.permute.xlu2 %843 }
 0x34d   : > { %5339 = vst [vmem:[#allocation48_spill] sm:$0xff] %v3898_v25 }
 0x354   : > { %v855_v27 = vpop.permute.xlu2 %854 }
 0x355   : > { %v859_v38 = vmul.f32 %v855_v27, %v3646_v1  ;;  %v857_v46 = vmul.f32 %v855_v27, %v3688_v29  ;;  %v858_v51 = vmul.f32 %v855_v27, %v3666_v14 }
 0x357   : > { %867 = vrot.lane.b32.xlu2 %v859_v38, %s3292_s26  ;;  %863 = vrot.lane.b32.xlu0 %v857_v46, %s3292_s26 }
 0x358   : > { %865 = vrot.lane.b32.xlu1 %v858_v51, %s3292_s26 }
 0x35f   : > { %876 = vperm.xlu0 %2952, %v3602_v21  }
 0x367   : > { %2954 = vset.pattern.permute.xlu0 %v3296_v16 }
 0x3b1   : > { %v3916_v17 = vpop.permute.xlu2 %867 }
 0x3b2   : > { %5341 = vst [vmem:[#allocation50_spill] sm:$0xff] %v3916_v17 }
 0x3c9   : > { %v3907_v58 = vpop.permute.xlu0 %863 }
 0x3ca   : > { %5340 = vst [vmem:[#allocation49_spill] sm:$0xff] %v3907_v58 }
 0x3d1   : > { %v877_v2 = vpop.permute.xlu0 %876 }
 0x3d2   : > { %v880_v5 = vmul.f32 %v877_v2, %v3668_v15  ;;  %v879_v10 = vmul.f32 %v877_v2, %v3678_v24  ;;  %v881_v12 = vmul.f32 %v877_v2, %v3696_v34  ;;  %v3298_v2 = vmov 30  }
 0x3d4   : > { %887 = vrot.lane.b32.xlu2 %v880_v5, %s3292_s26  ;;  %885 = vrot.lane.b32.xlu1 %v879_v10, %s3292_s26 }
 0x3dc   : > { %898 = vperm.xlu2 %2953, %v3602_v21   ;;  %889 = vrot.lane.b32.xlu1 %v881_v12, %s3292_s26  ;;  %s2674_s26 = sshll.u32 %s3246_s19, 2 }
 0x3e4   : > { %2955 = vset.pattern.permute.xlu2 %v3298_v2 }
 0x42e   : > { %v3918_v27 = vpop.permute.xlu2 %887 }
 0x42f   : > { %5342 = vst [vmem:[#allocation51_spill] sm:$0xff] %v3918_v27 }
 0x436   : > { %v899_v38 = vpop.permute.xlu2 %898 }
 0x437   : > { %v903_v46 = vmul.f32 %v899_v38, %v3655_v8  ;;  %v901_v51 = vmul.f32 %v899_v38, %v3640_v61  ;;  %v902_v54 = vmul.f32 %v899_v38, %v3642_v62 }
 0x439   : > { %911 = vrot.lane.b32.xlu2 %v903_v46, %s3297_s7  ;;  %907 = vrot.lane.b32.xlu0 %v901_v51, %s3297_s7  ;;  %v3299_v46 = vmov 31  }
 0x43a   : > { %909 = vrot.lane.b32.xlu1 %v902_v54, %s3297_s7 }
 0x441   : > { %921 = vperm.xlu0 %2954, %v3602_v21  }
 0x449   : > { %2956 = vset.pattern.permute.xlu0 %v3299_v46 }
 0x493   : > { %v3936_v51 = vpop.permute.xlu2 %911 }
 0x494   : > { %5344 = vst [vmem:[#allocation53_spill] sm:$0xff] %v3936_v51 }
 0x4ab   : > { %v3927_v5 = vpop.permute.xlu0 %907 }
 0x4ac   : > { %5343 = vst [vmem:[#allocation52_spill] sm:$0xff] %v3927_v5 }
 0x4b3   : > { %v922_v10 = vpop.permute.xlu0 %921 }
 0x4b4   : > { %v925_v12 = vmul.f32 %v922_v10, %v3653_v7  ;;  %v924_v16 = vmul.f32 %v922_v10, %v3664_v13  ;;  %v926_v38 = vmul.f32 %v922_v10, %v3675_v22  ;;  %v3300_v10 = vmov 32  }
 0x4b6   : > { %932 = vrot.lane.b32.xlu2 %v925_v12, %s3297_s7  ;;  %930 = vrot.lane.b32.xlu1 %v924_v16, %s3297_s7 }
 0x4be   : > { %943 = vperm.xlu2 %2955, %v3602_v21   ;;  %934 = vrot.lane.b32.xlu1 %v926_v38, %s3297_s7 }
 0x4c6   : > { %2957 = vset.pattern.permute.xlu2 %v3300_v10 }
 0x510   : > { %v3938_v54 = vpop.permute.xlu2 %932 }
 0x511   : > { %5345 = vst [vmem:[#allocation54_spill] sm:$0xff] %v3938_v54 }
 0x518   : > { %v944_v2 = vpop.permute.xlu2 %943 }
 0x519   : > { %v948_v49 = vmul.f32 %v944_v2, %v3646_v1  ;;  %v946_v18 = vmul.f32 %v944_v2, %v3688_v29  ;;  %v947_v12 = vmul.f32 %v944_v2, %v3666_v14 }
 0x51b   : > { %956 = vrot.lane.b32.xlu2 %v948_v49, %s3297_s7  ;;  %952 = vrot.lane.b32.xlu0 %v946_v18, %s3297_s7  ;;  %v3301_v18 = vmov 33  }
 0x51c   : > { %954 = vrot.lane.b32.xlu1 %v947_v12, %s3297_s7 }
 0x523   : > { %965 = vperm.xlu0 %2956, %v3602_v21  }
 0x52b   : > { %2958 = vset.pattern.permute.xlu0 %v3301_v18 }
 0x575   : > { %v3956_v2 = vpop.permute.xlu2 %956 }
 0x576   : > { %5347 = vst [vmem:[#allocation56_spill] sm:$0xff] %v3956_v2 }
 0x58d   : > { %v3947_v16 = vpop.permute.xlu0 %952 }
 0x58e   : > { %5346 = vst [vmem:[#allocation55_spill] sm:$0xff] %v3947_v16 }
 0x595   : > { %v966_v38 = vpop.permute.xlu0 %965 }
 0x596   : > { %v969_v46 = vmul.f32 %v966_v38, %v3668_v15  ;;  %v968_v51 = vmul.f32 %v966_v38, %v3678_v24  ;;  %v970_v49 = vmul.f32 %v966_v38, %v3696_v34 }
 0x598   : > { %976 = vrot.lane.b32.xlu2 %v969_v46, %s3297_s7  ;;  %974 = vrot.lane.b32.xlu1 %v968_v51, %s3297_s7  ;;  %v3303_v51 = vmov 34  }
 0x5a0   : > { %987 = vperm.xlu2 %2957, %v3602_v21   ;;  %978 = vrot.lane.b32.xlu1 %v970_v49, %s3297_s7  ;;  %s2524_s7 = sadd.s32 %s2674_s26, %s2673_s10 }
 0x5a8   : > { %2959 = vset.pattern.permute.xlu2 %v3303_v51 }
 0x5f2   : > { %v3958_v12 = vpop.permute.xlu2 %976 }
 0x5f3   : > { %5348 = vst [vmem:[#allocation57_spill] sm:$0xff] %v3958_v12 }
 0x5fa   : > { %v988_v10 = vpop.permute.xlu2 %987 }
 0x5fb   : > { %v992_v17 = vmul.f32 %v988_v10, %v3655_v8  ;;  %v990_v19 = vmul.f32 %v988_v10, %v3640_v61  ;;  %v991_v46 = vmul.f32 %v988_v10, %v3642_v62 }
 0x5fd   : > { %1000 = vrot.lane.b32.xlu2 %v992_v17, %s3302_s4  ;;  %996 = vrot.lane.b32.xlu0 %v990_v19, %s3302_s4  ;;  %v3304_v19 = vmov 35  }
 0x5fe   : > { %998 = vrot.lane.b32.xlu1 %v991_v46, %s3302_s4 }
 0x605   : > { %1010 = vperm.xlu0 %2958, %v3602_v21  }
 0x60d   : > { %2960 = vset.pattern.permute.xlu0 %v3304_v19 }
 0x657   : > { %v3976_v10 = vpop.permute.xlu2 %1000 }
 0x658   : > { %5350 = vst [vmem:[#allocation59_spill] sm:$0xff] %v3976_v10 }
 0x66f   : > { %v3967_v38 = vpop.permute.xlu0 %996 }
 0x670   : > { %5349 = vst [vmem:[#allocation58_spill] sm:$0xff] %v3967_v38 }
 0x677   : > { %v1011_v49 = vpop.permute.xlu0 %1010 }
 0x678   : > { %v1014_v18 = vmul.f32 %v1011_v49, %v3653_v7  ;;  %v1013_v2 = vmul.f32 %v1011_v49, %v3664_v13  ;;  %v1015_v17 = vmul.f32 %v1011_v49, %v3675_v22 }
 0x67a   : > { %1021 = vrot.lane.b32.xlu2 %v1014_v18, %s3302_s4  ;;  %1019 = vrot.lane.b32.xlu1 %v1013_v2, %s3302_s4  ;;  %v3305_v2 = vmov 36  }
 0x682   : > { %1032 = vperm.xlu2 %2959, %v3602_v21   ;;  %1023 = vrot.lane.b32.xlu1 %v1015_v17, %s3302_s4 }
 0x68a   : > { %2961 = vset.pattern.permute.xlu2 %v3305_v2 }
 0x6d4   : > { %v3978_v46 = vpop.permute.xlu2 %1021 }
 0x6d5   : > { %5351 = vst [vmem:[#allocation60_spill] sm:$0xff] %v3978_v46 }
 0x6dc   : > { %v1033_v51 = vpop.permute.xlu2 %1032 }
 0x6dd   : > { %v1037_v42 = vmul.f32 %v1033_v51, %v3646_v1  ;;  %v1035_v33 = vmul.f32 %v1033_v51, %v3688_v29  ;;  %v1036_v18 = vmul.f32 %v1033_v51, %v3666_v14 }
 0x6df   : > { %1045 = vrot.lane.b32.xlu2 %v1037_v42, %s3302_s4  ;;  %1041 = vrot.lane.b32.xlu0 %v1035_v33, %s3302_s4  ;;  %v3306_v33 = vmov 37  }
 0x6e0   : > { %1043 = vrot.lane.b32.xlu1 %v1036_v18, %s3302_s4 }
 0x6e7   : > { %1054 = vperm.xlu0 %2960, %v3602_v21  }
 0x6ef   : > { %2962 = vset.pattern.permute.xlu0 %v3306_v33  ;;  %v4009_v33 = vpop.permute.xlu1 %370 }
 0x739   : > { %v3996_v51 = vpop.permute.xlu2 %1045 }
 0x73a   : > { %5353 = vst [vmem:[#allocation62_spill] sm:$0xff] %v3996_v51 }
 0x751   : > { %v3987_v49 = vpop.permute.xlu0 %1041 }
 0x752   : > { %5352 = vst [vmem:[#allocation61_spill] sm:$0xff] %v3987_v49 }
 0x759   : > { %v1055_v17 = vpop.permute.xlu0 %1054 }
 0x75a   : > { %v1057_v19 = vmul.f32 %v1055_v17, %v3678_v24  ;;  %v1058_v10 = vmul.f32 %v1055_v17, %v3668_v15  ;;  %v1059_v42 = vmul.f32 %v1055_v17, %v3696_v34  ;;  %v3308_v17 = vmov 38  }
 0x75c   : > { %1065 = vrot.lane.b32.xlu2 %v1058_v10, %s3302_s4  ;;  %1063 = vrot.lane.b32.xlu1 %v1057_v19, %s3302_s4 }
 0x764   : > { %1076 = vperm.xlu2 %2961, %v3602_v21   ;;  %1067 = vrot.lane.b32.xlu1 %v1059_v42, %s3302_s4  ;;  %s2671_s4 = sshll.u32 %s3569_s2, 4 }
 0x765   : > { %s269_s18 = scalar_lea.vmem [#allocation8], %s2671_s4 }
 0x766   : > { %s2528_s19 = sshll.u32 %s269_s18, 4  ;;  %s2529_s19 = int_to_ptr.vmem [resolvable:$true] %s2528_s19 }
 0x76c   : > { %2963 = vset.pattern.permute.xlu2 %v3308_v17 }
 0x7b6   : > { %v3998_v18 = vpop.permute.xlu2 %1065 }
 0x7b7   : > { %5354 = vst [vmem:[#allocation63_spill] sm:$0xff] %v3998_v18 }
 0x7be   : > { %v1077_v2 = vpop.permute.xlu2 %1076 }
 0x7bf   : > { %v1080_v32 = vmul.f32 %v1077_v2, %v3642_v62  ;;  %v1081_v26 = vmul.f32 %v1077_v2, %v3655_v8  ;;  %v1079_v10 = vmul.f32 %v1077_v2, %v3640_v61 }
 0x7c1   : > { %1089 = vrot.lane.b32.xlu2 %v1081_v26, %s3307_s5  ;;  %1085 = vrot.lane.b32.xlu0 %v1079_v10, %s3307_s5  ;;  %v3309_v10 = vmov 39  }
 0x7c2   : > { %1087 = vrot.lane.b32.xlu1 %v1080_v32, %s3307_s5  ;;  %v4016_v32 = vpop.permute.xlu1 %374 }
 0x7c3   : > { %5356 = vst [vmem:[#allocation65_spill] sm:$0xff] %v4016_v32 }
 0x7c9   : > { %1099 = vperm.xlu0 %2962, %v3602_v21  }
 0x7d1   : > { %2964 = vset.pattern.permute.xlu0 %v3309_v10 }
 0x81b   : > { %v4020_v17 = vpop.permute.xlu2 %1089 }
 0x81c   : > { %5357 = vst [vmem:[#allocation66_spill] sm:$0xff] %v4020_v17 }
 0x833   : > { %v4007_v19 = vpop.permute.xlu0 %1085 }
 0x834   : > { %5355 = vst [vmem:[#allocation64_spill] sm:$0xff] %v4007_v19 }
 0x83b   : > { %v1100_v42 = vpop.permute.xlu0 %1099 }
 0x83c   : > { %v1102_v51 = vmul.f32 %v1100_v42, %v3664_v13  ;;  %v1103_v2 = vmul.f32 %v1100_v42, %v3653_v7  ;;  %v1104_v26 = vmul.f32 %v1100_v42, %v3675_v22  ;;  %v4029_v42 = vpop.permute.xlu1 %394 }
 0x83e   : > { %1110 = vrot.lane.b32.xlu2 %v1103_v2, %s3307_s5  ;;  %1108 = vrot.lane.b32.xlu1 %v1102_v51, %s3307_s5 }
 0x844   : > { %v4035_v45 = vpop.permute.xlu1 %398 }
 0x845   : > { %5360 = vst [vmem:[#allocation69_spill] sm:$0xff] %v4035_v45 }
 0x846   : > { %1121 = vperm.xlu2 %2963, %v3602_v21   ;;  %1112 = vrot.lane.b32.xlu1 %v1104_v26, %s3307_s5  ;;  %v3310_v26 = vmov 40  }
 0x84e   : > { %2965 = vset.pattern.permute.xlu2 %v3310_v26 }
 0x898   : > { %v4022_v56 = vpop.permute.xlu2 %1110 }
 0x899   : > { %5358 = vst [vmem:[#allocation67_spill] sm:$0xff] %v4022_v56 }
 0x8a0   : > { %v1122_v4 = vpop.permute.xlu2 %1121 }
 0x8a1   : > { %v1125_v55 = vmul.f32 %v1122_v4, %v3666_v14  ;;  %v1126_v2 = vmul.f32 %v1122_v4, %v3646_v1  ;;  %v1124_v51 = vmul.f32 %v1122_v4, %v3688_v29 }
 0x8a3   : > { %1134 = vrot.lane.b32.xlu2 %v1126_v2, %s3307_s5  ;;  %1130 = vrot.lane.b32.xlu0 %v1124_v51, %s3307_s5  ;;  %v3311_v51 = vmov 41  }
 0x8a4   : > { %1132 = vrot.lane.b32.xlu1 %v1125_v55, %s3307_s5  ;;  %v4042_v55 = vpop.permute.xlu1 %417 }
 0x8ab   : > { %1143 = vperm.xlu0 %2964, %v3602_v21  }
 0x8b3   : > { %2966 = vset.pattern.permute.xlu0 %v3311_v51 }
 0x8fd   : > { %v4046_v26 = vpop.permute.xlu2 %1134 }
 0x8fe   : > { %5361 = vst [vmem:[#allocation70_spill] sm:$0xff] %v4046_v26 }
 0x915   : > { %v4033_v10 = vpop.permute.xlu0 %1130 }
 0x916   : > { %5359 = vst [vmem:[#allocation68_spill] sm:$0xff] %v4033_v10 }
 0x91d   : > { %v1144_v17 = vpop.permute.xlu0 %1143 }
 0x91e   : > { %v1146_v31 = vmul.f32 %v1144_v17, %v3678_v24  ;;  %v1147_v4 = vmul.f32 %v1144_v17, %v3668_v15  ;;  %v1148_v2 = vmul.f32 %v1144_v17, %v3696_v34  ;;  %v4055_v17 = vpop.permute.xlu1 %444 }
 0x91f   : > { %5363 = vst [vmem:[#allocation72_spill] sm:$0xff] %v4055_v17 }
 0x920   : > { %1154 = vrot.lane.b32.xlu2 %v1147_v4, %s3307_s5  ;;  %1152 = vrot.lane.b32.xlu1 %v1146_v31, %s3307_s5 }
 0x928   : > { %1165 = vperm.xlu2 %2965, %v3602_v21   ;;  %1156 = vrot.lane.b32.xlu1 %v1148_v2, %s3307_s5  ;;  %v3313_v2 = vmov 42   ;;  %s2675_s5 = sshll.u32 %s2524_s7, 3 }
 0x930   : > { %2967 = vset.pattern.permute.xlu2 %v3313_v2 }
 0x97a   : > { %v4048_v45 = vpop.permute.xlu2 %1154 }
 0x97b   : > { %5362 = vst [vmem:[#allocation71_spill] sm:$0xff] %v4048_v45  ;;  %v4061_v45 = vpop.permute.xlu1 %464 }
 0x982   : > { %v1166_v32 = vpop.permute.xlu2 %1165 }
 0x983   : > { %v1169_v10 = vmul.f32 %v1166_v32, %v3642_v62  ;;  %v1170_v4 = vmul.f32 %v1166_v32, %v3655_v8  ;;  %v1168_v31 = vmul.f32 %v1166_v32, %v3640_v61 }
 0x985   : > { %1178 = vrot.lane.b32.xlu2 %v1170_v4, %s3312_s29  ;;  %1174 = vrot.lane.b32.xlu0 %v1168_v31, %s3312_s29  ;;  %v3314_v31 = vmov 43  }
 0x986   : > { %1176 = vrot.lane.b32.xlu1 %v1169_v10, %s3312_s29  ;;  %v4068_v10 = vpop.permute.xlu1 %485 }
 0x98d   : > { %1188 = vperm.xlu0 %2966, %v3602_v21  }
 0x995   : > { %2968 = vset.pattern.permute.xlu0 %v3314_v31 }
 0x9df   : > { %v4072_v2 = vpop.permute.xlu2 %1178 }
 0x9e0   : > { %5365 = vst [vmem:[#allocation74_spill] sm:$0xff] %v4072_v2 }
 0x9f7   : > { %v4059_v51 = vpop.permute.xlu0 %1174 }
 0x9f8   : > { %5364 = vst [vmem:[#allocation73_spill] sm:$0xff] %v4059_v51 }
 0x9ff   : > { %v1189_v26 = vpop.permute.xlu0 %1188 }
 0xa00   : > { %v1191_v32 = vmul.f32 %v1189_v26, %v3664_v13  ;;  %v1192_v56 = vmul.f32 %v1189_v26, %v3653_v7  ;;  %v1193_v4 = vmul.f32 %v1189_v26, %v3675_v22  ;;  %v4081_v26 = vpop.permute.xlu1 %489 }
 0xa01   : > { %5367 = vst [vmem:[#allocation76_spill] sm:$0xff] %v4081_v26 }
 0xa02   : > { %1199 = vrot.lane.b32.xlu2 %v1192_v56, %s3312_s29  ;;  %1197 = vrot.lane.b32.xlu1 %v1191_v32, %s3312_s29 }
 0xa0a   : > { %1210 = vperm.xlu2 %2967, %v3602_v21   ;;  %1201 = vrot.lane.b32.xlu1 %v1193_v4, %s3312_s29  ;;  %v3315_v4 = vmov 44  }
 0xa12   : > { %2969 = vset.pattern.permute.xlu2 %v3315_v4 }
 0xa5c   : > { %v4074_v17 = vpop.permute.xlu2 %1199 }
 0xa5d   : > { %5366 = vst [vmem:[#allocation75_spill] sm:$0xff] %v4074_v17  ;;  %v4087_v17 = vpop.permute.xlu1 %509 }
 0xa64   : > { %v1211_v51 = vpop.permute.xlu2 %1210 }
 0xa65   : > { %v1214_v19 = vmul.f32 %v1211_v51, %v3666_v14  ;;  %v1215_v56 = vmul.f32 %v1211_v51, %v3646_v1  ;;  %v1213_v32 = vmul.f32 %v1211_v51, %v3688_v29 }
 0xa67   : > { %1223 = vrot.lane.b32.xlu2 %v1215_v56, %s3312_s29  ;;  %1219 = vrot.lane.b32.xlu0 %v1213_v32, %s3312_s29  ;;  %v3316_v32 = vmov 45  }
 0xa68   : > { %1221 = vrot.lane.b32.xlu1 %v1214_v19, %s3312_s29  ;;  %v4094_v19 = vpop.permute.xlu1 %529 }
 0xa6f   : > { %1232 = vperm.xlu0 %2968, %v3602_v21  }
 0xa77   : > { %2970 = vset.pattern.permute.xlu0 %v3316_v32 }
 0xac1   : > { %v4098_v4 = vpop.permute.xlu2 %1223 }
 0xac2   : > { %5369 = vst [vmem:[#allocation78_spill] sm:$0xff] %v4098_v4 }
 0xad9   : > { %v4085_v31 = vpop.permute.xlu0 %1219 }
 0xada   : > { %5368 = vst [vmem:[#allocation77_spill] sm:$0xff] %v4085_v31 }
 0xae1   : > { %v1233_v2 = vpop.permute.xlu0 %1232 }
 0xae2   : > { %v1235_v18 = vmul.f32 %v1233_v2, %v3678_v24  ;;  %v1236_v51 = vmul.f32 %v1233_v2, %v3668_v15  ;;  %v1237_v56 = vmul.f32 %v1233_v2, %v3696_v34  ;;  %v4107_v2 = vpop.permute.xlu1 %533 }
 0xae3   : > { %5371 = vst [vmem:[#allocation80_spill] sm:$0xff] %v4107_v2 }
 0xae4   : > { %1243 = vrot.lane.b32.xlu2 %v1236_v51, %s3312_s29  ;;  %1241 = vrot.lane.b32.xlu1 %v1235_v18, %s3312_s29 }
 0xaec   : > { %1254 = vperm.xlu2 %2969, %v3602_v21   ;;  %1245 = vrot.lane.b32.xlu1 %v1237_v56, %s3312_s29  ;;  %v3318_v56 = vmov 46  }
 0xaf4   : > { %2971 = vset.pattern.permute.xlu2 %v3318_v56 }
 0xb3e   : > { %v4100_v26 = vpop.permute.xlu2 %1243 }
 0xb3f   : > { %5370 = vst [vmem:[#allocation79_spill] sm:$0xff] %v4100_v26  ;;  %v4113_v26 = vpop.permute.xlu1 %553 }
 0xb46   : > { %v1255_v31 = vpop.permute.xlu2 %1254 }
 0xb47   : > { %v1258_v49 = vmul.f32 %v1255_v31, %v3642_v62  ;;  %v1259_v51 = vmul.f32 %v1255_v31, %v3655_v8  ;;  %v1257_v18 = vmul.f32 %v1255_v31, %v3640_v61 }
 0xb49   : > { %1267 = vrot.lane.b32.xlu2 %v1259_v51, %s3317_s17  ;;  %1263 = vrot.lane.b32.xlu0 %v1257_v18, %s3317_s17  ;;  %v3319_v18 = vmov 47  }
 0xb4a   : > { %1265 = vrot.lane.b32.xlu1 %v1258_v49, %s3317_s17  ;;  %v4120_v49 = vpop.permute.xlu1 %574 }
 0xb51   : > { %1277 = vperm.xlu0 %2970, %v3602_v21  }
 0xb59   : > { %2972 = vset.pattern.permute.xlu0 %v3319_v18 }
 0xba3   : > { %v4124_v56 = vpop.permute.xlu2 %1267 }
 0xba4   : > { %5373 = vst [vmem:[#allocation82_spill] sm:$0xff] %v4124_v56 }
 0xbbb   : > { %v4111_v32 = vpop.permute.xlu0 %1263 }
 0xbbc   : > { %5372 = vst [vmem:[#allocation81_spill] sm:$0xff] %v4111_v32 }
 0xbc3   : > { %v1278_v4 = vpop.permute.xlu0 %1277 }
 0xbc4   : > { %v1280_v31 = vmul.f32 %v1278_v4, %v3664_v13  ;;  %v1281_v46 = vmul.f32 %v1278_v4, %v3653_v7  ;;  %v1282_v51 = vmul.f32 %v1278_v4, %v3675_v22  ;;  %v4133_v4 = vpop.permute.xlu1 %578 }
 0xbc5   : > { %5375 = vst [vmem:[#allocation84_spill] sm:$0xff] %v4133_v4 }
 0xbc6   : > { %1288 = vrot.lane.b32.xlu2 %v1281_v46, %s3317_s17  ;;  %1286 = vrot.lane.b32.xlu1 %v1280_v31, %s3317_s17 }
 0xbce   : > { %1299 = vperm.xlu2 %2971, %v3602_v21   ;;  %1290 = vrot.lane.b32.xlu1 %v1282_v51, %s3317_s17  ;;  %v3320_v51 = vmov 48  }
 0xbd6   : > { %2973 = vset.pattern.permute.xlu2 %v3320_v51 }
 0xc20   : > { %v4126_v2 = vpop.permute.xlu2 %1288 }
 0xc21   : > { %5374 = vst [vmem:[#allocation83_spill] sm:$0xff] %v4126_v2  ;;  %v4139_v2 = vpop.permute.xlu1 %598 }
 0xc28   : > { %v1300_v32 = vpop.permute.xlu2 %1299 }
 0xc29   : > { %v1303_v38 = vmul.f32 %v1300_v32, %v3666_v14  ;;  %v1304_v46 = vmul.f32 %v1300_v32, %v3646_v1  ;;  %v1302_v31 = vmul.f32 %v1300_v32, %v3688_v29 }
 0xc2b   : > { %1312 = vrot.lane.b32.xlu2 %v1304_v46, %s3317_s17  ;;  %1308 = vrot.lane.b32.xlu0 %v1302_v31, %s3317_s17  ;;  %v3321_v31 = vmov 49  }
 0xc2c   : > { %1310 = vrot.lane.b32.xlu1 %v1303_v38, %s3317_s17  ;;  %v4146_v38 = vpop.permute.xlu1 %618 }
 0xc33   : > { %1321 = vperm.xlu0 %2972, %v3602_v21  }
 0xc3b   : > { %2974 = vset.pattern.permute.xlu0 %v3321_v31 }
 0xc85   : > { %v4150_v51 = vpop.permute.xlu2 %1312 }
 0xc86   : > { %5377 = vst [vmem:[#allocation86_spill] sm:$0xff] %v4150_v51 }
 0xc9d   : > { %v4137_v18 = vpop.permute.xlu0 %1308 }
 0xc9e   : > { %5376 = vst [vmem:[#allocation85_spill] sm:$0xff] %v4137_v18 }
 0xca5   : > { %v1322_v56 = vpop.permute.xlu0 %1321 }
 0xca6   : > { %v1324_v12 = vmul.f32 %v1322_v56, %v3678_v24  ;;  %v1325_v32 = vmul.f32 %v1322_v56, %v3668_v15  ;;  %v1326_v46 = vmul.f32 %v1322_v56, %v3696_v34  ;;  %v4159_v56 = vpop.permute.xlu1 %622 }
 0xca7   : > { %5379 = vst [vmem:[#allocation88_spill] sm:$0xff] %v4159_v56 }
 0xca8   : > { %1332 = vrot.lane.b32.xlu2 %v1325_v32, %s3317_s17  ;;  %1330 = vrot.lane.b32.xlu1 %v1324_v12, %s3317_s17 }
 0xcb0   : > { %1343 = vperm.xlu2 %2973, %v3602_v21   ;;  %1334 = vrot.lane.b32.xlu1 %v1326_v46, %s3317_s17  ;;  %v3323_v46 = vmov 50  }
 0xcb8   : > { %2975 = vset.pattern.permute.xlu2 %v3323_v46 }
 0xd02   : > { %v4152_v4 = vpop.permute.xlu2 %1332 }
 0xd03   : > { %5378 = vst [vmem:[#allocation87_spill] sm:$0xff] %v4152_v4  ;;  %v4165_v4 = vpop.permute.xlu1 %642 }
 0xd0a   : > { %v1344_v18 = vpop.permute.xlu2 %1343 }
 0xd0b   : > { %v1347_v16 = vmul.f32 %v1344_v18, %v3642_v62  ;;  %v1348_v32 = vmul.f32 %v1344_v18, %v3655_v8  ;;  %v1346_v12 = vmul.f32 %v1344_v18, %v3640_v61 }
 0xd0d   : > { %1356 = vrot.lane.b32.xlu2 %v1348_v32, %s3322_s6  ;;  %1352 = vrot.lane.b32.xlu0 %v1346_v12, %s3322_s6  ;;  %v3324_v12 = vmov 51  }
 0xd0e   : > { %1354 = vrot.lane.b32.xlu1 %v1347_v16, %s3322_s6  ;;  %v4172_v16 = vpop.permute.xlu1 %663 }
 0xd15   : > { %1366 = vperm.xlu0 %2974, %v3602_v21  }
 0xd1d   : > { %2976 = vset.pattern.permute.xlu0 %v3324_v12 }
 0xd67   : > { %v4176_v46 = vpop.permute.xlu2 %1356 }
 0xd68   : > { %5381 = vst [vmem:[#allocation90_spill] sm:$0xff] %v4176_v46 }
 0xd7f   : > { %v4163_v31 = vpop.permute.xlu0 %1352 }
 0xd80   : > { %5380 = vst [vmem:[#allocation89_spill] sm:$0xff] %v4163_v31 }
 0xd87   : > { %v1367_v51 = vpop.permute.xlu0 %1366 }
 0xd88   : > { %v1369_v18 = vmul.f32 %v1367_v51, %v3664_v13  ;;  %v1370_v54 = vmul.f32 %v1367_v51, %v3653_v7  ;;  %v1371_v32 = vmul.f32 %v1367_v51, %v3675_v22  ;;  %v4185_v51 = vpop.permute.xlu1 %667 }
 0xd89   : > { %5383 = vst [vmem:[#allocation92_spill] sm:$0xff] %v4185_v51 }
 0xd8a   : > { %1377 = vrot.lane.b32.xlu2 %v1370_v54, %s3322_s6  ;;  %1375 = vrot.lane.b32.xlu1 %v1369_v18, %s3322_s6 }
 0xd92   : > { %1388 = vperm.xlu2 %2975, %v3602_v21   ;;  %1379 = vrot.lane.b32.xlu1 %v1371_v32, %s3322_s6  ;;  %v3325_v32 = vmov 52  }
 0xd9a   : > { %2977 = vset.pattern.permute.xlu2 %v3325_v32 }
 0xde4   : > { %v4178_v56 = vpop.permute.xlu2 %1377 }
 0xde5   : > { %5382 = vst [vmem:[#allocation91_spill] sm:$0xff] %v4178_v56  ;;  %v4191_v56 = vpop.permute.xlu1 %687 }
 0xdec   : > { %v1389_v31 = vpop.permute.xlu2 %1388 }
 0xded   : > { %v1392_v5 = vmul.f32 %v1389_v31, %v3666_v14  ;;  %v1393_v54 = vmul.f32 %v1389_v31, %v3646_v1  ;;  %v1391_v18 = vmul.f32 %v1389_v31, %v3688_v29 }
 0xdef   : > { %1401 = vrot.lane.b32.xlu2 %v1393_v54, %s3322_s6  ;;  %1397 = vrot.lane.b32.xlu0 %v1391_v18, %s3322_s6  ;;  %v3326_v18 = vmov 53  }
 0xdf0   : > { %1399 = vrot.lane.b32.xlu1 %v1392_v5, %s3322_s6  ;;  %v4198_v5 = vpop.permute.xlu1 %707 }
 0xdf7   : > { %1410 = vperm.xlu0 %2976, %v3602_v21  }
 0xdff   : > { %2978 = vset.pattern.permute.xlu0 %v3326_v18  ;;  %v3328_v18 = vmov 54  }
 0xe49   : > { %v4202_v32 = vpop.permute.xlu2 %1401 }
 0xe4a   : > { %5385 = vst [vmem:[#allocation94_spill] sm:$0xff] %v4202_v32 }
 0xe61   : > { %v4189_v12 = vpop.permute.xlu0 %1397 }
 0xe62   : > { %5384 = vst [vmem:[#allocation93_spill] sm:$0xff] %v4189_v12 }
 0xe69   : > { %v1411_v46 = vpop.permute.xlu0 %1410 }
 0xe6a   : > { %v1413_v27 = vmul.f32 %v1411_v46, %v3678_v24  ;;  %v1414_v31 = vmul.f32 %v1411_v46, %v3668_v15  ;;  %v1415_v54 = vmul.f32 %v1411_v46, %v3696_v34  ;;  %v4211_v46 = vpop.permute.xlu1 %711 }
 0xe6b   : > { %5387 = vst [vmem:[#allocation96_spill] sm:$0xff] %v4211_v46 }
 0xe6c   : > { %1421 = vrot.lane.b32.xlu2 %v1414_v31, %s3322_s6  ;;  %1419 = vrot.lane.b32.xlu1 %v1413_v27, %s3322_s6 }
 0xe74   : > { %1432 = vperm.xlu2 %2977, %v3602_v21   ;;  %1423 = vrot.lane.b32.xlu1 %v1415_v54, %s3322_s6  ;;  %v4215_v54 = vpop.permute.xlu1 %731  ;;  %s5614_s6 = sld [smem:[#allocation140_spill]] }
 0xe7c   : > { %2979 = vset.pattern.permute.xlu2 %v3328_v18  ;;  %v4217_v32 = vpop.permute.xlu1 %752 }
 0xec6   : > { %v4204_v51 = vpop.permute.xlu2 %1421 }
 0xec7   : > { %5386 = vst [vmem:[#allocation95_spill] sm:$0xff] %v4204_v51  ;;  %v4219_v51 = vpop.permute.xlu1 %756 }
 0xec8   : > { %5388 = vst [vmem:[#allocation97_spill] sm:$0xff] %v4219_v51 }
 0xece   : > { %v1433_v12 = vpop.permute.xlu2 %1432 }
 0xecf   : > { %v1435_v58 = vmul.f32 %v1433_v12, %v3640_v61  ;;  %v1436_v31 = vmul.f32 %v1433_v12, %v3642_v62  ;;  %v1437_v27 = vmul.f32 %v1433_v12, %v3655_v8 }
 0xed1   : > { %1445 = vrot.lane.b32.xlu2 %v1437_v27, %s3327_s3  ;;  %1441 = vrot.lane.b32.xlu0 %v1435_v58, %s3327_s3  ;;  %v4223_v27 = vpop.permute.xlu1 %776 }
 0xed2   : > { %1443 = vrot.lane.b32.xlu1 %v1436_v31, %s3327_s3 }
 0xed9   : > { %1455 = vperm.xlu0 %2978, %v3602_v21   ;;  %v4230_v18 = vpop.permute.xlu1 %796 }
 0xeda   : > { %5390 = vst [vmem:[#allocation99_spill] sm:$0xff] %v4230_v18 }
 0xee1   : > { %v4234_v51 = vpop.permute.xlu1 %800 }
 0xee2   : > { %5391 = vst [vmem:[#allocation100_spill] sm:$0xff] %v4234_v51 }
 0xf2b   : > { %v4250_v18 = vpop.permute.xlu2 %1445 }
 0xf2c   : > { %5398 = vst [vmem:[#allocation107_spill] sm:$0xff] %v4250_v18 }
 0xf43   : > { %v4221_v12 = vpop.permute.xlu0 %1441 }
 0xf44   : > { %5389 = vst [vmem:[#allocation98_spill] sm:$0xff] %v4221_v12  ;;  %v4236_v12 = vpop.permute.xlu1 %820 }
 0xf45   : > { %5392 = vst [vmem:[#allocation101_spill] sm:$0xff] %v4236_v12 }
 0xf4b   : > { %v1456_v25 = vpop.permute.xlu0 %1455 }
 0xf4c   : > { %v1458_v58 = vmul.f32 %v1456_v25, %v3664_v13  ;;  %v1459_v46 = vmul.f32 %v1456_v25, %v3653_v7  ;;  %v1460_v31 = vmul.f32 %v1456_v25, %v3675_v22  ;;  %v4238_v3 = vpop.permute.xlu1 %841  ;;  %v3329_v25 = vmov 55  }
 0xf4d   : > { %5393 = vst [vmem:[#allocation102_spill] sm:$0xff] %v4238_v3  ;;  %2980 = vset.pattern.permute.xlu0 %v3329_v25 }
 0xf4e   : > { %1466 = vrot.lane.b32.xlu2 %v1459_v46, %s3327_s3  ;;  %1464 = vrot.lane.b32.xlu1 %v1458_v58, %s3327_s3 }
 0xf54   : > { %v4240_v43 = vpop.permute.xlu1 %845 }
 0xf55   : > { %5394 = vst [vmem:[#allocation103_spill] sm:$0xff] %v4240_v43 }
 0xf56   : > { %1477 = vperm.xlu2 %2979, %v3602_v21   ;;  %1468 = vrot.lane.b32.xlu1 %v1460_v31, %s3327_s3 }
 0xf5c   : > { %v4242_v7 = vpop.permute.xlu1 %865 }
 0xf5d   : > { %5395 = vst [vmem:[#allocation104_spill] sm:$0xff] %v4242_v7 }
 0xf64   : > { %v4244_v46 = vpop.permute.xlu1 %885 }
 0xf65   : > { %5396 = vst [vmem:[#allocation105_spill] sm:$0xff] %v4244_v46 }
 0xf6c   : > { %v4246_v58 = vpop.permute.xlu1 %889 }
 0xf6d   : > { %5397 = vst [vmem:[#allocation106_spill] sm:$0xff] %v4246_v58 }
 0xf74   : > { %v4248_v22 = vpop.permute.xlu1 %909 }
 0xf7c   : > { %v4252_v31 = vpop.permute.xlu1 %930 }
 0xf84   : > { %v4256_v12 = vpop.permute.xlu1 %934 }
 0xf85   : > { %5400 = vst [vmem:[#allocation109_spill] sm:$0xff] %v4256_v12 }
 0xf8c   : > { %v4264_v25 = vpop.permute.xlu1 %954 }
 0xf8d   : > { %5401 = vst [vmem:[#allocation110_spill] sm:$0xff] %v4264_v25  ;;  %v3330_v25 = vmov 56  }
 0xf8e   : > { %2981 = vset.pattern.permute.xlu2 %v3330_v25 }
 0xf94   : > { %v4267_v18 = vpop.permute.xlu1 %974 }
 0xf95   : > { %5402 = vst [vmem:[#allocation111_spill] sm:$0xff] %v4267_v18 }
 0xf9c   : > { %v4269_v12 = vpop.permute.xlu1 %978 }
 0xf9d   : > { %5403 = vst [vmem:[#allocation112_spill] sm:$0xff] %v4269_v12 }
 0xfa4   : > { %v4271_v58 = vpop.permute.xlu1 %998 }
 0xfa5   : > { %5404 = vst [vmem:[#allocation113_spill] sm:$0xff] %v4271_v58 }
 0xfa8   : > { %v4254_v51 = vpop.permute.xlu2 %1466 }
 0xfa9   : > { %5399 = vst [vmem:[#allocation108_spill] sm:$0xff] %v4254_v51 }
 0xfac   : > { %v4273_v51 = vpop.permute.xlu1 %1019 }
 0xfad   : > { %5405 = vst [vmem:[#allocation114_spill] sm:$0xff] %v4273_v51 }
 0xfb0   : > { %v1478_v3 = vpop.permute.xlu2 %1477 }
 0xfb1   : > { %v1480_v43 = vmul.f32 %v1478_v3, %v3688_v29  ;;  %v1481_v7 = vmul.f32 %v1478_v3, %v3666_v14  ;;  %v1482_v46 = vmul.f32 %v1478_v3, %v3646_v1 }
 0xfb3   : > { %1490 = vrot.lane.b32.xlu2 %v1482_v46, %s3327_s3  ;;  %1486 = vrot.lane.b32.xlu0 %v1480_v43, %s3327_s3 }
 0xfb4   : > { %1488 = vrot.lane.b32.xlu1 %v1481_v7, %s3327_s3  ;;  %v4275_v14 = vpop.permute.xlu1 %1023 }
 0xfb5   : > { %5406 = vst [vmem:[#allocation115_spill] sm:$0xff] %v4275_v14 }
 0xfbb   : > { %1499 = vperm.xlu0 %2980, %v3602_v21  }
 0xfbc   : > { %v4277_v3 = vpop.permute.xlu1 %1043 }
 0xfbd   : > { %5407 = vst [vmem:[#allocation116_spill] sm:$0xff] %v4277_v3 }
 0xfc4   : > { %v4279_v46 = vpop.permute.xlu1 %1063 }
 0xfc5   : > { %5408 = vst [vmem:[#allocation117_spill] sm:$0xff] %v4279_v46 }
 0xfcc   : > { %v4281_v43 = vpop.permute.xlu1 %1067 }
 0xfcd   : > { %5409 = vst [vmem:[#allocation118_spill] sm:$0xff] %v4281_v43 }
 0xfd4   : > { %v4283_v7 = vpop.permute.xlu1 %1087 }
 0xfd5   : > { %5410 = vst [vmem:[#allocation119_spill] sm:$0xff] %v4283_v7 }
 0xfdc   : > { %v4285_v1 = vpop.permute.xlu1 %1108 }
 0xfe4   : > { %v4287_v18 = vpop.permute.xlu1 %1112 }
 0xfe5   : > { %5411 = vst [vmem:[#allocation120_spill] sm:$0xff] %v4287_v18 }
 0xfec   : > { %v4289_v12 = vpop.permute.xlu1 %1132 }
 0xfed   : > { %5412 = vst [vmem:[#allocation121_spill] sm:$0xff] %v4289_v12 }
 0xff4   : > { %v4293_v51 = vpop.permute.xlu1 %1152 }
 0xff5   : > { %5414 = vst [vmem:[#allocation123_spill] sm:$0xff] %v4293_v51 }
 0xffc   : > { %v4297_v43 = vpop.permute.xlu1 %1156 }
 0xffd   : > { %5415 = vst [vmem:[#allocation124_spill] sm:$0xff] %v4297_v43 }
0x1004   : > { %v4302_v18 = vpop.permute.xlu1 %1176 }
0x1005   : > { %5416 = vst [vmem:[#allocation125_spill] sm:$0xff] %v4302_v18 }
0x100d   : > { %v4322_v18 = vpop.permute.xlu2 %1490 }
0x100e   : > { %5424 = vst [vmem:[#allocation133_spill] sm:$0xff] %v4322_v18 }
0x1025   : > { %v4291_v58 = vpop.permute.xlu0 %1486 }
0x1026   : > { %5413 = vst [vmem:[#allocation122_spill] sm:$0xff] %v4291_v58  ;;  %v4306_v58 = vpop.permute.xlu1 %1197 }
0x1027   : > { %5417 = vst [vmem:[#allocation126_spill] sm:$0xff] %v4306_v58 }
0x102d   : > { %v1500_v14 = vpop.permute.xlu0 %1499 }
0x102e   : > { %v1502_v3 = vmul.f32 %v1500_v14, %v3678_v24  ;;  %v1503_v46 = vmul.f32 %v1500_v14, %v3668_v15  ;;  %v1504_v25 = vmul.f32 %v1500_v14, %v3696_v34  ;;  %v4308_v51 = vpop.permute.xlu1 %1201  ;;  %v3331_v14 = vmov 57  }
0x102f   : > { %5418 = vst [vmem:[#allocation127_spill] sm:$0xff] %v4308_v51  ;;  %2982 = vset.pattern.permute.xlu0 %v3331_v14 }
0x1030   : > { %1510 = vrot.lane.b32.xlu2 %v1503_v46, %s3327_s3  ;;  %1508 = vrot.lane.b32.xlu1 %v1502_v3, %s3327_s3 }
0x1036   : > { %v4310_v12 = vpop.permute.xlu1 %1221 }
0x1038   : > { %1521 = vperm.xlu2 %2981, %v3602_v21   ;;  %1512 = vrot.lane.b32.xlu1 %v1504_v25, %s3327_s3  ;;  %s2526_s3 = scalar_lea.hbm %s5614_s6, %s2675_s5 }
0x103e   : > { %v4312_v15 = vpop.permute.xlu1 %1241 }
0x103f   : > { %5419 = vst [vmem:[#allocation128_spill] sm:$0xff] %v4312_v15  ;;  %v335_v15 = vmul.f32 %v3664_v13, %v3658_v9  ;;  %v345_v9 = vmul.f32 %v3688_v29, %v3626_v48 }
0x1046   : > { %v4314_v43 = vpop.permute.xlu1 %1245 }
0x1047   : > { %5420 = vst [vmem:[#allocation129_spill] sm:$0xff] %v4314_v43 }
0x104e   : > { %v4316_v46 = vpop.permute.xlu1 %1265 }
0x104f   : > { %5421 = vst [vmem:[#allocation130_spill] sm:$0xff] %v4316_v46 }
0x1056   : > { %v4318_v3 = vpop.permute.xlu1 %1286 }
0x1057   : > { %5422 = vst [vmem:[#allocation131_spill] sm:$0xff] %v4318_v3 }
0x105e   : > { %v4320_v34 = vpop.permute.xlu1 %1290 }
0x105f   : > { %5423 = vst [vmem:[#allocation132_spill] sm:$0xff] %v4320_v34  ;;  %v325_v34 = vmul.f32 %v3640_v61, %v3644_v0  ;;  %v377_v0 = vsel %vm376_vm2, %v4009_v33, %v3767_v20  ;;  %v446_v33 = vsel %vm376_vm2, %v3796_v39, %v3790_v36  ;;  %v535_v39 = vsel %vm468_vm3, %v4094_v19, %v3829_v59 }
0x1060   : > { %v624_v19 = vsel %vm557_vm4, %v4146_v38, %v3858_v23  ;;  %v713_v38 = vsel %vm646_vm5, %v4198_v5, %v3870_v60  ;;  %v5430_v5 = vld [vmem:[#allocation45_spill] sm:$0xff] }
0x1061   : > { %v337_v18 = vadd.f32 %v335_v15, %v325_v34  ;;  %v400_v15 = vsel %vm376_vm2, %v4029_v42, %v3777_v30 }
0x1066   : > { %v4324_v25 = vpop.permute.xlu1 %1310 }
0x1067   : > { %5425 = vst [vmem:[#allocation134_spill] sm:$0xff] %v4324_v25 }
0x106e   : > { %v4328_v51 = vpop.permute.xlu1 %1330 }
0x1076   : > { %v4342_v13 = vpop.permute.xlu1 %1334 }
0x1077   : > { %5427 = vst [vmem:[#allocation136_spill] sm:$0xff] %v4342_v13 }
0x108a   : > { %v4326_v58 = vpop.permute.xlu2 %1510 }
0x108b   : > { %5426 = vst [vmem:[#allocation135_spill] sm:$0xff] %v4326_v58  ;;  %v347_v58 = vadd.f32 %v345_v9, %v337_v18  ;;  %v423_v9 = vsel %vm376_vm2, %v4042_v55, %v3788_v35  ;;  %v513_v55 = vsel %vm468_vm3, %v3806_v44, %v4087_v17  ;;  %v602_v44 = vsel %vm557_vm4, %v3818_v52, %v4139_v2 }
0x108c   : > { %v691_v52 = vsel %vm646_vm5, %v3831_v63, %v4191_v56  ;;  %v780_v63 = vsel %vm735_vm6, %v3842_v6, %v4223_v27 }
0x1092   : > { %v1522_v43 = vpop.permute.xlu2 %1521 }
0x1093   : > { %v1524_v46 = vmul.f32 %v1522_v43, %v3640_v61  ;;  %v1525_v3 = vmul.f32 %v1522_v43, %v3642_v62  ;;  %v1526_v14 = vmul.f32 %v1522_v43, %v3655_v8  ;;  %v355_v43 = vmul.f32 %v3678_v24, %v3635_v53 }
0x1095   : > { %1534 = vrot.lane.b32.xlu2 %v1526_v14, %s3332_s21  ;;  %1530 = vrot.lane.b32.xlu0 %v1524_v46, %s3332_s21  ;;  %v357_v46 = vadd.f32 %v355_v43, %v347_v58  ;;  %v469_v58 = vsel %vm468_vm3, %v3798_v40, %v4061_v45  ;;  %v558_v40 = vsel %vm557_vm4, %v3812_v50, %v4113_v26 }
0x1096   : > { %1532 = vrot.lane.b32.xlu1 %v1525_v3, %s3332_s21  ;;  %v4353_v3 = vpop.permute.xlu1 %1354  ;;  %v647_v50 = vsel %vm646_vm5, %v3825_v57, %v4165_v4  ;;  %v736_v57 = vsel %vm735_vm6, %v3835_v47, %v4215_v54  ;;  %v5432_v47 = vld [vmem:[#allocation101_spill] sm:$0xff] }
0x1097   : > { %v381_v34 = vadd.f32 %v377_v0, %v357_v46  ;;  %v491_v0 = vsel %vm468_vm3, %v4068_v10, %v3815_v41  ;;  %v580_v10 = vsel %vm557_vm4, %v4120_v49, %v3845_v11  ;;  %v669_v49 = vsel %vm646_vm5, %v4172_v16, %v3866_v28 }
0x1098   : > { %v758_v16 = vsel %vm735_vm6, %v4217_v32, %v3874_v37  ;;  %v5434_v32 = vld [vmem:[#allocation48_spill] sm:$0xff] }
0x1099   : > { %v404_v18 = vadd.f32 %v400_v15, %v381_v34 }
0x109b   : > { %v427_v14 = vadd.f32 %v423_v9, %v404_v18 }
0x109d   : > { %1544 = vperm.xlu0 %2982, %v3602_v21   ;;  %v450_v43 = vadd.f32 %v446_v33, %v427_v14 }
0x109e   : > { %v4364_v42 = vpop.permute.xlu1 %1375 }
0x109f   : > { %v473_v46 = vadd.f32 %v469_v58, %v450_v43 }
0x10a1   : > { %v495_v15 = vadd.f32 %v491_v0, %v473_v46 }
0x10a3   : > { %v517_v34 = vadd.f32 %v513_v55, %v495_v15 }
0x10a5   : > { %v539_v9 = vadd.f32 %v535_v39, %v517_v34 }
0x10a6   : > { %v4381_v14 = vpop.permute.xlu1 %1379 }
0x10a7   : > { %v562_v18 = vadd.f32 %v558_v40, %v539_v9  ;;  %5428 = vst [vmem:[#allocation137_spill] sm:$0xff] %v4381_v14 }
0x10a9   : > { %v584_v33 = vadd.f32 %v580_v10, %v562_v18  ;;  %v5431_v10 = vld [vmem:[#allocation99_spill] sm:$0xff] }
0x10aa   : > { %v802_v18 = vsel %vm735_vm6, %v5431_v10, %v5430_v5  ;;  %v5442_v10 = vld [vmem:[#allocation54_spill] sm:$0xff] }
0x10ab   : > { %v606_v58 = vadd.f32 %v602_v44, %v584_v33  ;;  %v5433_v33 = vld [vmem:[#allocation46_spill] sm:$0xff] }
0x10ad   : > { %v628_v43 = vadd.f32 %v624_v19, %v606_v58  ;;  %v825_v19 = vsel %vm824_vm7, %v5433_v33, %v5432_v47  ;;  %v5443_v33 = vld [vmem:[#allocation110_spill] sm:$0xff] }
0x10ae   : > { %v4395_v46 = vpop.permute.xlu1 %1399 }
0x10af   : > { %v651_v0 = vadd.f32 %v647_v50, %v628_v43  ;;  %5429 = vst [vmem:[#allocation138_spill] sm:$0xff] %v4395_v46  ;;  %v5435_v50 = vld [vmem:[#allocation102_spill] sm:$0xff] }
0x10b0   : > { %v847_v43 = vsel %vm824_vm7, %v5435_v50, %v5434_v32 }
0x10b1   : > { %v673_v55 = vadd.f32 %v669_v49, %v651_v0  ;;  %v5436_v0 = vld [vmem:[#allocation104_spill] sm:$0xff] }
0x10b3   : > { %v695_v15 = vadd.f32 %v691_v52, %v673_v55  ;;  %v5437_v52 = vld [vmem:[#allocation49_spill] sm:$0xff] }
0x10b4   : > { %v869_v6 = vsel %vm824_vm7, %v5437_v52, %v5436_v0  ;;  %v5447_v52 = vld [vmem:[#allocation111_spill] sm:$0xff] }
0x10b5   : > { %v717_v39 = vadd.f32 %v713_v38, %v695_v15  ;;  %v5439_v15 = vld [vmem:[#allocation51_spill] sm:$0xff] }
0x10b6   : > { %v4409_v40 = vpop.permute.xlu1 %1419 }
0x10b7   : > { %v740_v34 = vadd.f32 %v736_v57, %v717_v39  ;;  %v5440_v57 = vld [vmem:[#allocation105_spill] sm:$0xff] }
0x10b8   : > { %v891_v39 = vsel %vm824_vm7, %v5440_v57, %v5439_v15  ;;  %v5448_v57 = vld [vmem:[#allocation113_spill] sm:$0xff] }
0x10b9   : > { %v762_v9 = vadd.f32 %v758_v16, %v740_v34  ;;  %v5441_v34 = vld [vmem:[#allocation52_spill] sm:$0xff] }
0x10bb   : > { %v784_v44 = vadd.f32 %v780_v63, %v762_v9  ;;  %v914_v63 = vsel %vm913_vm8, %v5441_v34, %v4248_v22 }
0x10bd   : > { %v806_v58 = vadd.f32 %v802_v18, %v784_v44  ;;  %v936_v18 = vsel %vm913_vm8, %v4252_v31, %v5442_v10  ;;  %v5450_v31 = vld [vmem:[#allocation60_spill] sm:$0xff] }
0x10be   : > { %v4426_v38 = vpop.permute.xlu1 %1423 }
0x10bf   : > { %v829_v49 = vadd.f32 %v825_v19, %v806_v58  ;;  %5438 = vst [vmem:[#allocation45_spill] sm:$0xff] %v4426_v38  ;;  %v5444_v19 = vld [vmem:[#allocation55_spill] sm:$0xff] }
0x10c0   : > { %v958_v58 = vsel %vm913_vm8, %v5444_v19, %v5443_v33  ;;  %v5452_v19 = vld [vmem:[#allocation116_spill] sm:$0xff]  ;;  %v5454_v33 = vld [vmem:[#allocation63_spill] sm:$0xff] }
0x10c1   : > { %v851_v55 = vadd.f32 %v847_v43, %v829_v49  ;;  %v5446_v49 = vld [vmem:[#allocation57_spill] sm:$0xff] }
0x10c3   : > { %v873_v16 = vadd.f32 %v869_v6, %v851_v55  ;;  %v980_v6 = vsel %vm913_vm8, %v5447_v52, %v5446_v49  ;;  %v5455_v52 = vld [vmem:[#allocation117_spill] sm:$0xff] }
0x10c5   : > { %v895_v9 = vadd.f32 %v891_v39, %v873_v16  ;;  %v5449_v39 = vld [vmem:[#allocation58_spill] sm:$0xff] }
0x10c6   : > { %v4440_v43 = vpop.permute.xlu1 %1443  ;;  %v1003_v16 = vsel %vm1002_vm9, %v5449_v39, %v5448_v57  ;;  %v5456_v39 = vld [vmem:[#allocation64_spill] sm:$0xff]  ;;  %v5457_v57 = vld [vmem:[#allocation67_spill] sm:$0xff] }
0x10c7   : > { %v918_v44 = vadd.f32 %v914_v63, %v895_v9  ;;  %5445 = vst [vmem:[#allocation99_spill] sm:$0xff] %v4440_v43  ;;  %v5451_v63 = vld [vmem:[#allocation114_spill] sm:$0xff] }
0x10c8   : > { %v1025_v9 = vsel %vm1002_vm9, %v5451_v63, %v5450_v31  ;;  %v5458_v63 = vld [vmem:[#allocation121_spill] sm:$0xff]  ;;  %v5461_v31 = vld [vmem:[#allocation123_spill] sm:$0xff] }
0x10c9   : > { %v940_v50 = vadd.f32 %v936_v18, %v918_v44  ;;  %v5453_v18 = vld [vmem:[#allocation61_spill] sm:$0xff] }
0x10ca   : > { %v1047_v44 = vsel %vm1002_vm9, %v5453_v18, %v5452_v19  ;;  %v5459_v18 = vld [vmem:[#allocation68_spill] sm:$0xff]  ;;  %v5460_v19 = vld [vmem:[#allocation71_spill] sm:$0xff] }
0x10cb   : > { %v962_v55 = vadd.f32 %v958_v58, %v940_v50  ;;  %v1069_v58 = vsel %vm1002_vm9, %v5455_v52, %v5454_v33 }
0x10cd   : > { %v984_v34 = vadd.f32 %v980_v6, %v962_v55  ;;  %v1092_v6 = vsel %vm1091_vm10, %v5456_v39, %v4283_v7  ;;  %v5463_v39 = vld [vmem:[#allocation125_spill] sm:$0xff] }
0x10ce   : > { %v1465_v13 = vpop.permute.xlu1 %1464 }
0x10cf   : > { %v1007_v38 = vadd.f32 %v1003_v16, %v984_v34  ;;  %v1114_v16 = vsel %vm1091_vm10, %v4285_v1, %v5457_v57  ;;  %v5465_v1 = vld [vmem:[#allocation75_spill] sm:$0xff] }
0x10d1   : > { %v1029_v14 = vadd.f32 %v1025_v9, %v1007_v38  ;;  %v1136_v38 = vsel %vm1091_vm10, %v5459_v18, %v5458_v63 }
0x10d3   : > { %v1051_v50 = vadd.f32 %v1047_v44, %v1029_v14  ;;  %v1158_v14 = vsel %vm1091_vm10, %v5461_v31, %v5460_v19  ;;  %v5468_v31 = vld [vmem:[#allocation79_spill] sm:$0xff] }
0x10d5   : > { %v1073_v55 = vadd.f32 %v1069_v58, %v1051_v50  ;;  %v5464_v58 = vld [vmem:[#allocation73_spill] sm:$0xff] }
0x10d6   : > { %v4469_v52 = vpop.permute.xlu1 %1468  ;;  %v1181_v50 = vsel %vm1180_vm11, %v5464_v58, %v5463_v39  ;;  %v5471_v58 = vld [vmem:[#allocation130_spill] sm:$0xff] }
0x10d7   : > { %v1096_v34 = vadd.f32 %v1092_v6, %v1073_v55  ;;  %5462 = vst [vmem:[#allocation101_spill] sm:$0xff] %v4469_v52  ;;  %v5466_v6 = vld [vmem:[#allocation126_spill] sm:$0xff] }
0x10d8   : > { %v1203_v55 = vsel %vm1180_vm11, %v5466_v6, %v5465_v1  ;;  %v5473_v6 = vld [vmem:[#allocation83_spill] sm:$0xff] }
0x10d9   : > { %v1118_v9 = vadd.f32 %v1114_v16, %v1096_v34  ;;  %v5467_v16 = vld [vmem:[#allocation77_spill] sm:$0xff] }
0x10da   : > { %v1225_v34 = vsel %vm1180_vm11, %v5467_v16, %v4310_v12  ;;  %v3333_v16 = vmov 58  }
0x10db   : > { %v1140_v44 = vadd.f32 %v1136_v38, %v1118_v9  ;;  %v5469_v38 = vld [vmem:[#allocation128_spill] sm:$0xff]  ;;  %2983 = vset.pattern.permute.xlu2 %v3333_v16  ;;  %v5479_v16 = vld [vmem:[#allocation93_spill] sm:$0xff] }
0x10dc   : > { %v1247_v9 = vsel %vm1180_vm11, %v5469_v38, %v5468_v31 }
0x10dd   : > { %v1162_v7 = vadd.f32 %v1158_v14, %v1140_v44  ;;  %v5472_v14 = vld [vmem:[#allocation81_spill] sm:$0xff] }
0x10de   : > { %v4483_v19 = vpop.permute.xlu1 %1488  ;;  %v1270_v44 = vsel %vm1269_vm12, %v5472_v14, %v5471_v58 }
0x10df   : > { %v1185_v57 = vadd.f32 %v1181_v50, %v1162_v7  ;;  %5470 = vst [vmem:[#allocation46_spill] sm:$0xff] %v4483_v19  ;;  %v5474_v7 = vld [vmem:[#allocation131_spill] sm:$0xff] }
0x10e0   : > { %v1292_v50 = vsel %vm1269_vm12, %v5474_v7, %v5473_v6 }
0x10e1   : > { %v1207_v18 = vadd.f32 %v1203_v55, %v1185_v57  ;;  %v5475_v57 = vld [vmem:[#allocation85_spill] sm:$0xff] }
0x10e2   : > { %v1314_v55 = vsel %vm1269_vm12, %v5475_v57, %v4324_v25  ;;  %v5480_v25 = vld [vmem:[#allocation95_spill] sm:$0xff] }
0x10e3   : > { %v1229_v52 = vadd.f32 %v1225_v34, %v1207_v18  ;;  %v5476_v34 = vld [vmem:[#allocation87_spill] sm:$0xff] }
0x10e4   : > { %v1336_v18 = vsel %vm1269_vm12, %v4328_v51, %v5476_v34  ;;  %v1425_v51 = vsel %vm1358_vm13, %v4409_v40, %v5480_v25 }
0x10e5   : > { %v1251_v39 = vadd.f32 %v1247_v9, %v1229_v52  ;;  %v5477_v52 = vld [vmem:[#allocation89_spill] sm:$0xff] }
0x10e6   : > { %v1509_v14 = vpop.permute.xlu1 %1508  ;;  %v1359_v9 = vsel %vm1358_vm13, %v5477_v52, %v4353_v3 }
0x10e7   : > { %v1274_v1 = vadd.f32 %v1270_v44, %v1251_v39  ;;  %v5478_v39 = vld [vmem:[#allocation91_spill] sm:$0xff] }
0x10e8   : > { %v1381_v44 = vsel %vm1358_vm13, %v4364_v42, %v5478_v39  ;;  %v5483_v42 = vld [vmem:[#allocation108_spill] sm:$0xff] }
0x10e9   : > { %v1296_v38 = vadd.f32 %v1292_v50, %v1274_v1  ;;  %v1403_v1 = vsel %vm1358_vm13, %v5479_v16, %v4395_v46  ;;  %v5484_v16 = vld [vmem:[#allocation122_spill] sm:$0xff]  ;;  %v5485_v46 = vld [vmem:[#allocation135_spill] sm:$0xff] }
0x10ea   : > { %v1514_v40 = vsel %vm1447_vm14, %v1509_v14, %v5485_v46  ;;  %v5489_v14 = vld [vmem:[#allocation33_spill] sm:$0xff]  ;;  %v5496_v46 = vld [vmem:[#allocation32_spill] sm:$0xff] }
0x10eb   : > { %v1318_v31 = vadd.f32 %v1314_v55, %v1296_v38  ;;  %v5481_v38 = vld [vmem:[#allocation98_spill] sm:$0xff] }
0x10ed   : > { %v1340_v7 = vadd.f32 %v1336_v18, %v1318_v31  ;;  %v1448_v31 = vsel %vm1447_vm14, %v5481_v38, %v4440_v43 }
0x10ee   : > { %v4512_v52 = vpop.permute.xlu1 %1512 }
0x10ef   : > { %v1363_v57 = vadd.f32 %v1359_v9, %v1340_v7  ;;  %5482 = vst [vmem:[#allocation48_spill] sm:$0xff] %v4512_v52  ;;  %v1470_v9 = vsel %vm1447_vm14, %v1465_v13, %v5483_v42  ;;  %v5488_v52 = vld [vmem:[#allocation27_spill] sm:$0xff] }
0x10f1   : > { %v1385_v50 = vadd.f32 %v1381_v44, %v1363_v57  ;;  %v1492_v44 = vsel %vm1447_vm14, %v5484_v16, %v4483_v19  ;;  %v4532_v16 = vpop.permute.xlu2 %1534 }
0x10f2   : > { %5490 = vst [vmem:[#allocation104_spill] sm:$0xff] %v4532_v16 }
0x10f3   : > { %v1407_v55 = vadd.f32 %v1403_v1, %v1385_v50 }
0x10f5   : > { %v1429_v18 = vadd.f32 %v1425_v51, %v1407_v55 }
0x10f7   : > { %v1452_v7 = vadd.f32 %v1448_v31, %v1429_v18  ;;  %v5487_v31 = vld [vmem:[#allocation30_spill] sm:$0xff] }
0x10f9   : > { %v1474_v57 = vadd.f32 %v1470_v9, %v1452_v7  ;;  %v3334_v7 = vmov 59  }
0x10fa   : > { %2984 = vset.pattern.permute.xlu0 %v3334_v7 }
0x10fb   : > { %v1496_v1 = vadd.f32 %v1492_v44, %v1474_v57 }
0x10fd   : > { %v1518_v25 = vadd.f32 %v1514_v40, %v1496_v1  ;;  %v5492_v40 = vld [vmem:[#allocation31_spill] sm:$0xff] }
0x1107   : > { %v1531_v50 = vpop.permute.xlu0 %1530 }
0x1108   : > { %v4521_v38 = vpop.permute.xlu1 %1532 }
0x1109   : > { %5486 = vst [vmem:[#allocation102_spill] sm:$0xff] %v4521_v38  ;;  %v1537_v51 = vsel %vm1536_vm15, %v1531_v50, %v4521_v38 }
0x110a   : > { %v1541_v55 = vadd.f32 %v1537_v51, %v1518_v25  ;;  %v3335_v51 = vmov 60  }
0x110f   : > { %v1545_v13 = vpop.permute.xlu0 %1544 }
0x1110   : > { %v1547_v18 = vmul.f32 %v1545_v13, %v5487_v31  ;;  %v1548_v42 = vmul.f32 %v1545_v13, %v5488_v52  ;;  %v1549_v9 = vmul.f32 %v1545_v13, %v5489_v14 }
0x1112   : > { %1555 = vrot.lane.b32.xlu2 %v1548_v42, %s3332_s21  ;;  %1553 = vrot.lane.b32.xlu1 %v1547_v18, %s3332_s21  ;;  %v5493_v42 = vld [vmem:[#allocation26_spill] sm:$0xff] }
0x111a   : > { %1566 = vperm.xlu2 %2983, %v3602_v21   ;;  %1557 = vrot.lane.b32.xlu1 %v1549_v9, %s3332_s21 }
0x1122   : > { %2985 = vset.pattern.permute.xlu2 %v3335_v51  ;;  %v5497_v51 = vld [vmem:[#allocation35_spill] sm:$0xff] }
0x116c   : > { %v4534_v25 = vpop.permute.xlu2 %1555 }
0x116d   : > { %5491 = vst [vmem:[#allocation49_spill] sm:$0xff] %v4534_v25 }
0x1174   : > { %v1567_v44 = vpop.permute.xlu2 %1566 }
0x1175   : > { %v1569_v57 = vmul.f32 %v1567_v44, %v3688_v29  ;;  %v1570_v1 = vmul.f32 %v1567_v44, %v5492_v40  ;;  %v1571_v50 = vmul.f32 %v1567_v44, %v5493_v42 }
0x1177   : > { %1579 = vrot.lane.b32.xlu2 %v1571_v50, %s3332_s21  ;;  %1575 = vrot.lane.b32.xlu0 %v1569_v57, %s3332_s21 }
0x1178   : > { %1577 = vrot.lane.b32.xlu1 %v1570_v1, %s3332_s21 }
0x117f   : > { %1588 = vperm.xlu0 %2984, %v3602_v21  }
0x1184   : > { %v1554_v13 = vpop.permute.xlu1 %1553 }
0x1185   : > { %v1559_v9 = vsel %vm1536_vm15, %v1554_v13, %v4534_v25 }
0x1186   : > { %v1563_v38 = vadd.f32 %v1559_v9, %v1541_v55  ;;  %v3336_v55 = vmov 61  }
0x1187   : > { %2986 = vset.pattern.permute.xlu0 %v3336_v55 }
0x118c   : > { %v4543_v18 = vpop.permute.xlu1 %1557 }
0x118d   : > { %5494 = vst [vmem:[#allocation51_spill] sm:$0xff] %v4543_v18 }
0x11d1   : > { %v4558_v13 = vpop.permute.xlu2 %1579 }
0x11d2   : > { %5498 = vst [vmem:[#allocation52_spill] sm:$0xff] %v4558_v13 }
0x11e9   : > { %v1576_v7 = vpop.permute.xlu0 %1575 }
0x11ea   : > { %v4547_v16 = vpop.permute.xlu1 %1577 }
0x11eb   : > { %5495 = vst [vmem:[#allocation105_spill] sm:$0xff] %v4547_v16  ;;  %v1581_v44 = vsel %vm1536_vm15, %v1576_v7, %v4547_v16 }
0x11ec   : > { %v1585_v57 = vadd.f32 %v1581_v44, %v1563_v38 }
0x11f1   : > { %v1589_v50 = vpop.permute.xlu0 %1588 }
0x11f2   : > { %v1591_v1 = vmul.f32 %v1589_v50, %v3678_v24  ;;  %v1592_v19 = vmul.f32 %v1589_v50, %v5496_v46  ;;  %v1593_v18 = vmul.f32 %v1589_v50, %v5497_v51 }
0x11f4   : > { %1599 = vrot.lane.b32.xlu2 %v1592_v19, %s3332_s21  ;;  %1597 = vrot.lane.b32.xlu1 %v1591_v1, %s3332_s21 }
0x11fc   : > { %1610 = vperm.xlu2 %2985, %v3602_v21   ;;  %1601 = vrot.lane.b32.xlu1 %v1593_v18, %s3332_s21  ;;  %v3338_v18 = vmov 62   ;;  %s2530_s21 = sshll.u32 %s2526_s3, 4  ;;  %s2531_s21 = int_to_ptr.hbm [resolvable:$true] %s2530_s21 }
0x1204   : > { %2987 = vset.pattern.permute.xlu2 %v3338_v18 }
0x124e   : > { %v4560_v38 = vpop.permute.xlu2 %1599 }
0x124f   : > { %5499 = vst [vmem:[#allocation54_spill] sm:$0xff] %v4560_v38 }
0x1256   : > { %v1611_v9 = vpop.permute.xlu2 %1610 }
0x1257   : > { %v1613_v7 = vmul.f32 %v1611_v9, %v3640_v61  ;;  %v1614_v44 = vmul.f32 %v1611_v9, %v3642_v62  ;;  %v1615_v19 = vmul.f32 %v1611_v9, %v3655_v8 }
0x1259   : > { %1623 = vrot.lane.b32.xlu2 %v1615_v19, %s3337_s8  ;;  %1619 = vrot.lane.b32.xlu0 %v1613_v7, %s3337_s8 }
0x125a   : > { %1621 = vrot.lane.b32.xlu1 %v1614_v44, %s3337_s8 }
0x1261   : > { %1633 = vperm.xlu0 %2986, %v3602_v21  }
0x1266   : > { %v1598_v50 = vpop.permute.xlu1 %1597 }
0x1267   : > { %v1603_v55 = vsel %vm1536_vm15, %v1598_v50, %v4560_v38 }
0x1268   : > { %v1607_v9 = vadd.f32 %v1603_v55, %v1585_v57  ;;  %v3339_v57 = vmov 63  }
0x1269   : > { %2988 = vset.pattern.permute.xlu0 %v3339_v57 }
0x126e   : > { %v4569_v1 = vpop.permute.xlu1 %1601 }
0x126f   : > { %5500 = vst [vmem:[#allocation55_spill] sm:$0xff] %v4569_v1 }
0x12b3   : > { %v4584_v55 = vpop.permute.xlu2 %1623 }
0x12b4   : > { %5502 = vst [vmem:[#allocation111_spill] sm:$0xff] %v4584_v55 }
0x12cb   : > { %v1620_v16 = vpop.permute.xlu0 %1619 }
0x12cc   : > { %v4573_v13 = vpop.permute.xlu1 %1621 }
0x12cd   : > { %5501 = vst [vmem:[#allocation57_spill] sm:$0xff] %v4573_v13  ;;  %v1626_v7 = vsel %vm1625_vm0, %v1620_v16, %v4573_v13 }
0x12ce   : > { %v1630_v19 = vadd.f32 %v1626_v7, %v1607_v9 }
0x12d3   : > { %v1634_v44 = vpop.permute.xlu0 %1633 }
0x12d4   : > { %v1636_v25 = vmul.f32 %v1634_v44, %v5487_v31  ;;  %v1637_v18 = vmul.f32 %v1634_v44, %v5488_v52  ;;  %v1638_v50 = vmul.f32 %v1634_v44, %v5489_v14 }
0x12d6   : > { %1644 = vrot.lane.b32.xlu2 %v1637_v18, %s3337_s8  ;;  %1642 = vrot.lane.b32.xlu1 %v1636_v25, %s3337_s8  ;;  %v3340_v25 = vmov 64  }
0x12de   : > { %1655 = vperm.xlu2 %2987, %v3602_v21   ;;  %1646 = vrot.lane.b32.xlu1 %v1638_v50, %s3337_s8 }
0x12e6   : > { %2989 = vset.pattern.permute.xlu2 %v3340_v25 }
0x1330   : > { %v4586_v16 = vpop.permute.xlu2 %1644 }
0x1331   : > { %5503 = vst [vmem:[#allocation58_spill] sm:$0xff] %v4586_v16 }
0x1338   : > { %v1656_v9 = vpop.permute.xlu2 %1655 }
0x1339   : > { %v1658_v7 = vmul.f32 %v1656_v9, %v3688_v29  ;;  %v1659_v13 = vmul.f32 %v1656_v9, %v5492_v40  ;;  %v1660_v18 = vmul.f32 %v1656_v9, %v5493_v42 }
0x133b   : > { %1668 = vrot.lane.b32.xlu2 %v1660_v18, %s3337_s8  ;;  %1664 = vrot.lane.b32.xlu0 %v1658_v7, %s3337_s8 }
0x133c   : > { %1666 = vrot.lane.b32.xlu1 %v1659_v13, %s3337_s8 }
0x1343   : > { %1677 = vperm.xlu0 %2988, %v3602_v21  }
0x1348   : > { %v1643_v44 = vpop.permute.xlu1 %1642 }
0x1349   : > { %v1648_v57 = vsel %vm1625_vm0, %v1643_v44, %v4586_v16 }
0x134a   : > { %v1652_v38 = vadd.f32 %v1648_v57, %v1630_v19  ;;  %v3341_v19 = vmov 65  }
0x134b   : > { %2990 = vset.pattern.permute.xlu0 %v3341_v19 }
0x1350   : > { %v4595_v50 = vpop.permute.xlu1 %1646 }
0x1351   : > { %5504 = vst [vmem:[#allocation114_spill] sm:$0xff] %v4595_v50 }
0x1395   : > { %v4610_v44 = vpop.permute.xlu2 %1668 }
0x1396   : > { %5506 = vst [vmem:[#allocation63_spill] sm:$0xff] %v4610_v44 }
0x13ad   : > { %v1665_v55 = vpop.permute.xlu0 %1664 }
0x13ae   : > { %v4599_v1 = vpop.permute.xlu1 %1666 }
0x13af   : > { %5505 = vst [vmem:[#allocation61_spill] sm:$0xff] %v4599_v1  ;;  %v1670_v9 = vsel %vm1625_vm0, %v1665_v55, %v4599_v1 }
0x13b0   : > { %v1674_v7 = vadd.f32 %v1670_v9, %v1652_v38 }
0x13b5   : > { %v1678_v18 = vpop.permute.xlu0 %1677 }
0x13b6   : > { %v1680_v13 = vmul.f32 %v1678_v18, %v3678_v24  ;;  %v1681_v43 = vmul.f32 %v1678_v18, %v5496_v46  ;;  %v1682_v25 = vmul.f32 %v1678_v18, %v5497_v51  ;;  %v3343_v18 = vmov 66  }
0x13b8   : > { %1688 = vrot.lane.b32.xlu2 %v1681_v43, %s3337_s8  ;;  %1686 = vrot.lane.b32.xlu1 %v1680_v13, %s3337_s8 }
0x13c0   : > { %1699 = vperm.xlu2 %2989, %v3602_v21   ;;  %1690 = vrot.lane.b32.xlu1 %v1682_v25, %s3337_s8  ;;  %s2513_s8 = scalar_lea.sflag [#allocation4], %s3569_s2 }
0x13c8   : > { %2991 = vset.pattern.permute.xlu2 %v3343_v18 }
0x1412   : > { %v4612_v38 = vpop.permute.xlu2 %1688 }
0x1413   : > { %5507 = vst [vmem:[#allocation117_spill] sm:$0xff] %v4612_v38 }
0x141a   : > { %v1700_v55 = vpop.permute.xlu2 %1699 }
0x141b   : > { %v1702_v57 = vmul.f32 %v1700_v55, %v3640_v61  ;;  %v1703_v9 = vmul.f32 %v1700_v55, %v3642_v62  ;;  %v1704_v43 = vmul.f32 %v1700_v55, %v3655_v8 }
0x141d   : > { %1712 = vrot.lane.b32.xlu2 %v1704_v43, %s3342_s15  ;;  %1708 = vrot.lane.b32.xlu0 %v1702_v57, %s3342_s15 }
0x141e   : > { %1710 = vrot.lane.b32.xlu1 %v1703_v9, %s3342_s15 }
0x1425   : > { %1722 = vperm.xlu0 %2990, %v3602_v21  }
0x142a   : > { %v1687_v13 = vpop.permute.xlu1 %1686 }
0x142b   : > { %v1692_v19 = vsel %vm1625_vm0, %v1687_v13, %v4612_v38 }
0x142c   : > { %v1696_v55 = vadd.f32 %v1692_v19, %v1674_v7  ;;  %v3344_v7 = vmov 67  }
0x142d   : > { %2992 = vset.pattern.permute.xlu0 %v3344_v7 }
0x1432   : > { %v4621_v25 = vpop.permute.xlu1 %1690 }
0x1433   : > { %5508 = vst [vmem:[#allocation64_spill] sm:$0xff] %v4621_v25 }
0x1477   : > { %v4636_v19 = vpop.permute.xlu2 %1712 }
0x1478   : > { %5510 = vst [vmem:[#allocation68_spill] sm:$0xff] %v4636_v19 }
0x148f   : > { %v1709_v1 = vpop.permute.xlu0 %1708 }
0x1490   : > { %v4625_v44 = vpop.permute.xlu1 %1710 }
0x1491   : > { %5509 = vst [vmem:[#allocation121_spill] sm:$0xff] %v4625_v44  ;;  %v1715_v57 = vsel %vm5289_vm1, %v1709_v1, %v4625_v44 }
0x1492   : > { %v1719_v43 = vadd.f32 %v1715_v57, %v1696_v55 }
0x1497   : > { %v1723_v9 = vpop.permute.xlu0 %1722 }
0x1498   : > { %v1725_v16 = vmul.f32 %v1723_v9, %v5487_v31  ;;  %v1726_v18 = vmul.f32 %v1723_v9, %v5488_v52  ;;  %v1727_v13 = vmul.f32 %v1723_v9, %v5489_v14 }
0x149a   : > { %1733 = vrot.lane.b32.xlu2 %v1726_v18, %s3342_s15  ;;  %1731 = vrot.lane.b32.xlu1 %v1725_v16, %s3342_s15  ;;  %v3345_v16 = vmov 68  }
0x14a2   : > { %1744 = vperm.xlu2 %2991, %v3602_v21   ;;  %1735 = vrot.lane.b32.xlu1 %v1727_v13, %s3342_s15 }
0x14aa   : > { %2993 = vset.pattern.permute.xlu2 %v3345_v16 }
0x14f4   : > { %v4638_v1 = vpop.permute.xlu2 %1733 }
0x14fc   : > { %v1745_v55 = vpop.permute.xlu2 %1744 }
0x14fd   : > { %v1747_v57 = vmul.f32 %v1745_v55, %v3688_v29  ;;  %v1748_v44 = vmul.f32 %v1745_v55, %v5492_v40  ;;  %v1749_v18 = vmul.f32 %v1745_v55, %v5493_v42 }
0x14ff   : > { %1757 = vrot.lane.b32.xlu2 %v1749_v18, %s3342_s15  ;;  %1753 = vrot.lane.b32.xlu0 %v1747_v57, %s3342_s15 }
0x1500   : > { %1755 = vrot.lane.b32.xlu1 %v1748_v44, %s3342_s15 }
0x1507   : > { %1766 = vperm.xlu0 %2992, %v3602_v21  }
0x150c   : > { %v1732_v9 = vpop.permute.xlu1 %1731 }
0x150d   : > { %v1737_v7 = vsel %vm5289_vm1, %v1732_v9, %v4638_v1 }
0x150e   : > { %v1741_v38 = vadd.f32 %v1737_v7, %v1719_v43  ;;  %v3346_v43 = vmov 69  }
0x150f   : > { %2994 = vset.pattern.permute.xlu0 %v3346_v43  ;;  %v3348_v43 = vmov 70  }
0x1514   : > { %v4647_v13 = vpop.permute.xlu1 %1735 }
0x1559   : > { %v4662_v9 = vpop.permute.xlu2 %1757 }
0x1571   : > { %v1754_v19 = vpop.permute.xlu0 %1753 }
0x1572   : > { %v4651_v25 = vpop.permute.xlu1 %1755 }
0x1573   : > { %5511 = vst [vmem:[#allocation123_spill] sm:$0xff] %v4651_v25  ;;  %v1759_v55 = vsel %vm5289_vm1, %v1754_v19, %v4651_v25  ;;  %v356_v25 = vmul.f32 %v5496_v46, %v3635_v53 }
0x1574   : > { %v1763_v57 = vadd.f32 %v1759_v55, %v1741_v38 }
0x1579   : > { %v1767_v18 = vpop.permute.xlu0 %1766 }
0x157a   : > { %v1769_v44 = vmul.f32 %v1767_v18, %v3678_v24  ;;  %v1770_v50 = vmul.f32 %v1767_v18, %v5496_v46  ;;  %v1771_v16 = vmul.f32 %v1767_v18, %v5497_v51 }
0x157c   : > { %1777 = vrot.lane.b32.xlu2 %v1770_v50, %s3342_s15  ;;  %1775 = vrot.lane.b32.xlu1 %v1769_v44, %s3342_s15 }
0x1584   : > { %1788 = vperm.xlu2 %2993, %v3602_v21   ;;  %1779 = vrot.lane.b32.xlu1 %v1771_v16, %s3342_s15  ;;  %s3142_s15 = sshra.s32 %s2531_s21, 4  ;;  %s3143_s15 = int_to_ptr.hbm [resolvable:$true] %s3142_s15 }
0x1585   : > { %p3149_p8 = scmp.lt.s32.totalorder %s3143_s15, %s5614_s6 }
0x158c   : > { %2995 = vset.pattern.permute.xlu2 %v3348_v43 }
0x15d6   : > { %v4664_v38 = vpop.permute.xlu2 %1777 }
0x15de   : > { %v1789_v19 = vpop.permute.xlu2 %1788 }
0x15df   : > { %v1791_v7 = vmul.f32 %v1789_v19, %v3640_v61  ;;  %v1792_v55 = vmul.f32 %v1789_v19, %v3642_v62  ;;  %v1793_v50 = vmul.f32 %v1789_v19, %v3655_v8  ;;  %v5512_v61 = vld [vmem:[#allocation29_spill] sm:$0xff] }
0x15e0   : > { %v336_v51 = vmul.f32 %v5488_v52, %v5512_v61  ;;  %v5513_v19 = vld [vmem:[#allocation25_spill] sm:$0xff] }
0x15e1   : > { %1801 = vrot.lane.b32.xlu2 %v1793_v50, %s3347_s25  ;;  %1797 = vrot.lane.b32.xlu0 %v1791_v7, %s3347_s25  ;;  %v326_v8 = vmul.f32 %v3642_v62, %v5513_v19  ;;  %v346_v7 = vmul.f32 %v5492_v40, %v3626_v48  ;;  %v5515_v19 = vld [vmem:[#allocation69_spill] sm:$0xff] }
0x15e2   : > { %1799 = vrot.lane.b32.xlu1 %v1792_v55, %s3347_s25 }
0x15e3   : > { %v338_v50 = vadd.f32 %v336_v51, %v326_v8  ;;  %v401_v8 = vsel %vm376_vm2, %v3777_v30, %v5515_v19  ;;  %v5518_v19 = vld [vmem:[#allocation37_spill] sm:$0xff] }
0x15e5   : > { %v348_v55 = vadd.f32 %v346_v7, %v338_v50  ;;  %v5516_v7 = vld [vmem:[#allocation36_spill] sm:$0xff] }
0x15e6   : > { %v424_v62 = vsel %vm376_vm2, %v3788_v35, %v5516_v7  ;;  %v5519_v35 = vld [vmem:[#allocation76_spill] sm:$0xff]  ;;  %v5522_v7 = vld [vmem:[#allocation39_spill] sm:$0xff] }
0x15e7   : > { %v358_v61 = vadd.f32 %v356_v25, %v348_v55 }
0x15e9   : > { %1811 = vperm.xlu0 %2994, %v3602_v21  }
0x15ee   : > { %v1776_v18 = vpop.permute.xlu1 %1775 }
0x15ef   : > { %v1781_v44 = vsel %vm5289_vm1, %v1776_v18, %v4664_v38  ;;  %vm1803_vm1 = vcmask 539648  }
0x15f0   : > { %v1785_v16 = vadd.f32 %v1781_v44, %v1763_v57  ;;  %v5514_v57 = vld [vmem:[#allocation65_spill] sm:$0xff] }
0x15f1   : > { %v378_v18 = vsel %vm376_vm2, %v3767_v20, %v5514_v57  ;;  %v5517_v20 = vld [vmem:[#allocation72_spill] sm:$0xff] }
0x15f2   : > { %v382_v51 = vadd.f32 %v378_v18, %v358_v61  ;;  %v447_v25 = vsel %vm376_vm2, %v3790_v36, %v5517_v20  ;;  %v5520_v61 = vld [vmem:[#allocation38_spill] sm:$0xff]  ;;  %vm5601_vm2 = vcmask 547840  }
0x15f4   : > { %v405_v53 = vadd.f32 %v401_v8, %v382_v51 }
0x15f6   : > { %v4679_v24 = vpop.permute.xlu1 %1779  ;;  %v428_v57 = vadd.f32 %v424_v62, %v405_v53  ;;  %v514_v62 = vsel %vm468_vm3, %v4087_v17, %v5520_v61  ;;  %v5528_v61 = vld [vmem:[#allocation42_spill] sm:$0xff] }
0x15f8   : > { %v451_v18 = vadd.f32 %v447_v25, %v428_v57  ;;  %v5524_v57 = vld [vmem:[#allocation40_spill] sm:$0xff] }
0x1653   : > { %v1798_v44 = vpop.permute.xlu0 %1797 }
0x1654   : > { %v4688_v43 = vpop.permute.xlu1 %1799 }
0x1655   : > { %v1804_v48 = vsel %vm1803_vm1, %v1798_v44, %v4688_v43  ;;  %v492_v44 = vsel %vm468_vm3, %v3815_v41, %v5519_v35  ;;  %v5523_v41 = vld [vmem:[#allocation84_spill] sm:$0xff] }
0x1656   : > { %v4695_v50 = vadd.f32 %v1804_v48, %v1785_v16  ;;  %v470_v16 = vsel %vm468_vm3, %v4061_v45, %v5518_v19  ;;  %v5521_v48 = vld [vmem:[#allocation80_spill] sm:$0xff]  ;;  %v581_v17 = vsel %vm557_vm4, %v3845_v11, %v5523_v41 }
0x1657   : > { %v474_v36 = vadd.f32 %v470_v16, %v451_v18  ;;  %v536_v51 = vsel %vm468_vm3, %v3829_v59, %v5521_v48  ;;  %v603_v59 = vsel %vm557_vm4, %v4139_v2, %v5524_v57  ;;  %v5526_v16 = vld [vmem:[#allocation41_spill] sm:$0xff]  ;;  %v692_v2 = vsel %vm646_vm5, %v4191_v56, %v5528_v61  ;;  %v5533_v41 = vld [vmem:[#allocation100_spill] sm:$0xff]  ;;  %v5541_v61 = vld [vmem:[#allocation110_spill] sm:$0xff] }
0x1658   : > { %v648_v18 = vsel %vm646_vm5, %v4165_v4, %v5526_v16  ;;  %vm5602_vm3 = vmmov %vm5601_vm2 }
0x1659   : > { %v496_v8 = vadd.f32 %v492_v44, %v474_v36  ;;  %v5527_v44 = vld [vmem:[#allocation92_spill] sm:$0xff] }
0x165a   : > { %v670_v11 = vsel %vm646_vm5, %v3866_v28, %v5527_v44  ;;  %v5539_v44 = vld [vmem:[#allocation109_spill] sm:$0xff] }
0x165b   : > { %v1812_v55 = vpop.permute.xlu0 %1811  ;;  %v518_v45 = vadd.f32 %v514_v62, %v496_v8  ;;  %v5529_v8 = vld [vmem:[#allocation96_spill] sm:$0xff] }
0x165c   : > { %v1814_v46 = vmul.f32 %v1812_v55, %v5487_v31  ;;  %v1815_v30 = vmul.f32 %v1812_v55, %v5488_v52  ;;  %v1816_v53 = vmul.f32 %v1812_v55, %v5489_v14  ;;  %v5525_v55 = vld [vmem:[#allocation88_spill] sm:$0xff] }
0x165d   : > { %v540_v20 = vadd.f32 %v536_v51, %v518_v45  ;;  %v625_v19 = vsel %vm557_vm4, %v3858_v23, %v5525_v55  ;;  %v714_v23 = vsel %vm646_vm5, %v3870_v60, %v5529_v8  ;;  %v5530_v51 = vld [vmem:[#allocation43_spill] sm:$0xff]  ;;  %v803_v60 = vsel %vm735_vm6, %v5430_v5, %v5533_v41  ;;  %v5536_v55 = vld [vmem:[#allocation50_spill] sm:$0xff]  ;;  %vm5605_vm5 = vmmov %vm5601_vm2 }
0x165e   : > { %1822 = vrot.lane.b32.xlu2 %v1815_v30, %s3347_s25  ;;  %1820 = vrot.lane.b32.xlu1 %v1814_v46, %s3347_s25  ;;  %v559_v46 = vsel %vm557_vm4, %v4113_v26, %v5522_v7  ;;  %v737_v4 = vsel %vm735_vm6, %v4215_v54, %v5530_v51  ;;  %vm5604_vm4 = vmmov %vm5601_vm2 }
0x165f   : > { %v563_v25 = vadd.f32 %v559_v46, %v540_v20  ;;  %v5532_v46 = vld [vmem:[#allocation44_spill] sm:$0xff] }
0x1660   : > { %v781_v56 = vsel %vm735_vm6, %v4223_v27, %v5532_v46  ;;  %v870_v27 = vsel %vm824_vm7, %v5436_v0, %v5536_v55  ;;  %v5554_v55 = vld [vmem:[#allocation70_spill] sm:$0xff] }
0x1661   : > { %v585_v30 = vadd.f32 %v581_v17, %v563_v25  ;;  %v5534_v25 = vld [vmem:[#allocation47_spill] sm:$0xff] }
0x1662   : > { %v826_v54 = vsel %vm824_vm7, %v5432_v47, %v5534_v25 }
0x1663   : > { %v607_v26 = vadd.f32 %v603_v59, %v585_v30  ;;  %v5535_v59 = vld [vmem:[#allocation103_spill] sm:$0xff] }
0x1665   : > { %v629_v35 = vadd.f32 %v625_v19, %v607_v26  ;;  %v5537_v26 = vld [vmem:[#allocation106_spill] sm:$0xff] }
0x1666   : > { %1833 = vperm.xlu2 %2995, %v3602_v21   ;;  %1824 = vrot.lane.b32.xlu1 %v1816_v53, %s3347_s25  ;;  %v5531_v53 = vld [vmem:[#allocation97_spill] sm:$0xff]  ;;  %v892_v5 = vsel %vm824_vm7, %v5439_v15, %v5537_v26  ;;  %v5555_v26 = vld [vmem:[#allocation124_spill] sm:$0xff] }
0x1667   : > { %v652_v36 = vadd.f32 %v648_v18, %v629_v35  ;;  %v759_v28 = vsel %vm735_vm6, %v3874_v37, %v5531_v53  ;;  %v848_v37 = vsel %vm824_vm7, %v5434_v32, %v5535_v59  ;;  %v5538_v18 = vld [vmem:[#allocation53_spill] sm:$0xff]  ;;  %v937_v32 = vsel %vm913_vm8, %v5442_v10, %v5539_v44  ;;  %v5553_v59 = vld [vmem:[#allocation67_spill] sm:$0xff] }
0x1668   : > { %v915_v47 = vsel %vm913_vm8, %v4248_v22, %v5538_v18  ;;  %v5557_v18 = vld [vmem:[#allocation74_spill] sm:$0xff]  ;;  %vm1892_vm6 = vcmask 531456   ;;  %vm1981_vm7 = vcmask 523264  }
0x1669   : > { %v674_v62 = vadd.f32 %v670_v11, %v652_v36  ;;  %v5540_v36 = vld [vmem:[#allocation56_spill] sm:$0xff] }
0x166a   : > { %v959_v0 = vsel %vm913_vm8, %v5541_v61, %v5540_v36 }
0x166b   : > { %v696_v48 = vadd.f32 %v692_v2, %v674_v62  ;;  %v5542_v62 = vld [vmem:[#allocation112_spill] sm:$0xff] }
0x166c   : > { %v981_v15 = vsel %vm913_vm8, %v5446_v49, %v5542_v62  ;;  %v5562_v62 = vld [vmem:[#allocation129_spill] sm:$0xff]  ;;  %vm2070_vm8 = vcmask 392192  }
0x166d   : > { %v718_v45 = vadd.f32 %v714_v23, %v696_v48  ;;  %v5543_v23 = vld [vmem:[#allocation59_spill] sm:$0xff]  ;;  %v5544_v48 = vld [vmem:[#allocation113_spill] sm:$0xff] }
0x166e   : > { %v1004_v22 = vsel %vm1002_vm9, %v5544_v48, %v5543_v23  ;;  %v5564_v48 = vld [vmem:[#allocation82_spill] sm:$0xff] }
0x166f   : > { %v741_v7 = vadd.f32 %v737_v4, %v718_v45  ;;  %v5545_v4 = vld [vmem:[#allocation115_spill] sm:$0xff]  ;;  %v5546_v45 = vld [vmem:[#allocation60_spill] sm:$0xff] }
0x1670   : > { %v1026_v10 = vsel %vm1002_vm9, %v5546_v45, %v5545_v4  ;;  %v5565_v45 = vld [vmem:[#allocation132_spill] sm:$0xff] }
0x1671   : > { %v763_v20 = vadd.f32 %v759_v28, %v741_v7  ;;  %v5547_v28 = vld [vmem:[#allocation62_spill] sm:$0xff]  ;;  %v5548_v7 = vld [vmem:[#allocation116_spill] sm:$0xff] }
0x1672   : > { %v1048_v46 = vsel %vm1002_vm9, %v5548_v7, %v5547_v28  ;;  %v5566_v28 = vld [vmem:[#allocation86_spill] sm:$0xff] }
0x1673   : > { %v785_v17 = vadd.f32 %v781_v56, %v763_v20  ;;  %v5549_v20 = vld [vmem:[#allocation118_spill] sm:$0xff] }
0x1674   : > { %v1070_v49 = vsel %vm1002_vm9, %v5454_v33, %v5549_v20  ;;  %vm2159_vm9 = vcmask 384000  }
0x1675   : > { %v807_v57 = vadd.f32 %v803_v60, %v785_v17  ;;  %v5550_v60 = vld [vmem:[#allocation66_spill] sm:$0xff]  ;;  %v5551_v17 = vld [vmem:[#allocation119_spill] sm:$0xff] }
0x1676   : > { %v1093_v25 = vsel %vm1091_vm10, %v5551_v17, %v5550_v60  ;;  %v5570_v17 = vld [vmem:[#allocation137_spill] sm:$0xff] }
0x1677   : > { %v830_v30 = vadd.f32 %v826_v54, %v807_v57  ;;  %v5552_v57 = vld [vmem:[#allocation120_spill] sm:$0xff] }
0x1679   : > { %v852_v19 = vadd.f32 %v848_v37, %v830_v30  ;;  %v1115_v37 = vsel %vm1091_vm10, %v5553_v59, %v5552_v57  ;;  %v5571_v57 = vld [vmem:[#allocation94_spill] sm:$0xff] }
0x167a   : > { %v5572_v59 = vld [vmem:[#allocation138_spill] sm:$0xff] }
0x167b   : > { %v874_v16 = vadd.f32 %v870_v27, %v852_v19  ;;  %v1137_v27 = vsel %vm1091_vm10, %v5458_v63, %v5554_v55  ;;  %v5573_v55 = vld [vmem:[#allocation45_spill] sm:$0xff] }
0x167d   : > { %v896_v35 = vadd.f32 %v892_v5, %v874_v16  ;;  %v5556_v5 = vld [vmem:[#allocation71_spill] sm:$0xff] }
0x167e   : > { %v1159_v33 = vsel %vm1091_vm10, %v5556_v5, %v5555_v26  ;;  %v5575_v26 = vld [vmem:[#allocation107_spill] sm:$0xff]  ;;  %vm2248_vm10 = vcmask 375808  }
0x167f   : > { %v919_v11 = vadd.f32 %v915_v47, %v896_v35  ;;  %v5558_v47 = vld [vmem:[#allocation125_spill] sm:$0xff]  ;;  %v5576_v5 = vld [vmem:[#allocation99_spill] sm:$0xff] }
0x1680   : > { %v1182_v35 = vsel %vm1180_vm11, %v5558_v47, %v5557_v18  ;;  %v5578_v18 = vld [vmem:[#allocation108_spill] sm:$0xff] }
0x1681   : > { %v941_v2 = vadd.f32 %v937_v32, %v919_v11  ;;  %v5559_v32 = vld [vmem:[#allocation127_spill] sm:$0xff] }
0x1682   : > { %v5560_v11 = vld [vmem:[#allocation75_spill] sm:$0xff] }
0x1683   : > { %v963_v8 = vadd.f32 %v959_v0, %v941_v2  ;;  %v1204_v36 = vsel %vm1180_vm11, %v5560_v11, %v5559_v32  ;;  %v5561_v0 = vld [vmem:[#allocation78_spill] sm:$0xff] }
0x1684   : > { %v1226_v63 = vsel %vm1180_vm11, %v4310_v12, %v5561_v0  ;;  %v5567_v12 = vld [vmem:[#allocation134_spill] sm:$0xff]  ;;  %v5582_v0 = vld [vmem:[#allocation135_spill] sm:$0xff] }
0x1685   : > { %v985_v51 = vadd.f32 %v981_v15, %v963_v8  ;;  %v5563_v15 = vld [vmem:[#allocation79_spill] sm:$0xff]  ;;  %v1315_v7 = vsel %vm1269_vm12, %v5567_v12, %v5566_v28  ;;  %v5580_v32 = vld [vmem:[#allocation46_spill] sm:$0xff] }
0x1686   : > { %v1248_v8 = vsel %vm1180_vm11, %v5563_v15, %v5562_v62  ;;  %v5583_v62 = vld [vmem:[#allocation104_spill] sm:$0xff]  ;;  %v5584_v15 = vld [vmem:[#allocation102_spill] sm:$0xff]  ;;  %vm2337_vm11 = vcmask 367616  }
0x1687   : > { %v1008_v53 = vadd.f32 %v1004_v22, %v985_v51  ;;  %v1271_v22 = vsel %vm1269_vm12, %v5471_v58, %v5564_v48  ;;  %v3349_v51 = vmov 71   ;;  %v5585_v48 = vld [vmem:[#allocation51_spill] sm:$0xff] }
0x1688   : > { %2996 = vset.pattern.permute.xlu0 %v3349_v51 }
0x1689   : > { %v1030_v56 = vadd.f32 %v1026_v10, %v1008_v53  ;;  %v1293_v10 = vsel %vm1269_vm12, %v5473_v6, %v5565_v45  ;;  %v1382_v6 = vsel %vm1358_vm13, %v5478_v39, %v5570_v17  ;;  %v5592_v17 = vld [vmem:[#allocation57_spill] sm:$0xff] }
0x168b   : > { %v1052_v41 = vadd.f32 %v1048_v46, %v1030_v56  ;;  %v5568_v56 = vld [vmem:[#allocation136_spill] sm:$0xff] }
0x168c   : > { %v1337_v20 = vsel %vm1269_vm12, %v5476_v34, %v5568_v56  ;;  %vm2426_vm12 = vcmask 359424  }
0x168d   : > { %v1074_v54 = vadd.f32 %v1070_v49, %v1052_v41  ;;  %v5569_v41 = vld [vmem:[#allocation90_spill] sm:$0xff] }
0x168e   : > { %v1360_v58 = vsel %vm1358_vm13, %v4353_v3, %v5569_v41  ;;  %v1449_v3 = vsel %vm1447_vm14, %v5576_v5, %v5575_v26  ;;  %v5597_v26 = vld [vmem:[#allocation64_spill] sm:$0xff]  ;;  %v5598_v5 = vld [vmem:[#allocation117_spill] sm:$0xff] }
0x168f   : > { %v1097_v30 = vadd.f32 %v1093_v25, %v1074_v54  ;;  %v1802_v54 = vpop.permute.xlu2 %1801 }
0x1691   : > { %v1119_v19 = vadd.f32 %v1115_v37, %v1097_v30  ;;  %v1404_v37 = vsel %vm1358_vm13, %v5572_v59, %v5571_v57  ;;  %v5593_v57 = vld [vmem:[#allocation114_spill] sm:$0xff] }
0x1692   : > { %v5594_v59 = vld [vmem:[#allocation58_spill] sm:$0xff] }
0x1693   : > { %v1141_v16 = vadd.f32 %v1137_v27, %v1119_v19  ;;  %v5574_v27 = vld [vmem:[#allocation95_spill] sm:$0xff] }
0x1694   : > { %v1426_v34 = vsel %vm1358_vm13, %v5574_v27, %v5573_v55  ;;  %v5595_v55 = vld [vmem:[#allocation63_spill] sm:$0xff]  ;;  %v5596_v27 = vld [vmem:[#allocation61_spill] sm:$0xff] }
0x1695   : > { %v1163_v44 = vadd.f32 %v1159_v33, %v1141_v16  ;;  %v5577_v16 = vld [vmem:[#allocation101_spill] sm:$0xff] }
0x1696   : > { %v1471_v39 = vsel %vm1447_vm14, %v5578_v18, %v5577_v16  ;;  %v5599_v16 = vld [vmem:[#allocation68_spill] sm:$0xff]  ;;  %v5600_v18 = vld [vmem:[#allocation121_spill] sm:$0xff] }
0x1697   : > { %v1186_v61 = vadd.f32 %v1182_v35, %v1163_v44  ;;  %v5579_v44 = vld [vmem:[#allocation133_spill] sm:$0xff] }
0x1698   : > { %v1493_v11 = vsel %vm1447_vm14, %v5580_v32, %v5579_v44  ;;  %v1738_v44 = vsel %vm5602_vm3, %v4638_v1, %v4647_v13 }
0x1699   : > { %v1208_v2 = vadd.f32 %v1204_v36, %v1186_v61  ;;  %v5581_v61 = vld [vmem:[#allocation48_spill] sm:$0xff] }
0x169b   : > { %v1230_v23 = vadd.f32 %v1226_v63, %v1208_v2  ;;  %v1515_v63 = vsel %vm1447_vm14, %v5582_v0, %v5581_v61 }
0x169d   : > { %v1252_v4 = vadd.f32 %v1248_v8, %v1230_v23  ;;  %v1538_v8 = vsel %vm1536_vm15, %v5584_v15, %v5583_v62  ;;  %v1782_v62 = vsel %vm5605_vm5, %v4664_v38, %v4679_v24  ;;  %v5607_v38 = vld [vmem:[#allocation32_spill] sm:$0xff] }
0x169f   : > { %v1275_v53 = vadd.f32 %v1271_v22, %v1252_v4  ;;  %v5586_v22 = vld [vmem:[#allocation49_spill] sm:$0xff] }
0x16a0   : > { %v1560_v51 = vsel %vm1536_vm15, %v5586_v22, %v5585_v48 }
0x16a1   : > { %v1297_v46 = vadd.f32 %v1293_v10, %v1275_v53  ;;  %v5587_v10 = vld [vmem:[#allocation52_spill] sm:$0xff]  ;;  %v5588_v53 = vld [vmem:[#allocation105_spill] sm:$0xff] }
0x16a2   : > { %v1582_v28 = vsel %vm1536_vm15, %v5588_v53, %v5587_v10  ;;  %v5606_v53 = vld [vmem:[#allocation34_spill] sm:$0xff] }
0x16a3   : > { %v1319_v49 = vadd.f32 %v1315_v7, %v1297_v46 }
0x16a5   : > { %v1341_v60 = vadd.f32 %v1337_v20, %v1319_v49  ;;  %v5589_v20 = vld [vmem:[#allocation55_spill] sm:$0xff]  ;;  %v5590_v49 = vld [vmem:[#allocation54_spill] sm:$0xff] }
0x16a6   : > { %v1604_v41 = vsel %vm1536_vm15, %v5590_v49, %v5589_v20  ;;  %v5610_v49 = vld [vmem:[#allocation24_spill] sm:$0xff] }
0x16a7   : > { %v1364_v25 = vadd.f32 %v1360_v58, %v1341_v60  ;;  %v5591_v60 = vld [vmem:[#allocation111_spill] sm:$0xff] }
0x16a9   : > { %v1386_v30 = vadd.f32 %v1382_v6, %v1364_v25  ;;  %v1627_v6 = vsel %vm1625_vm0, %v5592_v17, %v5591_v60 }
0x16ab   : > { %v1408_v19 = vadd.f32 %v1404_v37, %v1386_v30  ;;  %v1649_v37 = vsel %vm1625_vm0, %v5594_v59, %v5593_v57 }
0x16ad   : > { %v1430_v33 = vadd.f32 %v1426_v34, %v1408_v19  ;;  %v1671_v34 = vsel %vm1625_vm0, %v5596_v27, %v5595_v55  ;;  %v3353_v27 = vmov 74  }
0x16af   : > { %v1453_v47 = vadd.f32 %v1449_v3, %v1430_v33  ;;  %v1693_v3 = vsel %vm1625_vm0, %v5598_v5, %v5597_v26 }
0x16b1   : > { %v1475_v36 = vadd.f32 %v1471_v39, %v1453_v47  ;;  %v1716_v39 = vsel %vm5601_vm2, %v5600_v18, %v5599_v16 }
0x16b3   : > { %v1497_v2 = vadd.f32 %v1493_v11, %v1475_v36  ;;  %v5603_v36 = vld [vmem:[#allocation123_spill] sm:$0xff] }
0x16b4   : > { %v1760_v61 = vsel %vm5604_vm4, %v5603_v36, %v4662_v9  ;;  %v3350_v9 = vmov 72  }
0x16b5   : > { %v1519_v23 = vadd.f32 %v1515_v63, %v1497_v2  ;;  %2997 = vset.pattern.permute.xlu2 %v3350_v9 }
0x16b7   : > { %v1542_v4 = vadd.f32 %v1538_v8, %v1519_v23  ;;  %v1805_v8 = vsel %vm1803_vm1, %v4688_v43, %v1802_v54  ;;  %v5608_v43 = vld [vmem:[#allocation35_spill] sm:$0xff] }
0x16b8   : > { %v1823_v35 = vpop.permute.xlu2 %1822 }
0x16b9   : > { %v1564_v56 = vadd.f32 %v1560_v51, %v1542_v4 }
0x16bb   : > { %v1586_v58 = vadd.f32 %v1582_v28, %v1564_v56  ;;  %v5609_v56 = vld [vmem:[#allocation23_spill] sm:$0xff] }
0x16bd   : > { %v1608_v25 = vadd.f32 %v1604_v41, %v1586_v58  ;;  %v5611_v58 = vld [vmem:[#allocation28_spill] sm:$0xff] }
0x16bf   : > { %v1631_v30 = vadd.f32 %v1627_v6, %v1608_v25 }
0x16c0   : > { %v1834_v45 = vpop.permute.xlu2 %1833 }
0x16c1   : > { %v1836_v12 = vmul.f32 %v1834_v45, %v3688_v29  ;;  %v1837_v7 = vmul.f32 %v1834_v45, %v5492_v40  ;;  %v1838_v46 = vmul.f32 %v1834_v45, %v5493_v42  ;;  %v1653_v19 = vadd.f32 %v1649_v37, %v1631_v30 }
0x16c3   : > { %1846 = vrot.lane.b32.xlu2 %v1838_v46, %s3347_s25  ;;  %1842 = vrot.lane.b32.xlu0 %v1836_v12, %s3347_s25  ;;  %v1675_v33 = vadd.f32 %v1671_v34, %v1653_v19 }
0x16c4   : > { %1844 = vrot.lane.b32.xlu1 %v1837_v7, %s3347_s25 }
0x16c5   : > { %v1697_v47 = vadd.f32 %v1693_v3, %v1675_v33 }
0x16c7   : > { %v1720_v32 = vadd.f32 %v1716_v39, %v1697_v47  ;;  %v3354_v39 = vmov 75  }
0x16c9   : > { %v1742_v63 = vadd.f32 %v1738_v44, %v1720_v32 }
0x16cb   : > { %1855 = vperm.xlu0 %2996, %v3602_v21   ;;  %v1764_v15 = vadd.f32 %v1760_v61, %v1742_v63 }
0x16cd   : > { %v1786_v1 = vadd.f32 %v1782_v62, %v1764_v15 }
0x16cf   : > { %v1809_v13 = vadd.f32 %v1805_v8, %v1786_v1 }
0x16d0   : > { %v1821_v11 = vpop.permute.xlu1 %1820 }
0x16d1   : > { %v1826_v0 = vsel %vm1803_vm1, %v1821_v11, %v1823_v35 }
0x16d2   : > { %v1830_v2 = vadd.f32 %v1826_v0, %v4695_v50 }
0x16d8   : > { %v1825_v23 = vpop.permute.xlu1 %1824 }
0x16d9   : > { %v1827_v48 = vsel %vm1803_vm1, %v1823_v35, %v1825_v23  ;;  %v3351_v35 = vmov 73   ;;  %v3355_v23 = vmov 76  }
0x16da   : > { %v1831_v22 = vadd.f32 %v1827_v48, %v1809_v13  ;;  %2998 = vset.pattern.permute.xlu0 %v3351_v35 }
0x171d   : > { %v1847_v12 = vpop.permute.xlu2 %1846 }
0x1735   : > { %v1843_v51 = vpop.permute.xlu0 %1842 }
0x1736   : > { %v1845_v4 = vpop.permute.xlu1 %1844 }
0x1737   : > { %v1848_v50 = vsel %vm1803_vm1, %v1843_v51, %v1845_v4  ;;  %v1849_v57 = vsel %vm1803_vm1, %v1845_v4, %v1847_v12 }
0x1738   : > { %v1852_v45 = vadd.f32 %v1848_v50, %v1830_v2  ;;  %v1853_v59 = vadd.f32 %v1849_v57, %v1831_v22 }
0x173d   : > { %v1856_v10 = vpop.permute.xlu0 %1855 }
0x173e   : > { %v1858_v24 = vmul.f32 %v1856_v10, %v5606_v53  ;;  %v1859_v28 = vmul.f32 %v1856_v10, %v5607_v38  ;;  %v1860_v54 = vmul.f32 %v1856_v10, %v5608_v43 }
0x1740   : > { %1866 = vrot.lane.b32.xlu2 %v1859_v28, %s3347_s25  ;;  %1864 = vrot.lane.b32.xlu1 %v1858_v24, %s3347_s25  ;;  %v3356_v24 = vmov 77  }
0x1748   : > { %1877 = vperm.xlu2 %2997, %v3602_v21   ;;  %1868 = vrot.lane.b32.xlu1 %v1860_v54, %s3347_s25  ;;  %s3144_s25 = scalar_lea.hbm %s3143_s15, 16 }
0x1749   : > { %p3145_p5 = scmp.ne.s32.totalorder %s3143_s15, %s3144_s25 }
0x174b   : > { %p3146_p3 = pnand %p3145_p5, %p3526_p7 }
0x174d   : > { %p3147_p4 = pneg %p3146_p3 }
0x1750   : > { %2999 = vset.pattern.permute.xlu2 %v3353_v27 }
0x179a   : > { %v1867_v7 = vpop.permute.xlu2 %1866 }
0x17a2   : > { %v1878_v46 = vpop.permute.xlu2 %1877 }
0x17a3   : > { %v1880_v20 = vmul.f32 %v1878_v46, %v5609_v56  ;;  %v1881_v41 = vmul.f32 %v1878_v46, %v5610_v49  ;;  %v1882_v60 = vmul.f32 %v1878_v46, %v5611_v58 }
0x17a5   : > { %1890 = vrot.lane.b32.xlu2 %v1882_v60, %s3352_s27  ;;  %1886 = vrot.lane.b32.xlu0 %v1880_v20, %s3352_s27 }
0x17a6   : > { %1888 = vrot.lane.b32.xlu1 %v1881_v41, %s3352_s27 }
0x17ad   : > { %1900 = vperm.xlu0 %2998, %v3602_v21  }
0x17b2   : > { %v1865_v17 = vpop.permute.xlu1 %1864 }
0x17b3   : > { %v1870_v6 = vsel %vm1803_vm1, %v1865_v17, %v1867_v7 }
0x17b4   : > { %v1874_v25 = vadd.f32 %v1870_v6, %v1852_v45 }
0x17b5   : > { %3000 = vset.pattern.permute.xlu0 %v3354_v39 }
0x17ba   : > { %v1869_v37 = vpop.permute.xlu1 %1868 }
0x17bb   : > { %v1871_v30 = vsel %vm1803_vm1, %v1867_v7, %v1869_v37  ;;  %v3358_v37 = vmov 78  }
0x17bc   : > { %v1875_v55 = vadd.f32 %v1871_v30, %v1853_v59 }
0x17ff   : > { %v1891_v47 = vpop.permute.xlu2 %1890 }
0x1817   : > { %v1887_v34 = vpop.permute.xlu0 %1886 }
0x1818   : > { %v1889_v19 = vpop.permute.xlu1 %1888 }
0x1819   : > { %v1893_v26 = vsel %vm1892_vm6, %v1887_v34, %v1889_v19  ;;  %v1894_v62 = vsel %vm1892_vm6, %v1889_v19, %v1891_v47 }
0x181a   : > { %v1897_v5 = vadd.f32 %v1893_v26, %v1874_v25  ;;  %v1898_v15 = vadd.f32 %v1894_v62, %v1875_v55 }
0x181f   : > { %v1901_v3 = vpop.permute.xlu0 %1900 }
0x1820   : > { %v1903_v33 = vmul.f32 %v1901_v3, %v5487_v31  ;;  %v1904_v16 = vmul.f32 %v1901_v3, %v5488_v52  ;;  %v1905_v18 = vmul.f32 %v1901_v3, %v5489_v14 }
0x1822   : > { %1911 = vrot.lane.b32.xlu2 %v1904_v16, %s3352_s27  ;;  %1909 = vrot.lane.b32.xlu1 %v1903_v33, %s3352_s27  ;;  %v3359_v33 = vmov 79  }
0x182a   : > { %1922 = vperm.xlu2 %2999, %v3602_v21   ;;  %1913 = vrot.lane.b32.xlu1 %v1905_v18, %s3352_s27 }
0x1832   : > { %3001 = vset.pattern.permute.xlu2 %v3355_v23 }
0x187c   : > { %v1912_v44 = vpop.permute.xlu2 %1911 }
0x1884   : > { %v1923_v32 = vpop.permute.xlu2 %1922 }
0x1885   : > { %v1925_v11 = vmul.f32 %v1923_v32, %v3688_v29  ;;  %v1926_v36 = vmul.f32 %v1923_v32, %v5492_v40  ;;  %v1927_v61 = vmul.f32 %v1923_v32, %v5493_v42 }
0x1887   : > { %1935 = vrot.lane.b32.xlu2 %v1927_v61, %s3352_s27  ;;  %1931 = vrot.lane.b32.xlu0 %v1925_v11, %s3352_s27 }
0x1888   : > { %1933 = vrot.lane.b32.xlu1 %v1926_v36, %s3352_s27 }
0x188f   : > { %1944 = vperm.xlu0 %3000, %v3602_v21  }
0x1894   : > { %v1910_v0 = vpop.permute.xlu1 %1909 }
0x1895   : > { %v1915_v63 = vsel %vm1892_vm6, %v1910_v0, %v1912_v44 }
0x1896   : > { %v1919_v2 = vadd.f32 %v1915_v63, %v1897_v5 }
0x1897   : > { %3002 = vset.pattern.permute.xlu0 %v3356_v24 }
0x189c   : > { %v1914_v8 = vpop.permute.xlu1 %1913 }
0x189d   : > { %v1916_v1 = vsel %vm1892_vm6, %v1912_v44, %v1914_v8  ;;  %v3360_v8 = vmov 80  }
0x189e   : > { %v1920_v13 = vadd.f32 %v1916_v1, %v1898_v15 }
0x18e1   : > { %v1936_v28 = vpop.permute.xlu2 %1935 }
0x18f9   : > { %v1932_v48 = vpop.permute.xlu0 %1931 }
0x18fa   : > { %v1934_v22 = vpop.permute.xlu1 %1933 }
0x18fb   : > { %v1937_v9 = vsel %vm1892_vm6, %v1932_v48, %v1934_v22  ;;  %v1938_v17 = vsel %vm1892_vm6, %v1934_v22, %v1936_v28 }
0x18fc   : > { %v1941_v51 = vadd.f32 %v1937_v9, %v1919_v2  ;;  %v1942_v6 = vadd.f32 %v1938_v17, %v1920_v13 }
0x1901   : > { %v1945_v4 = vpop.permute.xlu0 %1944 }
0x1902   : > { %v1947_v50 = vmul.f32 %v1945_v4, %v5606_v53  ;;  %v1948_v45 = vmul.f32 %v1945_v4, %v5607_v38  ;;  %v1949_v10 = vmul.f32 %v1945_v4, %v5608_v43 }
0x1904   : > { %1955 = vrot.lane.b32.xlu2 %v1948_v45, %s3352_s27  ;;  %1953 = vrot.lane.b32.xlu1 %v1947_v50, %s3352_s27  ;;  %v3361_v50 = vmov 81  }
0x190c   : > { %1966 = vperm.xlu2 %3001, %v3602_v21   ;;  %1957 = vrot.lane.b32.xlu1 %v1949_v10, %s3352_s27 }
0x1914   : > { %3003 = vset.pattern.permute.xlu2 %v3358_v37 }
0x195e   : > { %v1956_v54 = vpop.permute.xlu2 %1955 }
0x1966   : > { %v1967_v35 = vpop.permute.xlu2 %1966 }
0x1967   : > { %v1969_v12 = vmul.f32 %v1967_v35, %v5609_v56  ;;  %v1970_v7 = vmul.f32 %v1967_v35, %v5610_v49  ;;  %v1971_v46 = vmul.f32 %v1967_v35, %v5611_v58 }
0x1969   : > { %1979 = vrot.lane.b32.xlu2 %v1971_v46, %s3357_s28  ;;  %1975 = vrot.lane.b32.xlu0 %v1969_v12, %s3357_s28 }
0x196a   : > { %1977 = vrot.lane.b32.xlu1 %v1970_v7, %s3357_s28 }
0x1971   : > { %1989 = vperm.xlu0 %3002, %v3602_v21  }
0x1976   : > { %v1954_v20 = vpop.permute.xlu1 %1953 }
0x1977   : > { %v1959_v41 = vsel %vm1892_vm6, %v1954_v20, %v1956_v54 }
0x1978   : > { %v1963_v60 = vadd.f32 %v1959_v41, %v1941_v51 }
0x1979   : > { %3004 = vset.pattern.permute.xlu0 %v3359_v33 }
0x197e   : > { %v1958_v25 = vpop.permute.xlu1 %1957 }
0x197f   : > { %v1960_v57 = vsel %vm1892_vm6, %v1956_v54, %v1958_v25  ;;  %v3363_v25 = vmov 82  }
0x1980   : > { %v1964_v59 = vadd.f32 %v1960_v57, %v1942_v6 }
0x19c3   : > { %v1980_v16 = vpop.permute.xlu2 %1979 }
0x19db   : > { %v1976_v30 = vpop.permute.xlu0 %1975 }
0x19dc   : > { %v1978_v55 = vpop.permute.xlu1 %1977 }
0x19dd   : > { %v1982_v27 = vsel %vm1981_vm7, %v1976_v30, %v1978_v55  ;;  %v1983_v0 = vsel %vm1981_vm7, %v1978_v55, %v1980_v16 }
0x19de   : > { %v1986_v34 = vadd.f32 %v1982_v27, %v1963_v60  ;;  %v1987_v63 = vadd.f32 %v1983_v0, %v1964_v59 }
0x19e3   : > { %v1990_v19 = vpop.permute.xlu0 %1989 }
0x19e4   : > { %v1992_v26 = vmul.f32 %v1990_v19, %v5487_v31  ;;  %v1993_v5 = vmul.f32 %v1990_v19, %v5488_v52  ;;  %v1994_v3 = vmul.f32 %v1990_v19, %v5489_v14 }
0x19e6   : > { %2000 = vrot.lane.b32.xlu2 %v1993_v5, %s3357_s28  ;;  %1998 = vrot.lane.b32.xlu1 %v1992_v26, %s3357_s28  ;;  %v3364_v26 = vmov 83  }
0x19ee   : > { %2011 = vperm.xlu2 %3003, %v3602_v21   ;;  %2002 = vrot.lane.b32.xlu1 %v1994_v3, %s3357_s28 }
0x19f6   : > { %3005 = vset.pattern.permute.xlu2 %v3360_v8 }
0x1a40   : > { %v2001_v18 = vpop.permute.xlu2 %2000 }
0x1a48   : > { %v2012_v39 = vpop.permute.xlu2 %2011 }
0x1a49   : > { %v2014_v47 = vmul.f32 %v2012_v39, %v3688_v29  ;;  %v2015_v44 = vmul.f32 %v2012_v39, %v5492_v40  ;;  %v2016_v32 = vmul.f32 %v2012_v39, %v5493_v42 }
0x1a4b   : > { %2024 = vrot.lane.b32.xlu2 %v2016_v32, %s3357_s28  ;;  %2020 = vrot.lane.b32.xlu0 %v2014_v47, %s3357_s28 }
0x1a4c   : > { %2022 = vrot.lane.b32.xlu1 %v2015_v44, %s3357_s28 }
0x1a53   : > { %2033 = vperm.xlu0 %3004, %v3602_v21  }
0x1a58   : > { %v1999_v11 = vpop.permute.xlu1 %1998 }
0x1a59   : > { %v2004_v36 = vsel %vm1981_vm7, %v1999_v11, %v2001_v18 }
0x1a5a   : > { %v2008_v61 = vadd.f32 %v2004_v36, %v1986_v34 }
0x1a5b   : > { %3006 = vset.pattern.permute.xlu0 %v3361_v50 }
0x1a60   : > { %v2003_v2 = vpop.permute.xlu1 %2002 }
0x1a61   : > { %v2005_v62 = vsel %vm1981_vm7, %v2001_v18, %v2003_v2  ;;  %v3365_v2 = vmov 84  }
0x1a62   : > { %v2009_v15 = vadd.f32 %v2005_v62, %v1987_v63 }
0x1aa5   : > { %v2025_v45 = vpop.permute.xlu2 %2024 }
0x1abd   : > { %v2021_v1 = vpop.permute.xlu0 %2020 }
0x1abe   : > { %v2023_v13 = vpop.permute.xlu1 %2022 }
0x1abf   : > { %v2026_v23 = vsel %vm1981_vm7, %v2021_v1, %v2023_v13  ;;  %v2027_v20 = vsel %vm1981_vm7, %v2023_v13, %v2025_v45 }
0x1ac0   : > { %v2030_v48 = vadd.f32 %v2026_v23, %v2008_v61  ;;  %v2031_v41 = vadd.f32 %v2027_v20, %v2009_v15 }
0x1ac5   : > { %v2034_v22 = vpop.permute.xlu0 %2033 }
0x1ac6   : > { %v2036_v9 = vmul.f32 %v2034_v22, %v5606_v53  ;;  %v2037_v51 = vmul.f32 %v2034_v22, %v5607_v38  ;;  %v2038_v4 = vmul.f32 %v2034_v22, %v5608_v43 }
0x1ac8   : > { %2044 = vrot.lane.b32.xlu2 %v2037_v51, %s3357_s28  ;;  %2042 = vrot.lane.b32.xlu1 %v2036_v9, %s3357_s28  ;;  %v3366_v9 = vmov 85  }
0x1ad0   : > { %2055 = vperm.xlu2 %3005, %v3602_v21   ;;  %2046 = vrot.lane.b32.xlu1 %v2038_v4, %s3357_s28 }
0x1ad8   : > { %3007 = vset.pattern.permute.xlu2 %v3363_v25 }
0x1b22   : > { %v2045_v10 = vpop.permute.xlu2 %2044 }
0x1b2a   : > { %v2056_v24 = vpop.permute.xlu2 %2055 }
0x1b2b   : > { %v2058_v28 = vmul.f32 %v2056_v24, %v5609_v56  ;;  %v2059_v54 = vmul.f32 %v2056_v24, %v5610_v49  ;;  %v2060_v35 = vmul.f32 %v2056_v24, %v5611_v58 }
0x1b2d   : > { %2068 = vrot.lane.b32.xlu2 %v2060_v35, %s3362_s30  ;;  %2064 = vrot.lane.b32.xlu0 %v2058_v28, %s3362_s30 }
0x1b2e   : > { %2066 = vrot.lane.b32.xlu1 %v2059_v54, %s3362_s30 }
0x1b35   : > { %2078 = vperm.xlu0 %3006, %v3602_v21  }
0x1b3a   : > { %v2043_v12 = vpop.permute.xlu1 %2042 }
0x1b3b   : > { %v2048_v7 = vsel %vm1981_vm7, %v2043_v12, %v2045_v10 }
0x1b3c   : > { %v2052_v46 = vadd.f32 %v2048_v7, %v2030_v48 }
0x1b3d   : > { %3008 = vset.pattern.permute.xlu0 %v3364_v26 }
0x1b42   : > { %v2047_v60 = vpop.permute.xlu1 %2046 }
0x1b43   : > { %v2049_v17 = vsel %vm1981_vm7, %v2045_v10, %v2047_v60  ;;  %v3368_v60 = vmov 86  }
0x1b44   : > { %v2053_v6 = vadd.f32 %v2049_v17, %v2031_v41 }
0x1b87   : > { %v2069_v5 = vpop.permute.xlu2 %2068 }
0x1b9f   : > { %v2065_v57 = vpop.permute.xlu0 %2064 }
0x1ba0   : > { %v2067_v59 = vpop.permute.xlu1 %2066 }
0x1ba1   : > { %v2071_v37 = vsel %vm2070_vm8, %v2065_v57, %v2067_v59  ;;  %v2072_v11 = vsel %vm2070_vm8, %v2067_v59, %v2069_v5 }
0x1ba2   : > { %v2075_v30 = vadd.f32 %v2071_v37, %v2052_v46  ;;  %v2076_v36 = vadd.f32 %v2072_v11, %v2053_v6 }
0x1ba7   : > { %v2079_v55 = vpop.permute.xlu0 %2078 }
0x1ba8   : > { %v2081_v27 = vmul.f32 %v2079_v55, %v5487_v31  ;;  %v2082_v34 = vmul.f32 %v2079_v55, %v5488_v52  ;;  %v2083_v19 = vmul.f32 %v2079_v55, %v5489_v14 }
0x1baa   : > { %2089 = vrot.lane.b32.xlu2 %v2082_v34, %s3362_s30  ;;  %2087 = vrot.lane.b32.xlu1 %v2081_v27, %s3362_s30  ;;  %v3369_v27 = vmov 87  }
0x1bb2   : > { %2100 = vperm.xlu2 %3007, %v3602_v21   ;;  %2091 = vrot.lane.b32.xlu1 %v2083_v19, %s3362_s30 }
0x1bba   : > { %3009 = vset.pattern.permute.xlu2 %v3365_v2 }
0x1c04   : > { %v2090_v3 = vpop.permute.xlu2 %2089 }
0x1c0c   : > { %v2101_v33 = vpop.permute.xlu2 %2100 }
0x1c0d   : > { %v2103_v16 = vmul.f32 %v2101_v33, %v3688_v29  ;;  %v2104_v18 = vmul.f32 %v2101_v33, %v5492_v40  ;;  %v2105_v39 = vmul.f32 %v2101_v33, %v5493_v42 }
0x1c0f   : > { %2113 = vrot.lane.b32.xlu2 %v2105_v39, %s3362_s30  ;;  %2109 = vrot.lane.b32.xlu0 %v2103_v16, %s3362_s30 }
0x1c10   : > { %2111 = vrot.lane.b32.xlu1 %v2104_v18, %s3362_s30 }
0x1c17   : > { %2122 = vperm.xlu0 %3008, %v3602_v21  }
0x1c1c   : > { %v2088_v47 = vpop.permute.xlu1 %2087 }
0x1c1d   : > { %v2093_v44 = vsel %vm2070_vm8, %v2088_v47, %v2090_v3 }
0x1c1e   : > { %v2097_v32 = vadd.f32 %v2093_v44, %v2075_v30 }
0x1c1f   : > { %3010 = vset.pattern.permute.xlu0 %v3366_v9 }
0x1c24   : > { %v2092_v61 = vpop.permute.xlu1 %2091 }
0x1c25   : > { %v2094_v0 = vsel %vm2070_vm8, %v2090_v3, %v2092_v61  ;;  %v3370_v61 = vmov 88  }
0x1c26   : > { %v2098_v63 = vadd.f32 %v2094_v0, %v2076_v36 }
0x1c69   : > { %v2114_v51 = vpop.permute.xlu2 %2113 }
0x1c81   : > { %v2110_v62 = vpop.permute.xlu0 %2109 }
0x1c82   : > { %v2112_v15 = vpop.permute.xlu1 %2111 }
0x1c83   : > { %v2115_v8 = vsel %vm2070_vm8, %v2110_v62, %v2112_v15  ;;  %v2116_v12 = vsel %vm2070_vm8, %v2112_v15, %v2114_v51 }
0x1c84   : > { %v2119_v1 = vadd.f32 %v2115_v8, %v2097_v32  ;;  %v2120_v7 = vadd.f32 %v2116_v12, %v2098_v63 }
0x1c89   : > { %v2123_v13 = vpop.permute.xlu0 %2122 }
0x1c8a   : > { %v2125_v23 = vmul.f32 %v2123_v13, %v5606_v53  ;;  %v2126_v48 = vmul.f32 %v2123_v13, %v5607_v38  ;;  %v2127_v22 = vmul.f32 %v2123_v13, %v5608_v43 }
0x1c8c   : > { %2133 = vrot.lane.b32.xlu2 %v2126_v48, %s3362_s30  ;;  %2131 = vrot.lane.b32.xlu1 %v2125_v23, %s3362_s30  ;;  %v3371_v23 = vmov 89  }
0x1c94   : > { %2144 = vperm.xlu2 %3009, %v3602_v21   ;;  %2135 = vrot.lane.b32.xlu1 %v2127_v22, %s3362_s30  ;;  %s3148_s30 = scalar_lea.hbm %s5614_s6, 64 }
0x1c95   : > { %p3150_p9 = scmp.lt.s32.totalorder %s3148_s30, %s3144_s25 }
0x1c97   : > { %p3151_p12 = por %p3150_p9, %p3149_p8 }
0x1c99   : > { %p3152_p2 = pnand %p3151_p12, %p3147_p4 }
0x1c9c   : > { %3011 = vset.pattern.permute.xlu2 %v3368_v60 }
0x1ce6   : > { %v2134_v4 = vpop.permute.xlu2 %2133 }
0x1cee   : > { %v2145_v50 = vpop.permute.xlu2 %2144 }
0x1cef   : > { %v2147_v45 = vmul.f32 %v2145_v50, %v5609_v56  ;;  %v2148_v10 = vmul.f32 %v2145_v50, %v5610_v49  ;;  %v2149_v24 = vmul.f32 %v2145_v50, %v5611_v58 }
0x1cf1   : > { %2157 = vrot.lane.b32.xlu2 %v2149_v24, %s3367_s23  ;;  %2153 = vrot.lane.b32.xlu0 %v2147_v45, %s3367_s23 }
0x1cf2   : > { %2155 = vrot.lane.b32.xlu1 %v2148_v10, %s3367_s23 }
0x1cf9   : > { %2167 = vperm.xlu0 %3010, %v3602_v21  }
0x1cfe   : > { %v2132_v28 = vpop.permute.xlu1 %2131 }
0x1cff   : > { %v2137_v54 = vsel %vm2070_vm8, %v2132_v28, %v2134_v4 }
0x1d00   : > { %v2141_v35 = vadd.f32 %v2137_v54, %v2119_v1 }
0x1d01   : > { %3012 = vset.pattern.permute.xlu0 %v3369_v27 }
0x1d06   : > { %v2136_v46 = vpop.permute.xlu1 %2135 }
0x1d07   : > { %v2138_v20 = vsel %vm2070_vm8, %v2134_v4, %v2136_v46  ;;  %v3373_v46 = vmov 90  }
0x1d08   : > { %v2142_v41 = vadd.f32 %v2138_v20, %v2120_v7 }
0x1d4b   : > { %v2158_v34 = vpop.permute.xlu2 %2157 }
0x1d63   : > { %v2154_v17 = vpop.permute.xlu0 %2153 }
0x1d64   : > { %v2156_v6 = vpop.permute.xlu1 %2155 }
0x1d65   : > { %v2160_v25 = vsel %vm2159_vm9, %v2154_v17, %v2156_v6  ;;  %v2161_v47 = vsel %vm2159_vm9, %v2156_v6, %v2158_v34 }
0x1d66   : > { %v2164_v57 = vadd.f32 %v2160_v25, %v2141_v35  ;;  %v2165_v44 = vadd.f32 %v2161_v47, %v2142_v41 }
0x1d6b   : > { %v2168_v59 = vpop.permute.xlu0 %2167 }
0x1d6c   : > { %v2170_v37 = vmul.f32 %v2168_v59, %v5487_v31  ;;  %v2171_v30 = vmul.f32 %v2168_v59, %v5488_v52  ;;  %v2172_v55 = vmul.f32 %v2168_v59, %v5489_v14 }
0x1d6e   : > { %2178 = vrot.lane.b32.xlu2 %v2171_v30, %s3367_s23  ;;  %2176 = vrot.lane.b32.xlu1 %v2170_v37, %s3367_s23  ;;  %v3374_v37 = vmov 91  }
0x1d76   : > { %2189 = vperm.xlu2 %3011, %v3602_v21   ;;  %2180 = vrot.lane.b32.xlu1 %v2172_v55, %s3367_s23 }
0x1d7e   : > { %3013 = vset.pattern.permute.xlu2 %v3370_v61 }
0x1dc8   : > { %v2179_v19 = vpop.permute.xlu2 %2178 }
0x1dd0   : > { %v2190_v26 = vpop.permute.xlu2 %2189 }
0x1dd1   : > { %v2192_v5 = vmul.f32 %v2190_v26, %v3688_v29  ;;  %v2193_v3 = vmul.f32 %v2190_v26, %v5492_v40  ;;  %v2194_v33 = vmul.f32 %v2190_v26, %v5493_v42 }
0x1dd3   : > { %2202 = vrot.lane.b32.xlu2 %v2194_v33, %s3367_s23  ;;  %2198 = vrot.lane.b32.xlu0 %v2192_v5, %s3367_s23 }
0x1dd4   : > { %2200 = vrot.lane.b32.xlu1 %v2193_v3, %s3367_s23 }
0x1ddb   : > { %2211 = vperm.xlu0 %3012, %v3602_v21  }
0x1de0   : > { %v2177_v16 = vpop.permute.xlu1 %2176 }
0x1de1   : > { %v2182_v18 = vsel %vm2159_vm9, %v2177_v16, %v2179_v19 }
0x1de2   : > { %v2186_v39 = vadd.f32 %v2182_v18, %v2164_v57 }
0x1de3   : > { %3014 = vset.pattern.permute.xlu0 %v3371_v23  ;;  %v3379_v23 = vmov 97  }
0x1de8   : > { %v2181_v32 = vpop.permute.xlu1 %2180 }
0x1de9   : > { %v2183_v11 = vsel %vm2159_vm9, %v2179_v19, %v2181_v32  ;;  %v3375_v32 = vmov 92  }
0x1dea   : > { %v2187_v36 = vadd.f32 %v2183_v11, %v2165_v44  ;;  %v3376_v11 = vmov 93  }
0x1deb   : > { %3018 = vset.pattern.permute.xlu1 %v3376_v11 }
0x1e2d   : > { %v2203_v48 = vpop.permute.xlu2 %2202 }
0x1e45   : > { %v2199_v0 = vpop.permute.xlu0 %2198 }
0x1e46   : > { %v2201_v63 = vpop.permute.xlu1 %2200 }
0x1e47   : > { %v2204_v2 = vsel %vm2159_vm9, %v2199_v0, %v2201_v63  ;;  %v2205_v28 = vsel %vm2159_vm9, %v2201_v63, %v2203_v48  ;;  %v3380_v48 = vmov 98  }
0x1e48   : > { %v2208_v62 = vadd.f32 %v2204_v2, %v2186_v39  ;;  %v2209_v54 = vadd.f32 %v2205_v28, %v2187_v36 }
0x1e4d   : > { %v2212_v15 = vpop.permute.xlu0 %2211 }
0x1e4e   : > { %v2214_v8 = vmul.f32 %v2212_v15, %v5606_v53  ;;  %v2215_v1 = vmul.f32 %v2212_v15, %v5607_v38  ;;  %v2216_v13 = vmul.f32 %v2212_v15, %v5608_v43 }
0x1e50   : > { %2222 = vrot.lane.b32.xlu2 %v2215_v1, %s3367_s23  ;;  %2220 = vrot.lane.b32.xlu1 %v2214_v8, %s3367_s23  ;;  %v3377_v1 = vmov 94  }
0x1e58   : > { %2233 = vperm.xlu2 %3013, %v3602_v21   ;;  %2224 = vrot.lane.b32.xlu1 %v2216_v13, %s3367_s23  ;;  %v3378_v13 = vmov 96  }
0x1e60   : > { %3015 = vset.pattern.permute.xlu2 %v3373_v46 }
0x1eaa   : > { %v2223_v22 = vpop.permute.xlu2 %2222 }
0x1eb2   : > { %v2234_v9 = vpop.permute.xlu2 %2233 }
0x1eb3   : > { %v2236_v51 = vmul.f32 %v2234_v9, %v5609_v56  ;;  %v2237_v4 = vmul.f32 %v2234_v9, %v5610_v49  ;;  %v2238_v50 = vmul.f32 %v2234_v9, %v5611_v58  ;;  %v3382_v9 = vmov 95  }
0x1eb5   : > { %2246 = vrot.lane.b32.xlu2 %v2238_v50, %s3372_s24  ;;  %2242 = vrot.lane.b32.xlu0 %v2236_v51, %s3372_s24 }
0x1eb6   : > { %2244 = vrot.lane.b32.xlu1 %v2237_v4, %s3372_s24 }
0x1ebd   : > { %2256 = vperm.xlu0 %3014, %v3602_v21  }
0x1ec2   : > { %v2221_v45 = vpop.permute.xlu1 %2220 }
0x1ec3   : > { %v2226_v10 = vsel %vm2159_vm9, %v2221_v45, %v2223_v22 }
0x1ec4   : > { %v2230_v24 = vadd.f32 %v2226_v10, %v2208_v62 }
0x1ec5   : > { %3016 = vset.pattern.permute.xlu0 %v3374_v37 }
0x1eca   : > { %v2225_v35 = vpop.permute.xlu1 %2224 }
0x1ecb   : > { %v2227_v12 = vsel %vm2159_vm9, %v2223_v22, %v2225_v35  ;;  %v3381_v22 = vmov 99  }
0x1ecc   : > { %v2231_v7 = vadd.f32 %v2227_v12, %v2209_v54 }
0x1f0f   : > { %v2247_v30 = vpop.permute.xlu2 %2246 }
0x1f27   : > { %v2243_v20 = vpop.permute.xlu0 %2242 }
0x1f28   : > { %v2245_v41 = vpop.permute.xlu1 %2244 }
0x1f29   : > { %v2249_v60 = vsel %vm2248_vm10, %v2243_v20, %v2245_v41  ;;  %v2250_v16 = vsel %vm2248_vm10, %v2245_v41, %v2247_v30 }
0x1f2a   : > { %v2253_v17 = vadd.f32 %v2249_v60, %v2230_v24  ;;  %v2254_v18 = vadd.f32 %v2250_v16, %v2231_v7 }
0x1f2f   : > { %v2257_v6 = vpop.permute.xlu0 %2256 }
0x1f30   : > { %v2259_v25 = vmul.f32 %v2257_v6, %v5487_v31  ;;  %v2260_v57 = vmul.f32 %v2257_v6, %v5488_v52  ;;  %v2261_v59 = vmul.f32 %v2257_v6, %v5489_v14 }
0x1f32   : > { %2267 = vrot.lane.b32.xlu2 %v2260_v57, %s3372_s24  ;;  %2265 = vrot.lane.b32.xlu1 %v2259_v25, %s3372_s24 }
0x1f3a   : > { %2278 = vperm.xlu2 %3015, %v3602_v21   ;;  %2269 = vrot.lane.b32.xlu1 %v2261_v59, %s3372_s24 }
0x1f42   : > { %3017 = vset.pattern.permute.xlu2 %v3375_v32 }
0x1f8c   : > { %v2268_v55 = vpop.permute.xlu2 %2267 }
0x1f94   : > { %v2279_v27 = vpop.permute.xlu2 %2278 }
0x1f95   : > { %v2281_v34 = vmul.f32 %v2279_v27, %v3688_v29  ;;  %v2282_v19 = vmul.f32 %v2279_v27, %v5492_v40  ;;  %v2283_v26 = vmul.f32 %v2279_v27, %v5493_v42 }
0x1f97   : > { %2291 = vrot.lane.b32.xlu2 %v2283_v26, %s3372_s24  ;;  %2287 = vrot.lane.b32.xlu0 %v2281_v34, %s3372_s24 }
0x1f98   : > { %2289 = vrot.lane.b32.xlu1 %v2282_v19, %s3372_s24 }
0x1f9f   : > { %2300 = vperm.xlu0 %3016, %v3602_v21  }
0x1fa4   : > { %v2266_v5 = vpop.permute.xlu1 %2265 }
0x1fa5   : > { %v2271_v3 = vsel %vm2248_vm10, %v2266_v5, %v2268_v55 }
0x1fa6   : > { %v2275_v33 = vadd.f32 %v2271_v3, %v2253_v17 }
0x1fa7   : > { %3020 = vset.pattern.permute.xlu0 %v3382_v9 }
0x1fac   : > { %v2270_v39 = vpop.permute.xlu1 %2269 }
0x1fad   : > { %v2272_v47 = vsel %vm2248_vm10, %v2268_v55, %v2270_v39 }
0x1fae   : > { %v2276_v44 = vadd.f32 %v2272_v47, %v2254_v18 }
0x1ff1   : > { %v2292_v51 = vpop.permute.xlu2 %2291 }
0x2009   : > { %v2288_v36 = vpop.permute.xlu0 %2287 }
0x200a   : > { %v2290_v61 = vpop.permute.xlu1 %2289 }
0x200b   : > { %v2293_v0 = vsel %vm2248_vm10, %v2288_v36, %v2290_v61  ;;  %v2294_v12 = vsel %vm2248_vm10, %v2290_v61, %v2292_v51 }
0x200c   : > { %v2297_v63 = vadd.f32 %v2293_v0, %v2275_v33  ;;  %v2298_v7 = vadd.f32 %v2294_v12, %v2276_v44 }
0x2011   : > { %v2301_v2 = vpop.permute.xlu0 %2300 }
0x2012   : > { %v2303_v62 = vmul.f32 %v2301_v2, %v5606_v53  ;;  %v2304_v15 = vmul.f32 %v2301_v2, %v5607_v38  ;;  %v2305_v8 = vmul.f32 %v2301_v2, %v5608_v43 }
0x2014   : > { %2311 = vrot.lane.b32.xlu2 %v2304_v15, %s3372_s24  ;;  %2309 = vrot.lane.b32.xlu1 %v2303_v62, %s3372_s24 }
0x201c   : > { %2322 = vperm.xlu2 %3017, %v3602_v21   ;;  %2313 = vrot.lane.b32.xlu1 %v2305_v8, %s3372_s24 }
0x2024   : > { %3019 = vset.pattern.permute.xlu2 %v3377_v1  ;;  %2345 = vperm.xlu1 %3018, %v3602_v21  }
0x2025   : > { %2367 = vperm.xlu2 %3019, %v3602_v21  }
0x202c   : > { %3021 = vset.pattern.permute.xlu1 %v3378_v13 }
0x202d   : > { %3022 = vset.pattern.permute.xlu2 %v3379_v23  ;;  %2411 = vperm.xlu1 %3021, %v3602_v21  }
0x202e   : > { %2434 = vperm.xlu2 %3022, %v3602_v21  }
0x2035   : > { %3023 = vset.pattern.permute.xlu1 %v3380_v48 }
0x2036   : > { %3024 = vset.pattern.permute.xlu2 %v3381_v22  ;;  %2456 = vperm.xlu1 %3023, %v3602_v21  }
0x2037   : > { %2478 = vperm.xlu2 %3024, %v3602_v21  }
0x206e   : > { %v2312_v4 = vpop.permute.xlu2 %2311 }
0x2076   : > { %v2323_v50 = vpop.permute.xlu2 %2322 }
0x2077   : > { %v2325_v45 = vmul.f32 %v2323_v50, %v5609_v56  ;;  %v2327_v10 = vmul.f32 %v2323_v50, %v5611_v58  ;;  %v2326_v28 = vmul.f32 %v2323_v50, %v5610_v49 }
0x2079   : > { %2331 = vrot.lane.b32.xlu0 %v2325_v45, %s3383_s11  ;;  %2335 = vrot.lane.b32.xlu1 %v2327_v10, %s3383_s11 }
0x207f   : > { %v2368_v25 = vpop.permute.xlu2 %2367 }
0x2080   : > { %v2371_v57 = vmul.f32 %v2368_v25, %v5492_v40  ;;  %v2372_v59 = vmul.f32 %v2368_v25, %v5493_v42  ;;  %v2370_v37 = vmul.f32 %v2368_v25, %v3688_v29 }
0x2081   : > { %2389 = vperm.xlu0 %3020, %v3602_v21  }
0x2086   : > { %v2310_v24 = vpop.permute.xlu1 %2309 }
0x2087   : > { %v2315_v54 = vsel %vm2248_vm10, %v2310_v24, %v2312_v4 }
0x2088   : > { %v2319_v35 = vadd.f32 %v2315_v54, %v2297_v63  ;;  %v2435_v47 = vpop.permute.xlu2 %2434 }
0x2089   : > { %2333 = vrot.lane.b32.xlu0 %v2326_v28, %s3383_s11  ;;  %v2438_v44 = vmul.f32 %v2435_v47, %v5488_v52  ;;  %v2439_v32 = vmul.f32 %v2435_v47, %v5489_v14  ;;  %v2437_v11 = vmul.f32 %v2435_v47, %v5487_v31 }
0x208a   : > { %3025 = vset.pattern.permute.xlu0 %v3381_v22 }
0x208e   : > { %v2314_v46 = vpop.permute.xlu1 %2313 }
0x208f   : > { %v2316_v20 = vsel %vm2248_vm10, %v2312_v4, %v2314_v46 }
0x2090   : > { %v5106_v41 = vadd.f32 %v2316_v20, %v2298_v7 }
0x2091   : > { %v2479_v61 = vpop.permute.xlu2 %2478 }
0x2096   : > { %v2346_v60 = vpop.permute.xlu1 %2345 }
0x2097   : > { %v2348_v21 = vmul.f32 %v2346_v60, %v5487_v31  ;;  %v2349_v17 = vmul.f32 %v2346_v60, %v5488_v52  ;;  %v2350_v6 = vmul.f32 %v2346_v60, %v5489_v14  ;;  %v2482_v52 = vmul.f32 %v2479_v61, %v5607_v38 }
0x2098   : > { %v2483_v14 = vmul.f32 %v2479_v61, %v5608_v43  ;;  %v2481_v31 = vmul.f32 %v2479_v61, %v5606_v53 }
0x2099   : > { %2358 = vrot.lane.b32.xlu1 %v2350_v6, %s3383_s11  ;;  %2356 = vrot.lane.b32.xlu0 %v2349_v17, %s3383_s11 }
0x209a   : > { %2354 = vrot.lane.b32.xlu2 %v2348_v21, %s3383_s11 }
0x209f   : > { %v2412_v26 = vpop.permute.xlu1 %2411 }
0x20a0   : > { %v2415_v3 = vmul.f32 %v2412_v26, %v5610_v49  ;;  %v2416_v33 = vmul.f32 %v2412_v26, %v5611_v58  ;;  %v2414_v18 = vmul.f32 %v2412_v26, %v5609_v56 }
0x20a1   : > { %2380 = vrot.lane.b32.xlu1 %v2372_v59, %s3383_s11  ;;  %2378 = vrot.lane.b32.xlu0 %v2371_v57, %s3383_s11 }
0x20a2   : > { %2376 = vrot.lane.b32.xlu2 %v2370_v37, %s3383_s11 }
0x20a8   : > { %v2457_v49 = vpop.permute.xlu1 %2456 }
0x20a9   : > { %v2460_v58 = vmul.f32 %v2457_v49, %v5492_v40  ;;  %v2461_v56 = vmul.f32 %v2457_v49, %v5493_v42  ;;  %v2459_v36 = vmul.f32 %v2457_v49, %v3688_v29 }
0x20eb   : > { %v2332_v30 = vpop.permute.xlu0 %2331  ;;  %v2336_v63 = vpop.permute.xlu1 %2335 }
0x20f3   : > { %v2390_v55 = vpop.permute.xlu0 %2389 }
0x20f4   : > { %v2392_v27 = vmul.f32 %v2390_v55, %v5606_v53  ;;  %v2393_v34 = vmul.f32 %v2390_v55, %v5607_v38  ;;  %v2394_v19 = vmul.f32 %v2390_v55, %v5608_v43  ;;  %v2355_v0 = vpop.permute.xlu2 %2354 }
0x20f6   : > { %2402 = vrot.lane.b32.xlu1 %v2394_v19, %s3383_s11  ;;  %2400 = vrot.lane.b32.xlu0 %v2393_v34, %s3383_s11 }
0x20f7   : > { %2398 = vrot.lane.b32.xlu2 %v2392_v27, %s3383_s11 }
0x20fb   : > { %v2334_v5 = vpop.permute.xlu0 %2333 }
0x20fc   : > { %v2338_v16 = vsel %vm2337_vm11, %v2332_v30, %v2334_v5  ;;  %v2377_v42 = vpop.permute.xlu2 %2376  ;;  %v2339_v53 = vsel %vm2337_vm11, %v2334_v5, %v2336_v63 }
0x20fd   : > { %v2342_v39 = vadd.f32 %v2338_v16, %v2319_v35  ;;  %v2343_v4 = vadd.f32 %v2339_v53, %v5106_v41 }
0x20fe   : > { %2424 = vrot.lane.b32.xlu1 %v2416_v33, %s3384_s9  ;;  %2422 = vrot.lane.b32.xlu0 %v2415_v3, %s3384_s9 }
0x20ff   : > { %2420 = vrot.lane.b32.xlu2 %v2414_v18, %s3384_s9 }
0x2106   : > { %2447 = vrot.lane.b32.xlu1 %v2439_v32, %s3384_s9  ;;  %2445 = vrot.lane.b32.xlu0 %v2438_v44, %s3384_s9  ;;  %v5612_v32 = vld [vmem:[#allocation21_spill] sm:$0xff] }
0x2107   : > { %2443 = vrot.lane.b32.xlu2 %v2437_v11, %s3384_s9  ;;  %v5613_v11 = vld [vmem:[#allocation22_spill] sm:$0xff] }
0x2108   : > { %v2499_v49 = vadd.f32 %v5613_v11, %v5612_v32 }
0x210b   : > { %v2357_v40 = vpop.permute.xlu0 %2356  ;;  %v2359_v2 = vpop.permute.xlu1 %2358 }
0x210c   : > { %v2360_v9 = vsel %vm2337_vm11, %v2355_v0, %v2357_v40  ;;  %v2361_v51 = vsel %vm2337_vm11, %v2357_v40, %v2359_v2 }
0x210d   : > { %v2364_v24 = vadd.f32 %v2360_v9, %v2342_v39  ;;  %v2365_v28 = vadd.f32 %v2361_v51, %v2343_v4 }
0x210e   : > { %2469 = vrot.lane.b32.xlu1 %v2461_v56, %s3384_s9  ;;  %2467 = vrot.lane.b32.xlu0 %v2460_v58, %s3384_s9 }
0x210f   : > { %2465 = vrot.lane.b32.xlu2 %v2459_v36, %s3384_s9 }
0x2113   : > { %v2379_v29 = vpop.permute.xlu0 %2378  ;;  %v2381_v15 = vpop.permute.xlu1 %2380 }
0x2114   : > { %v2382_v50 = vsel %vm2337_vm11, %v2377_v42, %v2379_v29  ;;  %v2383_v45 = vsel %vm2337_vm11, %v2379_v29, %v2381_v15 }
0x2115   : > { %v2386_v12 = vadd.f32 %v2382_v50, %v2364_v24  ;;  %v2387_v7 = vadd.f32 %v2383_v45, %v2365_v28 }
0x2116   : > { %2491 = vrot.lane.b32.xlu1 %v2483_v14, %s3384_s9  ;;  %2489 = vrot.lane.b32.xlu0 %v2482_v52, %s3384_s9 }
0x2117   : > { %2487 = vrot.lane.b32.xlu2 %v2481_v31, %s3384_s9 }
0x2151   : > { %v2399_v62 = vpop.permute.xlu2 %2398 }
0x2159   : > { %v2421_v13 = vpop.permute.xlu2 %2420 }
0x2161   : > { %v2444_v48 = vpop.permute.xlu2 %2443 }
0x2168   : > { %v2401_v8 = vpop.permute.xlu0 %2400  ;;  %v2403_v1 = vpop.permute.xlu1 %2402 }
0x2169   : > { %v2466_v10 = vpop.permute.xlu2 %2465  ;;  %v2404_v54 = vsel %vm2337_vm11, %v2399_v62, %v2401_v8  ;;  %v2405_v35 = vsel %vm2337_vm11, %v2401_v8, %v2403_v1 }
0x216a   : > { %v2408_v21 = vadd.f32 %v2404_v54, %v2386_v12  ;;  %v2409_v17 = vadd.f32 %v2405_v35, %v2387_v7 }
0x2170   : > { %v2423_v23 = vpop.permute.xlu0 %2422  ;;  %v2425_v38 = vpop.permute.xlu1 %2424 }
0x2171   : > { %v2427_v60 = vsel %vm2426_vm12, %v2421_v13, %v2423_v23  ;;  %v2428_v41 = vsel %vm2426_vm12, %v2423_v23, %v2425_v38  ;;  %v2488_v34 = vpop.permute.xlu2 %2487 }
0x2172   : > { %v2431_v57 = vadd.f32 %v2427_v60, %v2408_v21  ;;  %v2432_v59 = vadd.f32 %v2428_v41, %v2409_v17 }
0x2178   : > { %v2446_v43 = vpop.permute.xlu0 %2445  ;;  %v2448_v22 = vpop.permute.xlu1 %2447 }
0x2179   : > { %v2449_v6 = vsel %vm2426_vm12, %v2444_v48, %v2446_v43  ;;  %v2450_v25 = vsel %vm2426_vm12, %v2446_v43, %v2448_v22 }
0x217a   : > { %v2453_v55 = vadd.f32 %v2449_v6, %v2431_v57  ;;  %v2454_v27 = vadd.f32 %v2450_v25, %v2432_v59 }
0x2180   : > { %v2468_v46 = vpop.permute.xlu0 %2467  ;;  %v2470_v20 = vpop.permute.xlu1 %2469 }
0x2181   : > { %v2471_v37 = vsel %vm2426_vm12, %v2466_v10, %v2468_v46  ;;  %v2472_v30 = vsel %vm2426_vm12, %v2468_v46, %v2470_v20 }
0x2182   : > { %v2475_v19 = vadd.f32 %v2471_v37, %v2453_v55  ;;  %v2476_v26 = vadd.f32 %v2472_v30, %v2454_v27 }
0x2188   : > { %v2490_v5 = vpop.permute.xlu0 %2489  ;;  %v2492_v3 = vpop.permute.xlu1 %2491 }
0x2189   : > { %v2493_v33 = vsel %vm2426_vm12, %v2488_v34, %v2490_v5  ;;  %v2494_v16 = vsel %vm2426_vm12, %v2490_v5, %v2492_v3 }
0x218a   : > { %v2497_v18 = vadd.f32 %v2493_v33, %v2475_v19  ;;  %v2498_v39 = vadd.f32 %v2494_v16, %v2476_v26 }
0x218c   : > { %3034 = vlog2.f32 %v2497_v18 }
0x218d   : > { %3036 = vlog2.f32 %v2498_v39 }
0x2192   : > { %v3035_v47 = vpop.eup %3034 }
0x2193   : > { %v3037_v44 = vpop.eup %3036  ;;  %v2501_v58 = vmul.f32 0.6931472, %v3035_v47 }
0x2194   : > { %v2503_v56 = vmul.f32 0.6931472, %v3037_v44 }
0x2195   : > { %v2504_v36 = vadd.f32 %v2501_v58, %v2499_v49 }
0x2196   : > { %v2505_v61 = vadd.f32 %v2503_v56, %v2499_v49 }
0x2197   : > { %v2506_v52 = vmul.f32 0.06666667, %v2504_v36 }
0x2198   : > { %v2507_v14 = vmul.f32 0.06666667, %v2505_v61 }
0x2199   : > { %v2508_v31 = vsub.f32 0.0, %v2506_v52 }
0x219a   : > { %v2509_v0 = vsub.f32 0.0, %v2507_v14 }
0x219b   : > { %2510 = vst [vmem:[%s269_s18] sm:$0xff] %v2508_v31 }
0x219c   : > { %2511 = vst [vmem:[%s269_s18 + $0x8] sm:$0xff] %v2509_v0 }
0x219d   : > { %3155 = shalt.err (!%p3152_p2)
}
0x219e   : > { %2691 = dma.vmem_to_hbm [thread:$0]  (%p3526_p7), %s2529_s19, 256, %s2531_s21, %s2513_s8  }
0x219f PF: > { %s5615_s2 = sld [smem:[#allocation13_spill]]  ;;  %p2711_p10 = scmp.ge.s32.totalorder %s3258_s22, 2 }
0x21a1   : > { %p2705_p13 = pnand %p2711_p10, %p3538_p1 }
0x21a3   : > { %p2706_p0 = pneg %p2705_p13 }
0x21a5   : > { %s2542_s9 = sand.u32 1, %s5615_s2  }
0x21a6   : > { %s2543_s10 = scalar_lea.sflag [#allocation4], %s2542_s9 }
0x21a7   : > { %3213 = dma.done.wait (%p2706_p0), %s2543_s10, 256  }
0x21a8   : > { %3215 = vsyncadd (%p2706_p0), %s2543_s10, 4294967040  ;;  %s22_s22 = sadd.s32 1, %s3258_s22   ;;  %s5617_s26 = smov %s3559_s12 }
0x21a9   : > { %p19_p6 = scmp.ge.s32.totalorder %s22_s22, 6   ;;  %s5618_s20 = sld [smem:[#allocation14_spill]] }
0x21aa   : > { %s5619_s17 = sld [smem:[#allocation19_spill]]  ;;  %s5624_s12 = smov %s3222_s13 }
0x21ab   : > { %s5620_s18 = sld [smem:[#allocation15_spill]]  ;;  %s5625_s13 = smov %s3226_s14 }
0x21ac   : > { %s5621_s19 = sld [smem:[#allocation16_spill]]  ;;  %s5626_s14 = smov %s5617_s26 }
0x21ad   : > { %s5622_s7 = sld [smem:[#allocation17_spill]]  ;;  %s5627_s15 = smov %s3234_s16 }
0x21ae   : > { %s5623_s21 = sld [smem:[#allocation18_spill]] }
0x21af   : > { %s5628_s16 = smov %s5618_s20  ;;  %21 = sbr.rel (!%p19_p6) target bundleno = 14 (0xe), region = 94 }
0x21b3   : > { %s5629_s20 = smov %s5622_s7 }
0x21b4   :  { %2549 = vsyncpa [#allocation3], 1 }
0x21b5   :  { %2551 = vsyncpa [#allocation3 + $0x1], 1 }
0x21b6   :  { %2552 = vsyncpa [#allocation6], 1 }
0x21b7   :  { %2554 = vsyncpa [#allocation6 + $0x1], 1 }
0x21b8   :  { %2555 = vsyncpa [#allocation4], 1 }
0x21b9   :  { %2557 = vsyncpa [#allocation4 + $0x1], 1 }

</bundles_post_ra>
